<compile_context>
chip_gen: v6e
topology: v6e:2x2x1
jax: 0.10.0
libtpu: 0.0.40
codegen_flags: <defaults>
</compile_context>

<pallas_src>
import math
import functools

import jax
import jax.numpy as jnp
import numpy as np
from jax.experimental import pallas as pl
from jax.experimental.pallas import tpu as pltpu

# ---- small, self-consistent hyper-parameters (scaled-down vs. the original) ----
BLOCK_SIZE = 16     # max sequence length (torch: 256)
N_EMBED    = 128    # embedding width    (torch: 384)
N_HEAD     = 4      # attention heads    (torch: 6)
N_LAYER    = 2      # transformer blocks (torch: 6)
VOCAB_SIZE = 128    # |chars|
LN_EPS     = 1e-5
NEG_INF    = -1e30  # large finite negative (avoids -inf/NaN softmax corner cases)


def _layernorm(x, gamma, beta):
    mu  = jnp.mean(x, axis=-1, keepdims=True)
    var = jnp.mean((x - mu) ** 2, axis=-1, keepdims=True)
    return (x - mu) * jax.lax.rsqrt(var + LN_EPS) * gamma + beta


# --------------------------- fused Pallas kernel ------------------------------

def gpt_kernel(x_ref, ln1_g_ref, ln1_b_ref, wqkv_ref, wproj_ref, bproj_ref,
               wfc_ref, bfc_ref, wfc2_ref, bfc2_ref, lnf_g_ref, lnf_b_ref,
               wlm_ref, o_ref, att_vmem, *, batch, seqlen):
    """Entire GPT forward for the whole batch: x (B*T, C) f32 -> logits (B*T, V) f32."""
    B, T = batch, seqlen
    C, H = N_EMBED, N_HEAD
    Dh = C // H
    M = B * T
    scale = 1.0 / math.sqrt(Dh)
    bf16 = jnp.bfloat16

    x = x_ref[...]                                            # (M, C) f32

    # additive causal bias, built once (outside the layer loop)
    row = jax.lax.broadcasted_iota(jnp.int32, (T, T), 0)
    col = jax.lax.broadcasted_iota(jnp.int32, (T, T), 1)
    bias = jnp.where(col <= row, 0.0, NEG_INF).astype(jnp.float32)[None]   # (1, T, T)

    for l in range(N_LAYER):                                  # static unroll (N_LAYER=2)
        g = ln1_g_ref[l]                                      # (1, C)
        b = ln1_b_ref[l]

        # ---- attention branch: x + c_proj(softmax(QK^T/sqrt(d)) V) ----------
        ln1 = _layernorm(x, g, b)                             # f32 elementwise
        qkv = jnp.dot(ln1.astype(bf16), wqkv_ref[l],
                      preferred_element_type=jnp.float32)     # (M, 3C) f32
        q = qkv[:, 0 * C:1 * C].reshape(B, T, C)
        k = qkv[:, 1 * C:2 * C].reshape(B, T, C)
        v = qkv[:, 2 * C:3 * C].reshape(B, T, C)

        for h in range(H):                                    # static unroll over heads
            sl = slice(h * Dh, (h + 1) * Dh)
            qh = q[:, :, sl].astype(bf16)                     # (B, T, Dh)
            kh = k[:, :, sl].astype(bf16)
            vh = v[:, :, sl].astype(bf16)
            s = jnp.einsum('bqd,bkd->bqk', qh, kh,
                           preferred_element_type=jnp.float32) * scale + bias
            s = s - jnp.max(s, axis=-1, keepdims=True)        # f32 softmax
            p = jnp.exp(s)
            p = p / jnp.sum(p, axis=-1, keepdims=True)
            oh = jnp.einsum('bqk,bkd->bqd', p.astype(bf16), vh,
                            preferred_element_type=jnp.float32)   # (B, T, Dh)
            att_vmem[:, sl] = oh.reshape(M, Dh)               # pack heads along lanes

        att = jnp.dot(att_vmem[...].astype(bf16), wproj_ref[l],
                      preferred_element_type=jnp.float32) + bproj_ref[l]
        x = x + att

        # ---- MLP branch (reference reuses ln_1 here, NOT ln_2) ---------------
        ln1b = _layernorm(x, g, b)
        hmid = jnp.dot(ln1b.astype(bf16), wfc_ref[l],
                       preferred_element_type=jnp.float32) + bfc_ref[l]
        hmid = jnp.maximum(hmid, 0.0)                         # ReLU (f32)
        mlp = jnp.dot(hmid.astype(bf16), wfc2_ref[l],
                      preferred_element_type=jnp.float32) + bfc2_ref[l]
        x = x + mlp

    # ---- final LayerNorm + lm_head ------------------------------------------
    xn = _layernorm(x, lnf_g_ref[...], lnf_b_ref[...])
    o_ref[...] = jnp.dot(xn.astype(bf16), wlm_ref[...],
                         preferred_element_type=jnp.float32)  # (M, V)


# --------------------------- wrapper -------------------------------------------

@jax.jit
def small_gpt_forward(idx, params):
    """idx: (B, T) int32 token ids. Returns logits (B, T, VOCAB_SIZE) f32."""
    B, T = idx.shape
    C, V = N_EMBED, VOCAB_SIZE
    # embedding gathers done as JAX glue outside the kernel
    tok = jnp.take(params["wte"], idx, axis=0)                # (B, T, C)
    x = (tok + params["wpe"][:T][None]).astype(jnp.float32).reshape(B * T, C)
    # transformer.drop(p=0.05) and all other dropouts are identity in eval mode

    kernel = functools.partial(gpt_kernel, batch=B, seqlen=T)
    logits = pl.pallas_call(
        kernel,
        out_shape=jax.ShapeDtypeStruct((B * T, V), jnp.float32),
        # no grid: whole (tiny) model lives in VMEM for one kernel invocation
        scratch_shapes=[pltpu.VMEM((B * T, C), jnp.float32)],  # attention head packing
    )(x,
      params["ln1_g"], params["ln1_b"],
      params["w_qkv"], params["w_proj"], params["b_proj"],
      params["w_fc"], params["b_fc"], params["w_fc2"], params["b_fc2"],
      params["lnf_g"], params["lnf_b"], params["w_lm"])
    return logits.reshape(B, T, V)


# --------------------------- deterministic params ------------------------------

def init_params(key):
    C, V, L = N_EMBED, VOCAB_SIZE, N_LAYER
    std = 0.02
    k = jax.random.split(key, 9)

    def w(kk, shape):   # weights stored bf16 (MXU-native, half the DMA bytes)
        return (std * jax.random.normal(kk, shape, jnp.float32)).astype(jnp.bfloat16)

    return {
        "wte": std * jax.random.normal(k[0], (V, C), jnp.float32),
        "wpe": std * jax.random.normal(k[1], (BLOCK_SIZE, C), jnp.float32),
        "lnf_g": jnp.ones((1, C), jnp.float32),
        "lnf_b": jnp.zeros((1, C), jnp.float32),
        "w_lm": w(k[2], (C, V)),
        # per-layer params stacked with leading N_LAYER dim
        "ln1_g": jnp.ones((L, 1, C), jnp.float32),
        "ln1_b": jnp.zeros((L, 1, C), jnp.float32),
        # ln_2 exists in the PyTorch module but is never used in forward()
        "w_qkv": w(k[3], (L, C, 3 * C)),
        "w_proj": w(k[4], (L, C, C)),
        "b_proj": std * jax.random.normal(k[5], (L, 1, C), jnp.float32),
        "w_fc": w(k[6], (L, C, 4 * C)),
        "b_fc": std * jax.random.normal(k[7], (L, 1, 4 * C), jnp.float32),
        "w_fc2": w(k[8], (L, 4 * C, C)),
        "b_fc2": jnp.zeros((L, 1, C), jnp.float32),
    }


# --------------------------- pure-JAX reference (same numerics) -----------------

def ref_forward(idx, params):
    B, T = idx.shape
    C, H, L = N_EMBED, N_HEAD, N_LAYER
    Dh = C // H
    scale = 1.0 / math.sqrt(Dh)
    bf16 = jnp.bfloat16

    x = jnp.take(params["wte"], idx, axis=0) + params["wpe"][:T][None]     # (B, T, C)
    bias = jnp.where(jnp.tril(jnp.ones((T, T), bool)), 0.0, NEG_INF).astype(jnp.float32)

    def ln(z, g, b):
        mu = z.mean(-1, keepdims=True)
        var = ((z - mu) ** 2).mean(-1, keepdims=True)
        return (z - mu) * jax.lax.rsqrt(var + LN_EPS) * g + b

    for l in range(L):
        g, b = params["ln1_g"][l, 0], params["ln1_b"][l, 0]
        qkv = jnp.dot(ln(x, g, b).astype(bf16), params["w_qkv"][l],
                      preferred_element_type=jnp.float32)
        q, k, v = jnp.split(qkv, 3, axis=-1)
        q = q.reshape(B, T, H, Dh).transpose(0, 2, 1, 3)
        k = k.reshape(B, T, H, Dh).transpose(0, 2, 1, 3)
        v = v.reshape(B, T, H, Dh).transpose(0, 2, 1, 3)
        s = jnp.einsum('bhqd,bhkd->bhqk', q.astype(bf16), k.astype(bf16),
                       preferred_element_type=jnp.float32) * scale + bias
        p = jax.nn.softmax(s, axis=-1)
        att = jnp.einsum('bhqk,bhkd->bhqd', p.astype(bf16), v.astype(bf16),
                         preferred_element_type=jnp.float32)
        att = att.transpose(0, 2, 1, 3).reshape(B, T, C)
        att = jnp.dot(att.astype(bf16), params["w_proj"][l],
                      preferred_element_type=jnp.float32) + params["b_proj"][l, 0]
        x = x + att
        h_ = jnp.dot(ln(x, g, b).astype(bf16), params["w_fc"][l],
                     preferred_element_type=jnp.float32) + params["b_fc"][l, 0]
        h_ = jax.nn.relu(h_)
        x = x + jnp.dot(h_.astype(bf16), params["w_fc2"][l],
                        preferred_element_type=jnp.float32) + params["b_fc2"][l, 0]

    xn = ln(x, params["lnf_g"][0], params["lnf_b"][0])
    return jnp.dot(xn.astype(bf16), params["w_lm"], preferred_element_type=jnp.float32)


# --------------------------- main ------------------------------------------------

if __name__ == "__main__":
    B, T = 2, BLOCK_SIZE
    idx = jax.random.randint(jax.random.PRNGKey(0), (B, T), 0, VOCAB_SIZE, dtype=jnp.int32)
    params = init_params(jax.random.PRNGKey(42))

    logits = small_gpt_forward(idx, params)
    logits = jax.block_until_ready(logits)
    assert logits.shape == (B, T, VOCAB_SIZE)

    ref = ref_forward(idx, params)
    np.testing.assert_allclose(np.asarray(logits), np.asarray(ref), atol=2e-3, rtol=2e-3)

    print("KERNEL_OK")
</pallas_src>

<mosaic_0001>
module attributes {stable_mosaic.version = 11 : i64} {
  func.func @gpt_kernel(%arg0: memref<32x128xf32, #tpu.memory_space<vmem>>, %arg1: memref<2x1x128xf32, #tpu.memory_space<vmem>>, %arg2: memref<2x1x128xf32, #tpu.memory_space<vmem>>, %arg3: memref<2x128x384xbf16, #tpu.memory_space<vmem>>, %arg4: memref<2x128x128xbf16, #tpu.memory_space<vmem>>, %arg5: memref<2x1x128xf32, #tpu.memory_space<vmem>>, %arg6: memref<2x128x512xbf16, #tpu.memory_space<vmem>>, %arg7: memref<2x1x512xf32, #tpu.memory_space<vmem>>, %arg8: memref<2x512x128xbf16, #tpu.memory_space<vmem>>, %arg9: memref<2x1x128xf32, #tpu.memory_space<vmem>>, %arg10: memref<1x128xf32, #tpu.memory_space<vmem>>, %arg11: memref<1x128xf32, #tpu.memory_space<vmem>>, %arg12: memref<128x128xbf16, #tpu.memory_space<vmem>>, %arg13: memref<32x128xf32, #tpu.memory_space<vmem>>, %arg14: memref<32x128xf32, #tpu.memory_space<vmem>>) attributes {dimension_semantics = [], scalar_prefetch = 0 : i64, scratch_operands = 1 : i64, tpu.core_type = #tpu.core_type<tc>} {
    %c0 = arith.constant 0 : index
    %c0_0 = arith.constant 0 : index
    %0 = vector.load %arg0[%c0, %c0_0] : memref<32x128xf32, #tpu.memory_space<vmem>>, vector<32x128xf32>
    %1 = tpu.iota {dimensions = array<i32: 0>} : vector<16x16xi32>
    %2 = tpu.iota {dimensions = array<i32: 1>} : vector<16x16xi32>
    %3 = arith.cmpi sle, %2, %1 : vector<16x16xi32>
    %cst = arith.constant 0.000000e+00 : f32
    %cst_1 = arith.constant -1.000000e+30 : f32
    %4 = vector.broadcast %cst : f32 to vector<16x16xf32>
    %5 = vector.broadcast %cst_1 : f32 to vector<16x16xf32>
    %6 = arith.select %3, %4, %5 : vector<16x16xi1>, vector<16x16xf32>
    %7 = vector.shape_cast %6 : vector<16x16xf32> to vector<1x16x16xf32>
    %c0_2 = arith.constant 0 : index
    %c0_3 = arith.constant 0 : index
    %c0_4 = arith.constant 0 : index
    %8 = vector.load %arg1[%c0_2, %c0_3, %c0_4] : memref<2x1x128xf32, #tpu.memory_space<vmem>>, vector<1x1x128xf32>
    %9 = vector.shape_cast %8 : vector<1x1x128xf32> to vector<1x128xf32>
    %c0_5 = arith.constant 0 : index
    %c0_6 = arith.constant 0 : index
    %c0_7 = arith.constant 0 : index
    %10 = vector.load %arg2[%c0_5, %c0_6, %c0_7] : memref<2x1x128xf32, #tpu.memory_space<vmem>>, vector<1x1x128xf32>
    %11 = vector.shape_cast %10 : vector<1x1x128xf32> to vector<1x128xf32>
    %cst_8 = arith.constant dense<0.000000e+00> : vector<32xf32>
    %12 = vector.multi_reduction <add>, %0, %cst_8 [1] : vector<32x128xf32> to vector<32xf32>
    %13 = vector.shape_cast %12 : vector<32xf32> to vector<32x1xf32>
    %cst_9 = arith.constant 1.280000e+02 : f32
    %14 = vector.broadcast %cst_9 : f32 to vector<32x1xf32>
    %15 = arith.divf %13, %14 : vector<32x1xf32>
    %16 = vector.broadcast %15 : vector<32x1xf32> to vector<32x128xf32>
    %17 = arith.subf %0, %16 : vector<32x128xf32>
    %18 = arith.mulf %17, %17 : vector<32x128xf32>
    %cst_10 = arith.constant dense<0.000000e+00> : vector<32xf32>
    %19 = vector.multi_reduction <add>, %18, %cst_10 [1] : vector<32x128xf32> to vector<32xf32>
    %20 = vector.shape_cast %19 : vector<32xf32> to vector<32x1xf32>
    %cst_11 = arith.constant 1.280000e+02 : f32
    %21 = vector.broadcast %cst_11 : f32 to vector<32x1xf32>
    %22 = arith.divf %20, %21 : vector<32x1xf32>
    %23 = vector.broadcast %15 : vector<32x1xf32> to vector<32x128xf32>
    %24 = arith.subf %0, %23 : vector<32x128xf32>
    %cst_12 = arith.constant 9.99999974E-6 : f32
    %25 = vector.broadcast %cst_12 : f32 to vector<32x1xf32>
    %26 = arith.addf %22, %25 : vector<32x1xf32>
    %27 = math.rsqrt %26 : vector<32x1xf32>
    %28 = vector.broadcast %27 : vector<32x1xf32> to vector<32x128xf32>
    %29 = arith.mulf %24, %28 : vector<32x128xf32>
    %30 = vector.broadcast %9 : vector<1x128xf32> to vector<32x128xf32>
    %31 = arith.mulf %29, %30 : vector<32x128xf32>
    %32 = vector.broadcast %11 : vector<1x128xf32> to vector<32x128xf32>
    %33 = arith.addf %31, %32 : vector<32x128xf32>
    %34 = arith.truncf %33 : vector<32x128xf32> to vector<32x128xbf16>
    %c0_13 = arith.constant 0 : index
    %c0_14 = arith.constant 0 : index
    %c0_15 = arith.constant 0 : index
    %35 = vector.load %arg3[%c0_13, %c0_14, %c0_15] : memref<2x128x384xbf16, #tpu.memory_space<vmem>>, vector<1x128x384xbf16>
    %36 = vector.shape_cast %35 : vector<1x128x384xbf16> to vector<128x384xbf16>
    %cst_16 = arith.constant dense<0.000000e+00> : vector<32x384xf32>
    %37 = tpu.matmul %34, %36, %cst_16 {dimension_numbers = #tpu.dot_dimension_numbers<[1], [0], [0], [1], [0, 0, 1, 1], [], []>} : vector<32x128xbf16>, vector<128x384xbf16>, vector<32x384xf32> -> vector<32x384xf32>
    %38 = vector.extract_strided_slice %37 {offsets = [0, 0], sizes = [32, 128], strides = [1, 1]} : vector<32x384xf32> to vector<32x128xf32>
    %39 = vector.shape_cast %38 : vector<32x128xf32> to vector<2x16x128xf32>
    %40 = vector.extract_strided_slice %37 {offsets = [0, 128], sizes = [32, 128], strides = [1, 1]} : vector<32x384xf32> to vector<32x128xf32>
    %41 = vector.shape_cast %40 : vector<32x128xf32> to vector<2x16x128xf32>
    %42 = vector.extract_strided_slice %37 {offsets = [0, 256], sizes = [32, 128], strides = [1, 1]} : vector<32x384xf32> to vector<32x128xf32>
    %43 = vector.shape_cast %42 : vector<32x128xf32> to vector<2x16x128xf32>
    %44 = vector.extract_strided_slice %39 {offsets = [0, 0, 0], sizes = [2, 16, 32], strides = [1, 1, 1]} : vector<2x16x128xf32> to vector<2x16x32xf32>
    %45 = arith.truncf %44 : vector<2x16x32xf32> to vector<2x16x32xbf16>
    %46 = vector.extract_strided_slice %41 {offsets = [0, 0, 0], sizes = [2, 16, 32], strides = [1, 1, 1]} : vector<2x16x128xf32> to vector<2x16x32xf32>
    %47 = arith.truncf %46 : vector<2x16x32xf32> to vector<2x16x32xbf16>
    %48 = vector.extract_strided_slice %43 {offsets = [0, 0, 0], sizes = [2, 16, 32], strides = [1, 1, 1]} : vector<2x16x128xf32> to vector<2x16x32xf32>
    %49 = arith.truncf %48 : vector<2x16x32xf32> to vector<2x16x32xbf16>
    "tpu.trace_start"() <{level = 10 : i32, message = "bqd,bkd->bqk"}> : () -> ()
    %cst_17 = arith.constant dense<0.000000e+00> : vector<2x16x16xf32>
    %50 = tpu.matmul %45, %47, %cst_17 {dimension_numbers = #tpu.dot_dimension_numbers<[2], [2], [1], [1], [0, 0, 0, 1, 1, 1], [0], [0]>} : vector<2x16x32xbf16>, vector<2x16x32xbf16>, vector<2x16x16xf32> -> vector<2x16x16xf32>
    "tpu.trace_stop"() : () -> ()
    %cst_18 = arith.constant 0.176776692 : f32
    %51 = vector.broadcast %cst_18 : f32 to vector<2x16x16xf32>
    %52 = arith.mulf %50, %51 : vector<2x16x16xf32>
    %53 = vector.broadcast %7 : vector<1x16x16xf32> to vector<2x16x16xf32>
    %54 = arith.addf %52, %53 : vector<2x16x16xf32>
    %cst_19 = arith.constant dense<0xFF800000> : vector<2x16xf32>
    %55 = vector.multi_reduction <maximumf>, %54, %cst_19 [2] : vector<2x16x16xf32> to vector<2x16xf32>
    %56 = vector.shape_cast %55 : vector<2x16xf32> to vector<2x16x1xf32>
    %57 = vector.broadcast %56 : vector<2x16x1xf32> to vector<2x16x16xf32>
    %58 = arith.subf %54, %57 : vector<2x16x16xf32>
    %59 = math.exp %58 : vector<2x16x16xf32>
    %cst_20 = arith.constant dense<0.000000e+00> : vector<2x16xf32>
    %60 = vector.multi_reduction <add>, %59, %cst_20 [2] : vector<2x16x16xf32> to vector<2x16xf32>
    %61 = vector.shape_cast %60 : vector<2x16xf32> to vector<2x16x1xf32>
    %62 = vector.broadcast %61 : vector<2x16x1xf32> to vector<2x16x16xf32>
    %63 = arith.divf %59, %62 : vector<2x16x16xf32>
    %64 = arith.truncf %63 : vector<2x16x16xf32> to vector<2x16x16xbf16>
    "tpu.trace_start"() <{level = 10 : i32, message = "bqk,bkd->bqd"}> : () -> ()
    %cst_21 = arith.constant dense<0.000000e+00> : vector<2x16x32xf32>
    %65 = tpu.matmul %64, %49, %cst_21 {dimension_numbers = #tpu.dot_dimension_numbers<[2], [1], [1], [2], [0, 0, 0, 1, 1, 2], [0], [0]>} : vector<2x16x16xbf16>, vector<2x16x32xbf16>, vector<2x16x32xf32> -> vector<2x16x32xf32>
    "tpu.trace_stop"() : () -> ()
    %66 = vector.shape_cast %65 : vector<2x16x32xf32> to vector<32x32xf32>
    %c0_22 = arith.constant 0 : index
    %c0_23 = arith.constant 0 : index
    %67 = vector.load %arg14[%c0_22, %c0_23] : memref<32x128xf32, #tpu.memory_space<vmem>>, vector<32x32xf32>
    tpu.vector_store %arg14[%c0_22, %c0_23], %66 {strides = array<i32>} : memref<32x128xf32, #tpu.memory_space<vmem>>, vector<32x32xf32>,
    %68 = vector.extract_strided_slice %39 {offsets = [0, 0, 32], sizes = [2, 16, 32], strides = [1, 1, 1]} : vector<2x16x128xf32> to vector<2x16x32xf32>
    %69 = arith.truncf %68 : vector<2x16x32xf32> to vector<2x16x32xbf16>
    %70 = vector.extract_strided_slice %41 {offsets = [0, 0, 32], sizes = [2, 16, 32], strides = [1, 1, 1]} : vector<2x16x128xf32> to vector<2x16x32xf32>
    %71 = arith.truncf %70 : vector<2x16x32xf32> to vector<2x16x32xbf16>
    %72 = vector.extract_strided_slice %43 {offsets = [0, 0, 32], sizes = [2, 16, 32], strides = [1, 1, 1]} : vector<2x16x128xf32> to vector<2x16x32xf32>
    %73 = arith.truncf %72 : vector<2x16x32xf32> to vector<2x16x32xbf16>
    "tpu.trace_start"() <{level = 10 : i32, message = "bqd,bkd->bqk"}> : () -> ()
    %cst_24 = arith.constant dense<0.000000e+00> : vector<2x16x16xf32>
    %74 = tpu.matmul %69, %71, %cst_24 {dimension_numbers = #tpu.dot_dimension_numbers<[2], [2], [1], [1], [0, 0, 0, 1, 1, 1], [0], [0]>} : vector<2x16x32xbf16>, vector<2x16x32xbf16>, vector<2x16x16xf32> -> vector<2x16x16xf32>
    "tpu.trace_stop"() : () -> ()
    %cst_25 = arith.constant 0.176776692 : f32
    %75 = vector.broadcast %cst_25 : f32 to vector<2x16x16xf32>
    %76 = arith.mulf %74, %75 : vector<2x16x16xf32>
    %77 = vector.broadcast %7 : vector<1x16x16xf32> to vector<2x16x16xf32>
    %78 = arith.addf %76, %77 : vector<2x16x16xf32>
    %cst_26 = arith.constant dense<0xFF800000> : vector<2x16xf32>
    %79 = vector.multi_reduction <maximumf>, %78, %cst_26 [2] : vector<2x16x16xf32> to vector<2x16xf32>
    %80 = vector.shape_cast %79 : vector<2x16xf32> to vector<2x16x1xf32>
    %81 = vector.broadcast %80 : vector<2x16x1xf32> to vector<2x16x16xf32>
    %82 = arith.subf %78, %81 : vector<2x16x16xf32>
    %83 = math.exp %82 : vector<2x16x16xf32>
    %cst_27 = arith.constant dense<0.000000e+00> : vector<2x16xf32>
    %84 = vector.multi_reduction <add>, %83, %cst_27 [2] : vector<2x16x16xf32> to vector<2x16xf32>
    %85 = vector.shape_cast %84 : vector<2x16xf32> to vector<2x16x1xf32>
    %86 = vector.broadcast %85 : vector<2x16x1xf32> to vector<2x16x16xf32>
    %87 = arith.divf %83, %86 : vector<2x16x16xf32>
    %88 = arith.truncf %87 : vector<2x16x16xf32> to vector<2x16x16xbf16>
    "tpu.trace_start"() <{level = 10 : i32, message = "bqk,bkd->bqd"}> : () -> ()
    %cst_28 = arith.constant dense<0.000000e+00> : vector<2x16x32xf32>
    %89 = tpu.matmul %88, %73, %cst_28 {dimension_numbers = #tpu.dot_dimension_numbers<[2], [1], [1], [2], [0, 0, 0, 1, 1, 2], [0], [0]>} : vector<2x16x16xbf16>, vector<2x16x32xbf16>, vector<2x16x32xf32> -> vector<2x16x32xf32>
    "tpu.trace_stop"() : () -> ()
    %90 = vector.shape_cast %89 : vector<2x16x32xf32> to vector<32x32xf32>
    %c0_29 = arith.constant 0 : index
    %c32 = arith.constant 32 : index
    %91 = vector.load %arg14[%c0_29, %c32] : memref<32x128xf32, #tpu.memory_space<vmem>>, vector<32x32xf32>
    tpu.vector_store %arg14[%c0_29, %c32], %90 {strides = array<i32>} : memref<32x128xf32, #tpu.memory_space<vmem>>, vector<32x32xf32>,
    %92 = vector.extract_strided_slice %39 {offsets = [0, 0, 64], sizes = [2, 16, 32], strides = [1, 1, 1]} : vector<2x16x128xf32> to vector<2x16x32xf32>
    %93 = arith.truncf %92 : vector<2x16x32xf32> to vector<2x16x32xbf16>
    %94 = vector.extract_strided_slice %41 {offsets = [0, 0, 64], sizes = [2, 16, 32], strides = [1, 1, 1]} : vector<2x16x128xf32> to vector<2x16x32xf32>
    %95 = arith.truncf %94 : vector<2x16x32xf32> to vector<2x16x32xbf16>
    %96 = vector.extract_strided_slice %43 {offsets = [0, 0, 64], sizes = [2, 16, 32], strides = [1, 1, 1]} : vector<2x16x128xf32> to vector<2x16x32xf32>
    %97 = arith.truncf %96 : vector<2x16x32xf32> to vector<2x16x32xbf16>
    "tpu.trace_start"() <{level = 10 : i32, message = "bqd,bkd->bqk"}> : () -> ()
    %cst_30 = arith.constant dense<0.000000e+00> : vector<2x16x16xf32>
    %98 = tpu.matmul %93, %95, %cst_30 {dimension_numbers = #tpu.dot_dimension_numbers<[2], [2], [1], [1], [0, 0, 0, 1, 1, 1], [0], [0]>} : vector<2x16x32xbf16>, vector<2x16x32xbf16>, vector<2x16x16xf32> -> vector<2x16x16xf32>
    "tpu.trace_stop"() : () -> ()
    %cst_31 = arith.constant 0.176776692 : f32
    %99 = vector.broadcast %cst_31 : f32 to vector<2x16x16xf32>
    %100 = arith.mulf %98, %99 : vector<2x16x16xf32>
    %101 = vector.broadcast %7 : vector<1x16x16xf32> to vector<2x16x16xf32>
    %102 = arith.addf %100, %101 : vector<2x16x16xf32>
    %cst_32 = arith.constant dense<0xFF800000> : vector<2x16xf32>
    %103 = vector.multi_reduction <maximumf>, %102, %cst_32 [2] : vector<2x16x16xf32> to vector<2x16xf32>
    %104 = vector.shape_cast %103 : vector<2x16xf32> to vector<2x16x1xf32>
    %105 = vector.broadcast %104 : vector<2x16x1xf32> to vector<2x16x16xf32>
    %106 = arith.subf %102, %105 : vector<2x16x16xf32>
    %107 = math.exp %106 : vector<2x16x16xf32>
    %cst_33 = arith.constant dense<0.000000e+00> : vector<2x16xf32>
    %108 = vector.multi_reduction <add>, %107, %cst_33 [2] : vector<2x16x16xf32> to vector<2x16xf32>
    %109 = vector.shape_cast %108 : vector<2x16xf32> to vector<2x16x1xf32>
    %110 = vector.broadcast %109 : vector<2x16x1xf32> to vector<2x16x16xf32>
    %111 = arith.divf %107, %110 : vector<2x16x16xf32>
    %112 = arith.truncf %111 : vector<2x16x16xf32> to vector<2x16x16xbf16>
    "tpu.trace_start"() <{level = 10 : i32, message = "bqk,bkd->bqd"}> : () -> ()
    %cst_34 = arith.constant dense<0.000000e+00> : vector<2x16x32xf32>
    %113 = tpu.matmul %112, %97, %cst_34 {dimension_numbers = #tpu.dot_dimension_numbers<[2], [1], [1], [2], [0, 0, 0, 1, 1, 2], [0], [0]>} : vector<2x16x16xbf16>, vector<2x16x32xbf16>, vector<2x16x32xf32> -> vector<2x16x32xf32>
    "tpu.trace_stop"() : () -> ()
    %114 = vector.shape_cast %113 : vector<2x16x32xf32> to vector<32x32xf32>
    %c0_35 = arith.constant 0 : index
    %c64 = arith.constant 64 : index
    %115 = vector.load %arg14[%c0_35, %c64] : memref<32x128xf32, #tpu.memory_space<vmem>>, vector<32x32xf32>
    tpu.vector_store %arg14[%c0_35, %c64], %114 {strides = array<i32>} : memref<32x128xf32, #tpu.memory_space<vmem>>, vector<32x32xf32>,
    %116 = vector.extract_strided_slice %39 {offsets = [0, 0, 96], sizes = [2, 16, 32], strides = [1, 1, 1]} : vector<2x16x128xf32> to vector<2x16x32xf32>
    %117 = arith.truncf %116 : vector<2x16x32xf32> to vector<2x16x32xbf16>
    %118 = vector.extract_strided_slice %41 {offsets = [0, 0, 96], sizes = [2, 16, 32], strides = [1, 1, 1]} : vector<2x16x128xf32> to vector<2x16x32xf32>
    %119 = arith.truncf %118 : vector<2x16x32xf32> to vector<2x16x32xbf16>
    %120 = vector.extract_strided_slice %43 {offsets = [0, 0, 96], sizes = [2, 16, 32], strides = [1, 1, 1]} : vector<2x16x128xf32> to vector<2x16x32xf32>
    %121 = arith.truncf %120 : vector<2x16x32xf32> to vector<2x16x32xbf16>
    "tpu.trace_start"() <{level = 10 : i32, message = "bqd,bkd->bqk"}> : () -> ()
    %cst_36 = arith.constant dense<0.000000e+00> : vector<2x16x16xf32>
    %122 = tpu.matmul %117, %119, %cst_36 {dimension_numbers = #tpu.dot_dimension_numbers<[2], [2], [1], [1], [0, 0, 0, 1, 1, 1], [0], [0]>} : vector<2x16x32xbf16>, vector<2x16x32xbf16>, vector<2x16x16xf32> -> vector<2x16x16xf32>
    "tpu.trace_stop"() : () -> ()
    %cst_37 = arith.constant 0.176776692 : f32
    %123 = vector.broadcast %cst_37 : f32 to vector<2x16x16xf32>
    %124 = arith.mulf %122, %123 : vector<2x16x16xf32>
    %125 = vector.broadcast %7 : vector<1x16x16xf32> to vector<2x16x16xf32>
    %126 = arith.addf %124, %125 : vector<2x16x16xf32>
    %cst_38 = arith.constant dense<0xFF800000> : vector<2x16xf32>
    %127 = vector.multi_reduction <maximumf>, %126, %cst_38 [2] : vector<2x16x16xf32> to vector<2x16xf32>
    %128 = vector.shape_cast %127 : vector<2x16xf32> to vector<2x16x1xf32>
    %129 = vector.broadcast %128 : vector<2x16x1xf32> to vector<2x16x16xf32>
    %130 = arith.subf %126, %129 : vector<2x16x16xf32>
    %131 = math.exp %130 : vector<2x16x16xf32>
    %cst_39 = arith.constant dense<0.000000e+00> : vector<2x16xf32>
    %132 = vector.multi_reduction <add>, %131, %cst_39 [2] : vector<2x16x16xf32> to vector<2x16xf32>
    %133 = vector.shape_cast %132 : vector<2x16xf32> to vector<2x16x1xf32>
    %134 = vector.broadcast %133 : vector<2x16x1xf32> to vector<2x16x16xf32>
    %135 = arith.divf %131, %134 : vector<2x16x16xf32>
    %136 = arith.truncf %135 : vector<2x16x16xf32> to vector<2x16x16xbf16>
    "tpu.trace_start"() <{level = 10 : i32, message = "bqk,bkd->bqd"}> : () -> ()
    %cst_40 = arith.constant dense<0.000000e+00> : vector<2x16x32xf32>
    %137 = tpu.matmul %136, %121, %cst_40 {dimension_numbers = #tpu.dot_dimension_numbers<[2], [1], [1], [2], [0, 0, 0, 1, 1, 2], [0], [0]>} : vector<2x16x16xbf16>, vector<2x16x32xbf16>, vector<2x16x32xf32> -> vector<2x16x32xf32>
    "tpu.trace_stop"() : () -> ()
    %138 = vector.shape_cast %137 : vector<2x16x32xf32> to vector<32x32xf32>
    %c0_41 = arith.constant 0 : index
    %c96 = arith.constant 96 : index
    %139 = vector.load %arg14[%c0_41, %c96] : memref<32x128xf32, #tpu.memory_space<vmem>>, vector<32x32xf32>
    tpu.vector_store %arg14[%c0_41, %c96], %138 {strides = array<i32>} : memref<32x128xf32, #tpu.memory_space<vmem>>, vector<32x32xf32>,
    %c0_42 = arith.constant 0 : index
    %c0_43 = arith.constant 0 : index
    %140 = vector.load %arg14[%c0_42, %c0_43] : memref<32x128xf32, #tpu.memory_space<vmem>>, vector<32x128xf32>
    %141 = arith.truncf %140 : vector<32x128xf32> to vector<32x128xbf16>
    %c0_44 = arith.constant 0 : index
    %c0_45 = arith.constant 0 : index
    %c0_46 = arith.constant 0 : index
    %142 = vector.load %arg4[%c0_44, %c0_45, %c0_46] : memref<2x128x128xbf16, #tpu.memory_space<vmem>>, vector<1x128x128xbf16>
    %143 = vector.shape_cast %142 : vector<1x128x128xbf16> to vector<128x128xbf16>
    %cst_47 = arith.constant dense<0.000000e+00> : vector<32x128xf32>
    %144 = tpu.matmul %141, %143, %cst_47 {dimension_numbers = #tpu.dot_dimension_numbers<[1], [0], [0], [1], [0, 0, 1, 1], [], []>} : vector<32x128xbf16>, vector<128x128xbf16>, vector<32x128xf32> -> vector<32x128xf32>
    %c0_48 = arith.constant 0 : index
    %c0_49 = arith.constant 0 : index
    %c0_50 = arith.constant 0 : index
    %145 = vector.load %arg5[%c0_48, %c0_49, %c0_50] : memref<2x1x128xf32, #tpu.memory_space<vmem>>, vector<1x1x128xf32>
    %146 = vector.shape_cast %145 : vector<1x1x128xf32> to vector<1x128xf32>
    %147 = vector.broadcast %146 : vector<1x128xf32> to vector<32x128xf32>
    %148 = arith.addf %144, %147 : vector<32x128xf32>
    %149 = arith.addf %0, %148 : vector<32x128xf32>
    %cst_51 = arith.constant dense<0.000000e+00> : vector<32xf32>
    %150 = vector.multi_reduction <add>, %149, %cst_51 [1] : vector<32x128xf32> to vector<32xf32>
    %151 = vector.shape_cast %150 : vector<32xf32> to vector<32x1xf32>
    %cst_52 = arith.constant 1.280000e+02 : f32
    %152 = vector.broadcast %cst_52 : f32 to vector<32x1xf32>
    %153 = arith.divf %151, %152 : vector<32x1xf32>
    %154 = vector.broadcast %153 : vector<32x1xf32> to vector<32x128xf32>
    %155 = arith.subf %149, %154 : vector<32x128xf32>
    %156 = arith.mulf %155, %155 : vector<32x128xf32>
    %cst_53 = arith.constant dense<0.000000e+00> : vector<32xf32>
    %157 = vector.multi_reduction <add>, %156, %cst_53 [1] : vector<32x128xf32> to vector<32xf32>
    %158 = vector.shape_cast %157 : vector<32xf32> to vector<32x1xf32>
    %cst_54 = arith.constant 1.280000e+02 : f32
    %159 = vector.broadcast %cst_54 : f32 to vector<32x1xf32>
    %160 = arith.divf %158, %159 : vector<32x1xf32>
    %161 = vector.broadcast %153 : vector<32x1xf32> to vector<32x128xf32>
    %162 = arith.subf %149, %161 : vector<32x128xf32>
    %cst_55 = arith.constant 9.99999974E-6 : f32
    %163 = vector.broadcast %cst_55 : f32 to vector<32x1xf32>
    %164 = arith.addf %160, %163 : vector<32x1xf32>
    %165 = math.rsqrt %164 : vector<32x1xf32>
    %166 = vector.broadcast %165 : vector<32x1xf32> to vector<32x128xf32>
    %167 = arith.mulf %162, %166 : vector<32x128xf32>
    %168 = vector.broadcast %9 : vector<1x128xf32> to vector<32x128xf32>
    %169 = arith.mulf %167, %168 : vector<32x128xf32>
    %170 = vector.broadcast %11 : vector<1x128xf32> to vector<32x128xf32>
    %171 = arith.addf %169, %170 : vector<32x128xf32>
    %172 = arith.truncf %171 : vector<32x128xf32> to vector<32x128xbf16>
    %c0_56 = arith.constant 0 : index
    %c0_57 = arith.constant 0 : index
    %c0_58 = arith.constant 0 : index
    %173 = vector.load %arg6[%c0_56, %c0_57, %c0_58] : memref<2x128x512xbf16, #tpu.memory_space<vmem>>, vector<1x128x512xbf16>
    %174 = vector.shape_cast %173 : vector<1x128x512xbf16> to vector<128x512xbf16>
    %cst_59 = arith.constant dense<0.000000e+00> : vector<32x512xf32>
    %175 = tpu.matmul %172, %174, %cst_59 {dimension_numbers = #tpu.dot_dimension_numbers<[1], [0], [0], [1], [0, 0, 1, 1], [], []>} : vector<32x128xbf16>, vector<128x512xbf16>, vector<32x512xf32> -> vector<32x512xf32>
    %c0_60 = arith.constant 0 : index
    %c0_61 = arith.constant 0 : index
    %c0_62 = arith.constant 0 : index
    %176 = vector.load %arg7[%c0_60, %c0_61, %c0_62] : memref<2x1x512xf32, #tpu.memory_space<vmem>>, vector<1x1x512xf32>
    %177 = vector.shape_cast %176 : vector<1x1x512xf32> to vector<1x512xf32>
    %178 = vector.broadcast %177 : vector<1x512xf32> to vector<32x512xf32>
    %179 = arith.addf %175, %178 : vector<32x512xf32>
    %cst_63 = arith.constant 0.000000e+00 : f32
    %180 = vector.broadcast %cst_63 : f32 to vector<32x512xf32>
    %181 = arith.maximumf %179, %180 : vector<32x512xf32>
    %182 = arith.truncf %181 : vector<32x512xf32> to vector<32x512xbf16>
    %c0_64 = arith.constant 0 : index
    %c0_65 = arith.constant 0 : index
    %c0_66 = arith.constant 0 : index
    %183 = vector.load %arg8[%c0_64, %c0_65, %c0_66] : memref<2x512x128xbf16, #tpu.memory_space<vmem>>, vector<1x512x128xbf16>
    %184 = vector.shape_cast %183 : vector<1x512x128xbf16> to vector<512x128xbf16>
    %cst_67 = arith.constant dense<0.000000e+00> : vector<32x128xf32>
    %185 = tpu.matmul %182, %184, %cst_67 {dimension_numbers = #tpu.dot_dimension_numbers<[1], [0], [0], [1], [0, 0, 1, 1], [], []>} : vector<32x512xbf16>, vector<512x128xbf16>, vector<32x128xf32> -> vector<32x128xf32>
    %c0_68 = arith.constant 0 : index
    %c0_69 = arith.constant 0 : index
    %c0_70 = arith.constant 0 : index
    %186 = vector.load %arg9[%c0_68, %c0_69, %c0_70] : memref<2x1x128xf32, #tpu.memory_space<vmem>>, vector<1x1x128xf32>
    %187 = vector.shape_cast %186 : vector<1x1x128xf32> to vector<1x128xf32>
    %188 = vector.broadcast %187 : vector<1x128xf32> to vector<32x128xf32>
    %189 = arith.addf %185, %188 : vector<32x128xf32>
    %190 = arith.addf %149, %189 : vector<32x128xf32>
    %c1 = arith.constant 1 : index
    %c0_71 = arith.constant 0 : index
    %c0_72 = arith.constant 0 : index
    %191 = vector.load %arg1[%c1, %c0_71, %c0_72] : memref<2x1x128xf32, #tpu.memory_space<vmem>>, vector<1x1x128xf32>
    %192 = vector.shape_cast %191 : vector<1x1x128xf32> to vector<1x128xf32>
    %c1_73 = arith.constant 1 : index
    %c0_74 = arith.constant 0 : index
    %c0_75 = arith.constant 0 : index
    %193 = vector.load %arg2[%c1_73, %c0_74, %c0_75] : memref<2x1x128xf32, #tpu.memory_space<vmem>>, vector<1x1x128xf32>
    %194 = vector.shape_cast %193 : vector<1x1x128xf32> to vector<1x128xf32>
    %cst_76 = arith.constant dense<0.000000e+00> : vector<32xf32>
    %195 = vector.multi_reduction <add>, %190, %cst_76 [1] : vector<32x128xf32> to vector<32xf32>
    %196 = vector.shape_cast %195 : vector<32xf32> to vector<32x1xf32>
    %cst_77 = arith.constant 1.280000e+02 : f32
    %197 = vector.broadcast %cst_77 : f32 to vector<32x1xf32>
    %198 = arith.divf %196, %197 : vector<32x1xf32>
    %199 = vector.broadcast %198 : vector<32x1xf32> to vector<32x128xf32>
    %200 = arith.subf %190, %199 : vector<32x128xf32>
    %201 = arith.mulf %200, %200 : vector<32x128xf32>
    %cst_78 = arith.constant dense<0.000000e+00> : vector<32xf32>
    %202 = vector.multi_reduction <add>, %201, %cst_78 [1] : vector<32x128xf32> to vector<32xf32>
    %203 = vector.shape_cast %202 : vector<32xf32> to vector<32x1xf32>
    %cst_79 = arith.constant 1.280000e+02 : f32
    %204 = vector.broadcast %cst_79 : f32 to vector<32x1xf32>
    %205 = arith.divf %203, %204 : vector<32x1xf32>
    %206 = vector.broadcast %198 : vector<32x1xf32> to vector<32x128xf32>
    %207 = arith.subf %190, %206 : vector<32x128xf32>
    %cst_80 = arith.constant 9.99999974E-6 : f32
    %208 = vector.broadcast %cst_80 : f32 to vector<32x1xf32>
    %209 = arith.addf %205, %208 : vector<32x1xf32>
    %210 = math.rsqrt %209 : vector<32x1xf32>
    %211 = vector.broadcast %210 : vector<32x1xf32> to vector<32x128xf32>
    %212 = arith.mulf %207, %211 : vector<32x128xf32>
    %213 = vector.broadcast %192 : vector<1x128xf32> to vector<32x128xf32>
    %214 = arith.mulf %212, %213 : vector<32x128xf32>
    %215 = vector.broadcast %194 : vector<1x128xf32> to vector<32x128xf32>
    %216 = arith.addf %214, %215 : vector<32x128xf32>
    %217 = arith.truncf %216 : vector<32x128xf32> to vector<32x128xbf16>
    %c1_81 = arith.constant 1 : index
    %c0_82 = arith.constant 0 : index
    %c0_83 = arith.constant 0 : index
    %218 = vector.load %arg3[%c1_81, %c0_82, %c0_83] : memref<2x128x384xbf16, #tpu.memory_space<vmem>>, vector<1x128x384xbf16>
    %219 = vector.shape_cast %218 : vector<1x128x384xbf16> to vector<128x384xbf16>
    %cst_84 = arith.constant dense<0.000000e+00> : vector<32x384xf32>
    %220 = tpu.matmul %217, %219, %cst_84 {dimension_numbers = #tpu.dot_dimension_numbers<[1], [0], [0], [1], [0, 0, 1, 1], [], []>} : vector<32x128xbf16>, vector<128x384xbf16>, vector<32x384xf32> -> vector<32x384xf32>
    %221 = vector.extract_strided_slice %220 {offsets = [0, 0], sizes = [32, 128], strides = [1, 1]} : vector<32x384xf32> to vector<32x128xf32>
    %222 = vector.shape_cast %221 : vector<32x128xf32> to vector<2x16x128xf32>
    %223 = vector.extract_strided_slice %220 {offsets = [0, 128], sizes = [32, 128], strides = [1, 1]} : vector<32x384xf32> to vector<32x128xf32>
    %224 = vector.shape_cast %223 : vector<32x128xf32> to vector<2x16x128xf32>
    %225 = vector.extract_strided_slice %220 {offsets = [0, 256], sizes = [32, 128], strides = [1, 1]} : vector<32x384xf32> to vector<32x128xf32>
    %226 = vector.shape_cast %225 : vector<32x128xf32> to vector<2x16x128xf32>
    %227 = vector.extract_strided_slice %222 {offsets = [0, 0, 0], sizes = [2, 16, 32], strides = [1, 1, 1]} : vector<2x16x128xf32> to vector<2x16x32xf32>
    %228 = arith.truncf %227 : vector<2x16x32xf32> to vector<2x16x32xbf16>
    %229 = vector.extract_strided_slice %224 {offsets = [0, 0, 0], sizes = [2, 16, 32], strides = [1, 1, 1]} : vector<2x16x128xf32> to vector<2x16x32xf32>
    %230 = arith.truncf %229 : vector<2x16x32xf32> to vector<2x16x32xbf16>
    %231 = vector.extract_strided_slice %226 {offsets = [0, 0, 0], sizes = [2, 16, 32], strides = [1, 1, 1]} : vector<2x16x128xf32> to vector<2x16x32xf32>
    %232 = arith.truncf %231 : vector<2x16x32xf32> to vector<2x16x32xbf16>
    "tpu.trace_start"() <{level = 10 : i32, message = "bqd,bkd->bqk"}> : () -> ()
    %cst_85 = arith.constant dense<0.000000e+00> : vector<2x16x16xf32>
    %233 = tpu.matmul %228, %230, %cst_85 {dimension_numbers = #tpu.dot_dimension_numbers<[2], [2], [1], [1], [0, 0, 0, 1, 1, 1], [0], [0]>} : vector<2x16x32xbf16>, vector<2x16x32xbf16>, vector<2x16x16xf32> -> vector<2x16x16xf32>
    "tpu.trace_stop"() : () -> ()
    %cst_86 = arith.constant 0.176776692 : f32
    %234 = vector.broadcast %cst_86 : f32 to vector<2x16x16xf32>
    %235 = arith.mulf %233, %234 : vector<2x16x16xf32>
    %236 = vector.broadcast %7 : vector<1x16x16xf32> to vector<2x16x16xf32>
    %237 = arith.addf %235, %236 : vector<2x16x16xf32>
    %cst_87 = arith.constant dense<0xFF800000> : vector<2x16xf32>
    %238 = vector.multi_reduction <maximumf>, %237, %cst_87 [2] : vector<2x16x16xf32> to vector<2x16xf32>
    %239 = vector.shape_cast %238 : vector<2x16xf32> to vector<2x16x1xf32>
    %240 = vector.broadcast %239 : vector<2x16x1xf32> to vector<2x16x16xf32>
    %241 = arith.subf %237, %240 : vector<2x16x16xf32>
    %242 = math.exp %241 : vector<2x16x16xf32>
    %cst_88 = arith.constant dense<0.000000e+00> : vector<2x16xf32>
    %243 = vector.multi_reduction <add>, %242, %cst_88 [2] : vector<2x16x16xf32> to vector<2x16xf32>
    %244 = vector.shape_cast %243 : vector<2x16xf32> to vector<2x16x1xf32>
    %245 = vector.broadcast %244 : vector<2x16x1xf32> to vector<2x16x16xf32>
    %246 = arith.divf %242, %245 : vector<2x16x16xf32>
    %247 = arith.truncf %246 : vector<2x16x16xf32> to vector<2x16x16xbf16>
    "tpu.trace_start"() <{level = 10 : i32, message = "bqk,bkd->bqd"}> : () -> ()
    %cst_89 = arith.constant dense<0.000000e+00> : vector<2x16x32xf32>
    %248 = tpu.matmul %247, %232, %cst_89 {dimension_numbers = #tpu.dot_dimension_numbers<[2], [1], [1], [2], [0, 0, 0, 1, 1, 2], [0], [0]>} : vector<2x16x16xbf16>, vector<2x16x32xbf16>, vector<2x16x32xf32> -> vector<2x16x32xf32>
    "tpu.trace_stop"() : () -> ()
    %249 = vector.shape_cast %248 : vector<2x16x32xf32> to vector<32x32xf32>
    %c0_90 = arith.constant 0 : index
    %c0_91 = arith.constant 0 : index
    %250 = vector.load %arg14[%c0_90, %c0_91] : memref<32x128xf32, #tpu.memory_space<vmem>>, vector<32x32xf32>
    tpu.vector_store %arg14[%c0_90, %c0_91], %249 {strides = array<i32>} : memref<32x128xf32, #tpu.memory_space<vmem>>, vector<32x32xf32>,
    %251 = vector.extract_strided_slice %222 {offsets = [0, 0, 32], sizes = [2, 16, 32], strides = [1, 1, 1]} : vector<2x16x128xf32> to vector<2x16x32xf32>
    %252 = arith.truncf %251 : vector<2x16x32xf32> to vector<2x16x32xbf16>
    %253 = vector.extract_strided_slice %224 {offsets = [0, 0, 32], sizes = [2, 16, 32], strides = [1, 1, 1]} : vector<2x16x128xf32> to vector<2x16x32xf32>
    %254 = arith.truncf %253 : vector<2x16x32xf32> to vector<2x16x32xbf16>
    %255 = vector.extract_strided_slice %226 {offsets = [0, 0, 32], sizes = [2, 16, 32], strides = [1, 1, 1]} : vector<2x16x128xf32> to vector<2x16x32xf32>
    %256 = arith.truncf %255 : vector<2x16x32xf32> to vector<2x16x32xbf16>
    "tpu.trace_start"() <{level = 10 : i32, message = "bqd,bkd->bqk"}> : () -> ()
    %cst_92 = arith.constant dense<0.000000e+00> : vector<2x16x16xf32>
    %257 = tpu.matmul %252, %254, %cst_92 {dimension_numbers = #tpu.dot_dimension_numbers<[2], [2], [1], [1], [0, 0, 0, 1, 1, 1], [0], [0]>} : vector<2x16x32xbf16>, vector<2x16x32xbf16>, vector<2x16x16xf32> -> vector<2x16x16xf32>
    "tpu.trace_stop"() : () -> ()
    %cst_93 = arith.constant 0.176776692 : f32
    %258 = vector.broadcast %cst_93 : f32 to vector<2x16x16xf32>
    %259 = arith.mulf %257, %258 : vector<2x16x16xf32>
    %260 = vector.broadcast %7 : vector<1x16x16xf32> to vector<2x16x16xf32>
    %261 = arith.addf %259, %260 : vector<2x16x16xf32>
    %cst_94 = arith.constant dense<0xFF800000> : vector<2x16xf32>
    %262 = vector.multi_reduction <maximumf>, %261, %cst_94 [2] : vector<2x16x16xf32> to vector<2x16xf32>
    %263 = vector.shape_cast %262 : vector<2x16xf32> to vector<2x16x1xf32>
    %264 = vector.broadcast %263 : vector<2x16x1xf32> to vector<2x16x16xf32>
    %265 = arith.subf %261, %264 : vector<2x16x16xf32>
    %266 = math.exp %265 : vector<2x16x16xf32>
    %cst_95 = arith.constant dense<0.000000e+00> : vector<2x16xf32>
    %267 = vector.multi_reduction <add>, %266, %cst_95 [2] : vector<2x16x16xf32> to vector<2x16xf32>
    %268 = vector.shape_cast %267 : vector<2x16xf32> to vector<2x16x1xf32>
    %269 = vector.broadcast %268 : vector<2x16x1xf32> to vector<2x16x16xf32>
    %270 = arith.divf %266, %269 : vector<2x16x16xf32>
    %271 = arith.truncf %270 : vector<2x16x16xf32> to vector<2x16x16xbf16>
    "tpu.trace_start"() <{level = 10 : i32, message = "bqk,bkd->bqd"}> : () -> ()
    %cst_96 = arith.constant dense<0.000000e+00> : vector<2x16x32xf32>
    %272 = tpu.matmul %271, %256, %cst_96 {dimension_numbers = #tpu.dot_dimension_numbers<[2], [1], [1], [2], [0, 0, 0, 1, 1, 2], [0], [0]>} : vector<2x16x16xbf16>, vector<2x16x32xbf16>, vector<2x16x32xf32> -> vector<2x16x32xf32>
    "tpu.trace_stop"() : () -> ()
    %273 = vector.shape_cast %272 : vector<2x16x32xf32> to vector<32x32xf32>
    %c0_97 = arith.constant 0 : index
    %c32_98 = arith.constant 32 : index
    %274 = vector.load %arg14[%c0_97, %c32_98] : memref<32x128xf32, #tpu.memory_space<vmem>>, vector<32x32xf32>
    tpu.vector_store %arg14[%c0_97, %c32_98], %273 {strides = array<i32>} : memref<32x128xf32, #tpu.memory_space<vmem>>, vector<32x32xf32>,
    %275 = vector.extract_strided_slice %222 {offsets = [0, 0, 64], sizes = [2, 16, 32], strides = [1, 1, 1]} : vector<2x16x128xf32> to vector<2x16x32xf32>
    %276 = arith.truncf %275 : vector<2x16x32xf32> to vector<2x16x32xbf16>
    %277 = vector.extract_strided_slice %224 {offsets = [0, 0, 64], sizes = [2, 16, 32], strides = [1, 1, 1]} : vector<2x16x128xf32> to vector<2x16x32xf32>
    %278 = arith.truncf %277 : vector<2x16x32xf32> to vector<2x16x32xbf16>
    %279 = vector.extract_strided_slice %226 {offsets = [0, 0, 64], sizes = [2, 16, 32], strides = [1, 1, 1]} : vector<2x16x128xf32> to vector<2x16x32xf32>
    %280 = arith.truncf %279 : vector<2x16x32xf32> to vector<2x16x32xbf16>
    "tpu.trace_start"() <{level = 10 : i32, message = "bqd,bkd->bqk"}> : () -> ()
    %cst_99 = arith.constant dense<0.000000e+00> : vector<2x16x16xf32>
    %281 = tpu.matmul %276, %278, %cst_99 {dimension_numbers = #tpu.dot_dimension_numbers<[2], [2], [1], [1], [0, 0, 0, 1, 1, 1], [0], [0]>} : vector<2x16x32xbf16>, vector<2x16x32xbf16>, vector<2x16x16xf32> -> vector<2x16x16xf32>
    "tpu.trace_stop"() : () -> ()
    %cst_100 = arith.constant 0.176776692 : f32
    %282 = vector.broadcast %cst_100 : f32 to vector<2x16x16xf32>
    %283 = arith.mulf %281, %282 : vector<2x16x16xf32>
    %284 = vector.broadcast %7 : vector<1x16x16xf32> to vector<2x16x16xf32>
    %285 = arith.addf %283, %284 : vector<2x16x16xf32>
    %cst_101 = arith.constant dense<0xFF800000> : vector<2x16xf32>
    %286 = vector.multi_reduction <maximumf>, %285, %cst_101 [2] : vector<2x16x16xf32> to vector<2x16xf32>
    %287 = vector.shape_cast %286 : vector<2x16xf32> to vector<2x16x1xf32>
    %288 = vector.broadcast %287 : vector<2x16x1xf32> to vector<2x16x16xf32>
    %289 = arith.subf %285, %288 : vector<2x16x16xf32>
    %290 = math.exp %289 : vector<2x16x16xf32>
    %cst_102 = arith.constant dense<0.000000e+00> : vector<2x16xf32>
    %291 = vector.multi_reduction <add>, %290, %cst_102 [2] : vector<2x16x16xf32> to vector<2x16xf32>
    %292 = vector.shape_cast %291 : vector<2x16xf32> to vector<2x16x1xf32>
    %293 = vector.broadcast %292 : vector<2x16x1xf32> to vector<2x16x16xf32>
    %294 = arith.divf %290, %293 : vector<2x16x16xf32>
    %295 = arith.truncf %294 : vector<2x16x16xf32> to vector<2x16x16xbf16>
    "tpu.trace_start"() <{level = 10 : i32, message = "bqk,bkd->bqd"}> : () -> ()
    %cst_103 = arith.constant dense<0.000000e+00> : vector<2x16x32xf32>
    %296 = tpu.matmul %295, %280, %cst_103 {dimension_numbers = #tpu.dot_dimension_numbers<[2], [1], [1], [2], [0, 0, 0, 1, 1, 2], [0], [0]>} : vector<2x16x16xbf16>, vector<2x16x32xbf16>, vector<2x16x32xf32> -> vector<2x16x32xf32>
    "tpu.trace_stop"() : () -> ()
    %297 = vector.shape_cast %296 : vector<2x16x32xf32> to vector<32x32xf32>
    %c0_104 = arith.constant 0 : index
    %c64_105 = arith.constant 64 : index
    %298 = vector.load %arg14[%c0_104, %c64_105] : memref<32x128xf32, #tpu.memory_space<vmem>>, vector<32x32xf32>
    tpu.vector_store %arg14[%c0_104, %c64_105], %297 {strides = array<i32>} : memref<32x128xf32, #tpu.memory_space<vmem>>, vector<32x32xf32>,
    %299 = vector.extract_strided_slice %222 {offsets = [0, 0, 96], sizes = [2, 16, 32], strides = [1, 1, 1]} : vector<2x16x128xf32> to vector<2x16x32xf32>
    %300 = arith.truncf %299 : vector<2x16x32xf32> to vector<2x16x32xbf16>
    %301 = vector.extract_strided_slice %224 {offsets = [0, 0, 96], sizes = [2, 16, 32], strides = [1, 1, 1]} : vector<2x16x128xf32> to vector<2x16x32xf32>
    %302 = arith.truncf %301 : vector<2x16x32xf32> to vector<2x16x32xbf16>
    %303 = vector.extract_strided_slice %226 {offsets = [0, 0, 96], sizes = [2, 16, 32], strides = [1, 1, 1]} : vector<2x16x128xf32> to vector<2x16x32xf32>
    %304 = arith.truncf %303 : vector<2x16x32xf32> to vector<2x16x32xbf16>
    "tpu.trace_start"() <{level = 10 : i32, message = "bqd,bkd->bqk"}> : () -> ()
    %cst_106 = arith.constant dense<0.000000e+00> : vector<2x16x16xf32>
    %305 = tpu.matmul %300, %302, %cst_106 {dimension_numbers = #tpu.dot_dimension_numbers<[2], [2], [1], [1], [0, 0, 0, 1, 1, 1], [0], [0]>} : vector<2x16x32xbf16>, vector<2x16x32xbf16>, vector<2x16x16xf32> -> vector<2x16x16xf32>
    "tpu.trace_stop"() : () -> ()
    %cst_107 = arith.constant 0.176776692 : f32
    %306 = vector.broadcast %cst_107 : f32 to vector<2x16x16xf32>
    %307 = arith.mulf %305, %306 : vector<2x16x16xf32>
    %308 = vector.broadcast %7 : vector<1x16x16xf32> to vector<2x16x16xf32>
    %309 = arith.addf %307, %308 : vector<2x16x16xf32>
    %cst_108 = arith.constant dense<0xFF800000> : vector<2x16xf32>
    %310 = vector.multi_reduction <maximumf>, %309, %cst_108 [2] : vector<2x16x16xf32> to vector<2x16xf32>
    %311 = vector.shape_cast %310 : vector<2x16xf32> to vector<2x16x1xf32>
    %312 = vector.broadcast %311 : vector<2x16x1xf32> to vector<2x16x16xf32>
    %313 = arith.subf %309, %312 : vector<2x16x16xf32>
    %314 = math.exp %313 : vector<2x16x16xf32>
    %cst_109 = arith.constant dense<0.000000e+00> : vector<2x16xf32>
    %315 = vector.multi_reduction <add>, %314, %cst_109 [2] : vector<2x16x16xf32> to vector<2x16xf32>
    %316 = vector.shape_cast %315 : vector<2x16xf32> to vector<2x16x1xf32>
    %317 = vector.broadcast %316 : vector<2x16x1xf32> to vector<2x16x16xf32>
    %318 = arith.divf %314, %317 : vector<2x16x16xf32>
    %319 = arith.truncf %318 : vector<2x16x16xf32> to vector<2x16x16xbf16>
    "tpu.trace_start"() <{level = 10 : i32, message = "bqk,bkd->bqd"}> : () -> ()
    %cst_110 = arith.constant dense<0.000000e+00> : vector<2x16x32xf32>
    %320 = tpu.matmul %319, %304, %cst_110 {dimension_numbers = #tpu.dot_dimension_numbers<[2], [1], [1], [2], [0, 0, 0, 1, 1, 2], [0], [0]>} : vector<2x16x16xbf16>, vector<2x16x32xbf16>, vector<2x16x32xf32> -> vector<2x16x32xf32>
    "tpu.trace_stop"() : () -> ()
    %321 = vector.shape_cast %320 : vector<2x16x32xf32> to vector<32x32xf32>
    %c0_111 = arith.constant 0 : index
    %c96_112 = arith.constant 96 : index
    %322 = vector.load %arg14[%c0_111, %c96_112] : memref<32x128xf32, #tpu.memory_space<vmem>>, vector<32x32xf32>
    tpu.vector_store %arg14[%c0_111, %c96_112], %321 {strides = array<i32>} : memref<32x128xf32, #tpu.memory_space<vmem>>, vector<32x32xf32>,
    %c0_113 = arith.constant 0 : index
    %c0_114 = arith.constant 0 : index
    %323 = vector.load %arg14[%c0_113, %c0_114] : memref<32x128xf32, #tpu.memory_space<vmem>>, vector<32x128xf32>
    %324 = arith.truncf %323 : vector<32x128xf32> to vector<32x128xbf16>
    %c1_115 = arith.constant 1 : index
    %c0_116 = arith.constant 0 : index
    %c0_117 = arith.constant 0 : index
    %325 = vector.load %arg4[%c1_115, %c0_116, %c0_117] : memref<2x128x128xbf16, #tpu.memory_space<vmem>>, vector<1x128x128xbf16>
    %326 = vector.shape_cast %325 : vector<1x128x128xbf16> to vector<128x128xbf16>
    %cst_118 = arith.constant dense<0.000000e+00> : vector<32x128xf32>
    %327 = tpu.matmul %324, %326, %cst_118 {dimension_numbers = #tpu.dot_dimension_numbers<[1], [0], [0], [1], [0, 0, 1, 1], [], []>} : vector<32x128xbf16>, vector<128x128xbf16>, vector<32x128xf32> -> vector<32x128xf32>
    %c1_119 = arith.constant 1 : index
    %c0_120 = arith.constant 0 : index
    %c0_121 = arith.constant 0 : index
    %328 = vector.load %arg5[%c1_119, %c0_120, %c0_121] : memref<2x1x128xf32, #tpu.memory_space<vmem>>, vector<1x1x128xf32>
    %329 = vector.shape_cast %328 : vector<1x1x128xf32> to vector<1x128xf32>
    %330 = vector.broadcast %329 : vector<1x128xf32> to vector<32x128xf32>
    %331 = arith.addf %327, %330 : vector<32x128xf32>
    %332 = arith.addf %190, %331 : vector<32x128xf32>
    %cst_122 = arith.constant dense<0.000000e+00> : vector<32xf32>
    %333 = vector.multi_reduction <add>, %332, %cst_122 [1] : vector<32x128xf32> to vector<32xf32>
    %334 = vector.shape_cast %333 : vector<32xf32> to vector<32x1xf32>
    %cst_123 = arith.constant 1.280000e+02 : f32
    %335 = vector.broadcast %cst_123 : f32 to vector<32x1xf32>
    %336 = arith.divf %334, %335 : vector<32x1xf32>
    %337 = vector.broadcast %336 : vector<32x1xf32> to vector<32x128xf32>
    %338 = arith.subf %332, %337 : vector<32x128xf32>
    %339 = arith.mulf %338, %338 : vector<32x128xf32>
    %cst_124 = arith.constant dense<0.000000e+00> : vector<32xf32>
    %340 = vector.multi_reduction <add>, %339, %cst_124 [1] : vector<32x128xf32> to vector<32xf32>
    %341 = vector.shape_cast %340 : vector<32xf32> to vector<32x1xf32>
    %cst_125 = arith.constant 1.280000e+02 : f32
    %342 = vector.broadcast %cst_125 : f32 to vector<32x1xf32>
    %343 = arith.divf %341, %342 : vector<32x1xf32>
    %344 = vector.broadcast %336 : vector<32x1xf32> to vector<32x128xf32>
    %345 = arith.subf %332, %344 : vector<32x128xf32>
    %cst_126 = arith.constant 9.99999974E-6 : f32
    %346 = vector.broadcast %cst_126 : f32 to vector<32x1xf32>
    %347 = arith.addf %343, %346 : vector<32x1xf32>
    %348 = math.rsqrt %347 : vector<32x1xf32>
    %349 = vector.broadcast %348 : vector<32x1xf32> to vector<32x128xf32>
    %350 = arith.mulf %345, %349 : vector<32x128xf32>
    %351 = vector.broadcast %192 : vector<1x128xf32> to vector<32x128xf32>
    %352 = arith.mulf %350, %351 : vector<32x128xf32>
    %353 = vector.broadcast %194 : vector<1x128xf32> to vector<32x128xf32>
    %354 = arith.addf %352, %353 : vector<32x128xf32>
    %355 = arith.truncf %354 : vector<32x128xf32> to vector<32x128xbf16>
    %c1_127 = arith.constant 1 : index
    %c0_128 = arith.constant 0 : index
    %c0_129 = arith.constant 0 : index
    %356 = vector.load %arg6[%c1_127, %c0_128, %c0_129] : memref<2x128x512xbf16, #tpu.memory_space<vmem>>, vector<1x128x512xbf16>
    %357 = vector.shape_cast %356 : vector<1x128x512xbf16> to vector<128x512xbf16>
    %cst_130 = arith.constant dense<0.000000e+00> : vector<32x512xf32>
    %358 = tpu.matmul %355, %357, %cst_130 {dimension_numbers = #tpu.dot_dimension_numbers<[1], [0], [0], [1], [0, 0, 1, 1], [], []>} : vector<32x128xbf16>, vector<128x512xbf16>, vector<32x512xf32> -> vector<32x512xf32>
    %c1_131 = arith.constant 1 : index
    %c0_132 = arith.constant 0 : index
    %c0_133 = arith.constant 0 : index
    %359 = vector.load %arg7[%c1_131, %c0_132, %c0_133] : memref<2x1x512xf32, #tpu.memory_space<vmem>>, vector<1x1x512xf32>
    %360 = vector.shape_cast %359 : vector<1x1x512xf32> to vector<1x512xf32>
    %361 = vector.broadcast %360 : vector<1x512xf32> to vector<32x512xf32>
    %362 = arith.addf %358, %361 : vector<32x512xf32>
    %cst_134 = arith.constant 0.000000e+00 : f32
    %363 = vector.broadcast %cst_134 : f32 to vector<32x512xf32>
    %364 = arith.maximumf %362, %363 : vector<32x512xf32>
    %365 = arith.truncf %364 : vector<32x512xf32> to vector<32x512xbf16>
    %c1_135 = arith.constant 1 : index
    %c0_136 = arith.constant 0 : index
    %c0_137 = arith.constant 0 : index
    %366 = vector.load %arg8[%c1_135, %c0_136, %c0_137] : memref<2x512x128xbf16, #tpu.memory_space<vmem>>, vector<1x512x128xbf16>
    %367 = vector.shape_cast %366 : vector<1x512x128xbf16> to vector<512x128xbf16>
    %cst_138 = arith.constant dense<0.000000e+00> : vector<32x128xf32>
    %368 = tpu.matmul %365, %367, %cst_138 {dimension_numbers = #tpu.dot_dimension_numbers<[1], [0], [0], [1], [0, 0, 1, 1], [], []>} : vector<32x512xbf16>, vector<512x128xbf16>, vector<32x128xf32> -> vector<32x128xf32>
    %c1_139 = arith.constant 1 : index
    %c0_140 = arith.constant 0 : index
    %c0_141 = arith.constant 0 : index
    %369 = vector.load %arg9[%c1_139, %c0_140, %c0_141] : memref<2x1x128xf32, #tpu.memory_space<vmem>>, vector<1x1x128xf32>
    %370 = vector.shape_cast %369 : vector<1x1x128xf32> to vector<1x128xf32>
    %371 = vector.broadcast %370 : vector<1x128xf32> to vector<32x128xf32>
    %372 = arith.addf %368, %371 : vector<32x128xf32>
    %373 = arith.addf %332, %372 : vector<32x128xf32>
    %c0_142 = arith.constant 0 : index
    %c0_143 = arith.constant 0 : index
    %374 = vector.load %arg10[%c0_142, %c0_143] : memref<1x128xf32, #tpu.memory_space<vmem>>, vector<1x128xf32>
    %c0_144 = arith.constant 0 : index
    %c0_145 = arith.constant 0 : index
    %375 = vector.load %arg11[%c0_144, %c0_145] : memref<1x128xf32, #tpu.memory_space<vmem>>, vector<1x128xf32>
    %cst_146 = arith.constant dense<0.000000e+00> : vector<32xf32>
    %376 = vector.multi_reduction <add>, %373, %cst_146 [1] : vector<32x128xf32> to vector<32xf32>
    %377 = vector.shape_cast %376 : vector<32xf32> to vector<32x1xf32>
    %cst_147 = arith.constant 1.280000e+02 : f32
    %378 = vector.broadcast %cst_147 : f32 to vector<32x1xf32>
    %379 = arith.divf %377, %378 : vector<32x1xf32>
    %380 = vector.broadcast %379 : vector<32x1xf32> to vector<32x128xf32>
    %381 = arith.subf %373, %380 : vector<32x128xf32>
    %382 = arith.mulf %381, %381 : vector<32x128xf32>
    %cst_148 = arith.constant dense<0.000000e+00> : vector<32xf32>
    %383 = vector.multi_reduction <add>, %382, %cst_148 [1] : vector<32x128xf32> to vector<32xf32>
    %384 = vector.shape_cast %383 : vector<32xf32> to vector<32x1xf32>
    %cst_149 = arith.constant 1.280000e+02 : f32
    %385 = vector.broadcast %cst_149 : f32 to vector<32x1xf32>
    %386 = arith.divf %384, %385 : vector<32x1xf32>
    %387 = vector.broadcast %379 : vector<32x1xf32> to vector<32x128xf32>
    %388 = arith.subf %373, %387 : vector<32x128xf32>
    %cst_150 = arith.constant 9.99999974E-6 : f32
    %389 = vector.broadcast %cst_150 : f32 to vector<32x1xf32>
    %390 = arith.addf %386, %389 : vector<32x1xf32>
    %391 = math.rsqrt %390 : vector<32x1xf32>
    %392 = vector.broadcast %391 : vector<32x1xf32> to vector<32x128xf32>
    %393 = arith.mulf %388, %392 : vector<32x128xf32>
    %394 = vector.broadcast %374 : vector<1x128xf32> to vector<32x128xf32>
    %395 = arith.mulf %393, %394 : vector<32x128xf32>
    %396 = vector.broadcast %375 : vector<1x128xf32> to vector<32x128xf32>
    %397 = arith.addf %395, %396 : vector<32x128xf32>
    %398 = arith.truncf %397 : vector<32x128xf32> to vector<32x128xbf16>
    %c0_151 = arith.constant 0 : index
    %c0_152 = arith.constant 0 : index
    %399 = vector.load %arg12[%c0_151, %c0_152] : memref<128x128xbf16, #tpu.memory_space<vmem>>, vector<128x128xbf16>
    %cst_153 = arith.constant dense<0.000000e+00> : vector<32x128xf32>
    %400 = tpu.matmul %398, %399, %cst_153 {dimension_numbers = #tpu.dot_dimension_numbers<[1], [0], [0], [1], [0, 0, 1, 1], [], []>} : vector<32x128xbf16>, vector<128x128xbf16>, vector<32x128xf32> -> vector<32x128xf32>
    %c0_154 = arith.constant 0 : index
    %c0_155 = arith.constant 0 : index
    %401 = vector.load %arg13[%c0_154, %c0_155] : memref<32x128xf32, #tpu.memory_space<vmem>>, vector<32x128xf32>
    tpu.vector_store %arg13[%c0_154, %c0_155], %400 {strides = array<i32>} : memref<32x128xf32, #tpu.memory_space<vmem>>, vector<32x128xf32>,
    return
  }
}

</mosaic_0001>

<bundles_post_ra>
// kernel: small_gpt_forward.1
= control target key start
LH: loop header
LB: loop body
LE: loop exit
PB: predicated region body
PF: predicated region fallthrough
CT: control target
= control target key end

     0   :  { %18 = vsyncpa [#allocation4], 0  ;;  %s7285_s0 = inlined_call_operand.vmem [shape: f32[32,128], index: 0, kind: input, shape index: {}]   ;;  %s7286_s1 = inlined_call_operand.vmem [shape: f32[2,1,128], index: 1, kind: input, shape index: {}]   ;;  %s7287_s2 = inlined_call_operand.vmem [shape: f32[2,1,128], index: 2, kind: input, shape index: {}]   ;;  %s7288_s3 = inlined_call_operand.vmem [shape: bf16[2,128,384], index: 3, kind: input, shape index: {}]   ;;  %s7289_s4 = inlined_call_operand.hbm [shape: bf16[2,128,128], index: 4, kind: input, shape index: {}]   ;;  %s7290_s5 = inlined_call_operand.hbm [shape: f32[2,1,128], index: 5, kind: input, shape index: {}]   ;;  %s7291_s6 = inlined_call_operand.hbm [shape: bf16[2,128,512], index: 6, kind: input, shape index: {}]   ;;  %s7292_s7 = inlined_call_operand.vmem [shape: f32[2,1,512], index: 7, kind: input, shape index: {}]   ;;  %s7293_s8 = inlined_call_operand.hbm [shape: bf16[2,512,128], index: 8, kind: input, shape index: {}]   ;;  %s7294_s9 = inlined_call_operand.hbm [shape: f32[2,1,128], index: 9, kind: input, shape index: {}]   ;;  %s7295_s10 = inlined_call_operand.vmem [shape: f32[1,128], index: 10, kind: input, shape index: {}]   ;;  %s7296_s11 = inlined_call_operand.hbm [shape: f32[1,128], index: 11, kind: input, shape index: {}]   ;;  %s7297_s12 = inlined_call_operand.vmem [shape: bf16[128,128], index: 12, kind: input, shape index: {}]   ;;  %s7298_s13 = inlined_call_operand.hbm [shape: f32[32,128], index: 13, kind: output, shape index: {}]  }
   0x1   :  { %19 = vsyncpa [#allocation7], 0 }
   0x2   :  { %20 = vsyncpa [#allocation10], 0 }
   0x3   :  { %21 = vsyncpa [#allocation13], 0 }
   0x4   :  { %22 = vsyncpa [#allocation5], 0  ;;  %s6318_s25 = smov [#allocation6]  }
   0x5   :  { %s48_s26 = sshll.u32 %s6318_s25, 4  ;;  %s49_s26 = int_to_ptr.vmem [resolvable:$true] %s48_s26 }
   0x6   :  { %s6176_s27 = scalar_lea.vmem %s49_s26, 32  ;;  %p6181_p1 = scmp.lt.s32.totalorder %s49_s26, %s49_s26 }
   0x7   :  { %p6177_p0 = scmp.ne.s32.totalorder %s49_s26, %s6176_s27  ;;  %p6182_p2 = scmp.lt.s32.totalorder %s6176_s27, %s6176_s27 }
   0x9   :  { %p6183_p3 = por %p6182_p2, %p6181_p1 }
   0xb   :  { %p6184_p4 = pnand %p6183_p3, %p6177_p0 }
   0xd   :  { %6187 = shalt.err (!%p6184_p4)
}
   0xe   :  { %s6319_s28 = smov 16   ;;  %s6320_s29 = smov 1  }
   0xf   :  { %54 = dma.hbm_to_vmem [thread:$0]  %s7290_s5, 32, %s49_s26, [#allocation7], %s6319_s28, %s6319_s28, %s6320_s29  }
  0x10   :  { %s6321_s15 = smov [#allocation9]   ;;  %s6322_s17 = smov [#allocation3]  }
  0x11   :  { %s74_s16 = sshll.u32 %s6321_s15, 4  ;;  %s36_s18 = sshll.u32 %s6322_s17, 4  ;;  %s75_s16 = int_to_ptr.vmem [resolvable:$true] %s74_s16  ;;  %s37_s18 = int_to_ptr.vmem [resolvable:$true] %s36_s18 }
  0x12   :  { %s6196_s19 = scalar_lea.vmem %s75_s16, 8192  ;;  %p6201_p6 = scmp.lt.s32.totalorder %s75_s16, %s75_s16 }
  0x13   :  { %p6197_p5 = scmp.ne.s32.totalorder %s75_s16, %s6196_s19  ;;  %p6202_p7 = scmp.lt.s32.totalorder %s6196_s19, %s6196_s19 }
  0x15   :  { %p6203_p8 = por %p6202_p7, %p6201_p6 }
  0x17   :  { %p6204_p9 = pnand %p6203_p8, %p6197_p5 }
  0x19   :  { %6207 = shalt.err (!%p6204_p9)
}
  0x1a   :  { %s6323_s20 = smov 64   ;;  %s6324_s21 = smov 4  }
  0x1b   :  { %80 = dma.hbm_to_vmem [thread:$0]  %s7293_s8, 8192, %s75_s16, [#allocation10], %s6323_s20, %s6323_s20, %s6324_s21  }
  0x1c   :  { %s6216_s5 = scalar_lea.vmem %s37_s18, 2048  ;;  %p6221_p11 = scmp.lt.s32.totalorder %s37_s18, %s37_s18 }
  0x1d   :  { %p6217_p10 = scmp.ne.s32.totalorder %s37_s18, %s6216_s5  ;;  %p6222_p12 = scmp.lt.s32.totalorder %s6216_s5, %s6216_s5 }
  0x1f   :  { %p6223_p13 = por %p6222_p12, %p6221_p11 }
  0x21   :  { %p6224_p0 = pnand %p6223_p13, %p6217_p10 }
  0x23   :  { %6227 = shalt.err (!%p6224_p0)
}
  0x24   :  { %42 = dma.hbm_to_vmem [thread:$0]  %s7289_s4, 2048, %s37_s18, [#allocation4], %s6323_s20, %s6323_s20, %s6324_s21  }
  0x25   :  { %s6325_s26 = smov [#allocation8]  }
  0x26   :  { %s60_s27 = sshll.u32 %s6325_s26, 4  ;;  %s61_s27 = int_to_ptr.vmem [resolvable:$true] %s60_s27 }
  0x27   :  { %s6236_s30 = scalar_lea.vmem %s61_s27, 8192  ;;  %p6241_p2 = scmp.lt.s32.totalorder %s61_s27, %s61_s27 }
  0x28   :  { %p6237_p1 = scmp.ne.s32.totalorder %s61_s27, %s6236_s30  ;;  %p6242_p3 = scmp.lt.s32.totalorder %s6236_s30, %s6236_s30 }
  0x2a   :  { %p6243_p4 = por %p6242_p3, %p6241_p2 }
  0x2c   :  { %p6244_p5 = pnand %p6243_p4, %p6237_p1 }
  0x2e   :  { %6247 = shalt.err (!%p6244_p5)
}
  0x2f   :  { %s6326_s8 = smov 256   ;;  %s6327_s16 = smov [#allocation11]  }
  0x30   :  { %66 = dma.hbm_to_vmem [thread:$0]  %s7291_s6, 8192, %s61_s27, [#allocation7], %s6326_s8, %s6326_s8, %s6319_s28  }
  0x31   :  { %s86_s17 = sshll.u32 %s6327_s16, 4  ;;  %s6328_s4 = smov [#allocation12]   ;;  %s87_s17 = int_to_ptr.vmem [resolvable:$true] %s86_s17 }
  0x32   :  { %s101_s18 = sshll.u32 %s6328_s4, 4  ;;  %s6256_s19 = scalar_lea.vmem %s87_s17, 32  ;;  %s102_s18 = int_to_ptr.vmem [resolvable:$true] %s101_s18 }
  0x33   :  { %p6257_p6 = scmp.ne.s32.totalorder %s87_s17, %s6256_s19  ;;  %p6261_p7 = scmp.lt.s32.totalorder %s87_s17, %s87_s17 }
  0x34   :  { %p6262_p8 = scmp.lt.s32.totalorder %s6256_s19, %s6256_s19 }
  0x36   :  { %p6263_p9 = por %p6262_p8, %p6261_p7 }
  0x38   :  { %p6264_p10 = pnand %p6263_p9, %p6257_p6 }
  0x3a   :  { %6267 = shalt.err (!%p6264_p10)
}
  0x3b   :  { %92 = dma.hbm_to_vmem [thread:$0]  %s7294_s9, 32, %s87_s17, [#allocation10], %s6319_s28, %s6319_s28, %s6320_s29  }
  0x3c   :  { %s6276_s6 = scalar_lea.vmem %s102_s18, 16  ;;  %s6280_s23 = scalar_lea.vmem %s102_s18, 32 }
  0x3d   :  { %p6277_p11 = scmp.ne.s32.totalorder %s102_s18, %s6276_s6  ;;  %p6281_p12 = scmp.lt.s32.totalorder %s102_s18, %s102_s18 }
  0x3e   :  { %p6282_p13 = scmp.lt.s32.totalorder %s6280_s23, %s6276_s6 }
  0x40   :  { %p6283_p0 = por %p6282_p13, %p6281_p12 }
  0x42   :  { %p6284_p1 = pnand %p6283_p0, %p6277_p11 }
  0x44   :  { %6287 = shalt.err (!%p6284_p1)
}
  0x45   :  { %104 = dma.hbm_to_vmem [thread:$0]  %s7296_s11, 16, %s102_s18, [#allocation13]  }
  0x46   :  { %6308 = dma.done.wait [#allocation4], 2048  }
  0x47   :  { %6309 = vsyncadd [#allocation4], 4294965248 }
  0x48   :  { %6310 = dma.done.wait [#allocation7], 8224  }
  0x49   :  { %6311 = vsyncadd [#allocation7], 4294959072 }
  0x4a   :  { %6312 = dma.done.wait [#allocation10], 8224  }
  0x4b   :  { %6313 = vsyncadd [#allocation10], 4294959072 }
  0x4c   :  { %6314 = dma.done.wait [#allocation13], 16  }
  0x4d   :  { %6315 = vsyncadd [#allocation13], 4294967280  ;;  %v126_v0 = vld [vmem:[%s7285_s0] sm:$0xff]  ;;  %v128_v1 = vld [vmem:[%s7285_s0 + $0x10] sm:$0xff]  ;;  %v6329_v39 = vmov 0   ;;  %vm6331_vm0 = vmmov 0  }
  0x4e   :  { %v127_v2 = vld [vmem:[%s7285_s0 + $0x8] sm:$0xff]  ;;  %141 = vadd.xlane.f32.xlu0 %v126_v0  ;;  %145 = vadd.xlane.f32.xlu1 %v128_v1  ;;  %v129_v3 = vld [vmem:[%s7285_s0 + $0x18] sm:$0xff]  ;;  %v5747_v22 = vld [vmem:[%s7288_s3 + $0x94] ss:$12 sps:$4 sm:$0xff]   ;;  %vm476_vm1 = vcmask 261120   ;;  %vm579_vm4 = vcmask 130048  }
  0x4f   :  { %v5744_v4 = vld [vmem:[%s7288_s3 + $0xac] ss:$12 sps:$4 sm:$0xff]   ;;  %v5746_v5 = vld [vmem:[%s7288_s3 + $0xa8] ss:$12 sps:$4 sm:$0xff]   ;;  %v5749_v23 = vld [vmem:[%s7288_s3 + $0xb0] ss:$12 sps:$4 sm:$0xff]   ;;  %400 = vmatprep.mubr.bf16.mxu0 %v6329_v39 }
  0x50   :  { %368 = vmatprep.subr.bf16.mxu0 %v5744_v4  ;;  %v5750_v24 = vld [vmem:[%s7288_s3 + $0x90] ss:$12 sps:$4 sm:$0xff]   ;;  %5432 = vmatprep.subr.bf16.mxu1 %v5749_v23  ;;  %v5753_v26 = vld [vmem:[%s7288_s3 + $0x98] ss:$12 sps:$4 sm:$0xff]   ;;  %v5757_v29 = vld [vmem:[%s7288_s3 + $0x80] ss:$12 sps:$4 sm:$0xff]  }
  0x51   :  { %369 = vmatpush1.bf16.msra.mxu0 %v5746_v5  ;;  %5433 = vmatpush3.bf16.msra.mxu1 %v5749_v23  ;;  %v5751_v25 = vld [vmem:[%s7288_s3 + $0x7c] ss:$12 sps:$4 sm:$0xff]   ;;  %v5754_v27 = vld [vmem:[%s7288_s3 + $0x78] ss:$12 sps:$4 sm:$0xff]   ;;  %v5758_v30 = vld [vmem:[%s7288_s3 + $0x60] ss:$12 sps:$4 sm:$0xff]  }
  0x52   :  { %143 = vadd.xlane.f32.xlu0 %v127_v2  ;;  %147 = vadd.xlane.f32.xlu1 %v129_v3  ;;  %v5755_v28 = vld [vmem:[%s7288_s3 + $0x64] ss:$12 sps:$4 sm:$0xff]   ;;  %v5759_v31 = vld [vmem:[%s7288_s3 + $0x4c] ss:$12 sps:$4 sm:$0xff]   ;;  %v5761_v32 = vld [vmem:[%s7288_s3 + $0x68] ss:$12 sps:$4 sm:$0xff]  }
  0x53   :  { %370 = vmatprep.subr.bf16.mxu0 %v5747_v22  ;;  %5434 = vmatprep.subr.bf16.mxu1 %v5753_v26  ;;  %v5762_v33 = vld [vmem:[%s7288_s3 + $0x48] ss:$12 sps:$4 sm:$0xff]   ;;  %v5765_v35 = vld [vmem:[%s7288_s3 + $0x50] ss:$12 sps:$4 sm:$0xff]   ;;  %v5769_v38 = vld [vmem:[%s7288_s3 + $0x38] ss:$12 sps:$4 sm:$0xff]  }
  0x54   :  { %v5763_v34 = vld [vmem:[%s7288_s3 + $0x34] ss:$12 sps:$4 sm:$0xff]   ;;  %v5766_v36 = vld [vmem:[%s7288_s3 + $0x30] ss:$12 sps:$4 sm:$0xff]   ;;  %v5770_v40 = vld [vmem:[%s7288_s3 + $0x18] ss:$12 sps:$4 sm:$0xff]  }
  0x55   :  { %371 = vmatpush1.bf16.msra.mxu0 %v5750_v24  ;;  %5435 = vmatpush3.bf16.msra.mxu1 %v5753_v26  ;;  %v5767_v37 = vld [vmem:[%s7288_s3 + $0x1c] ss:$12 sps:$4 sm:$0xff]   ;;  %v5771_v41 = vld [vmem:[%s7288_s3 + $0x4] ss:$12 sps:$4 sm:$0xff]   ;;  %v5773_v42 = vld [vmem:[%s7288_s3 + $0x20] ss:$12 sps:$4 sm:$0xff]  }
  0x56   :  { %372 = vmatprep.subr.bf16.mxu0 %v5751_v25  ;;  %5436 = vmatprep.subr.bf16.mxu1 %v5757_v29  ;;  %v5774_v43 = vld [vmem:[%s7288_s3] ss:$12 sps:$4 sm:$0xff]   ;;  %v5775_v44 = vld [vmem:[%s7288_s3 + $0x8] ss:$12 sps:$4 sm:$0xff]   ;;  %s6333_s21 = smov 96   ;;  %s6334_s22 = smov 32  }
  0x57   :  { %v4929_v59 = vld [vmem:[%s7286_s1] ss:$0 sm:$0xff]  ;;  %vm990_vm5 = vcmask 523520   ;;  %vm1261_vm6 = vcmask 785920   ;;  %vm1532_vm7 = vcmask 1048320  }
  0x59   :  { %373 = vmatpush1.bf16.msra.mxu0 %v5754_v27  ;;  %5437 = vmatpush3.bf16.msra.mxu1 %v5757_v29 }
  0x5a   :  { %374 = vmatprep.subr.bf16.mxu0 %v5755_v28  ;;  %5438 = vmatprep.subr.bf16.mxu1 %v5761_v32 }
  0x5d   :  { %375 = vmatpush1.bf16.msra.mxu0 %v5758_v30  ;;  %5439 = vmatpush3.bf16.msra.mxu1 %v5761_v32 }
  0x5e   :  { %376 = vmatprep.subr.bf16.mxu0 %v5759_v31  ;;  %5440 = vmatprep.subr.bf16.mxu1 %v5765_v35 }
  0x61   :  { %377 = vmatpush1.bf16.msra.mxu0 %v5762_v33  ;;  %5441 = vmatpush3.bf16.msra.mxu1 %v5765_v35 }
  0x62   :  { %378 = vmatprep.subr.bf16.mxu0 %v5763_v34  ;;  %5442 = vmatprep.subr.bf16.mxu1 %v5769_v38  ;;  %v130_v34 = vlaneseq }
  0x64   :  { %v6585_v35 = vshrl.u32 %v130_v34, 7 }
  0x65   :  { %379 = vmatpush1.bf16.msra.mxu0 %v5766_v36  ;;  %5443 = vmatpush3.bf16.msra.mxu1 %v5769_v38  ;;  %v134_v36 = vand.u32 127, %v130_v34 }
  0x66   :  { %380 = vmatprep.subr.bf16.mxu0 %v5767_v37  ;;  %5444 = vmatprep.subr.bf16.mxu1 %v5773_v42  ;;  %v132_v37 = vadd.s32 8, %v6585_v35 }
  0x67   :  { %vm135_vm2 = vcmp.le.s32.totalorder %v134_v36, %v6585_v35 }
  0x68   :  { %vm136_vm3 = vcmp.le.s32.totalorder %v134_v36, %v132_v37 }
  0x69   :  { %381 = vmatpush1.bf16.msra.mxu0 %v5770_v40  ;;  %5445 = vmatpush3.bf16.msra.mxu1 %v5773_v42  ;;  %v6332_v40 = vmov -1e+30  }
  0x6a   :  { %382 = vmatprep.subr.bf16.mxu0 %v5771_v41  ;;  %5446 = vmatprep.subr.bf16.mxu1 %v5775_v44  ;;  %v6589_v41 = vsel %vm135_vm2, 0.0, %v6332_v40 }
  0x6d   :  { %383 = vmatpush1.bf16.msra.mxu0 %v5774_v43  ;;  %5447 = vmatpush3.bf16.msra.mxu1 %v5775_v44 }
  0xd7   :  { %v142_v6 = vpop.xlane.xlu0 %141  ;;  %v146_v7 = vpop.xlane.xlu1 %145 }
  0xd8   :  { %v150_v8 = vmul.f32 0.0078125, %v142_v6  ;;  %v152_v9 = vmul.f32 0.0078125, %v146_v7 }
  0xda   :  { %v6455_v10 = vsub.f32 %v126_v0, %v150_v8  ;;  %v6457_v11 = vsub.f32 %v128_v1, %v152_v9  ;;  %v4930_v0 = vld [vmem:[%s7287_s2] ss:$0 sm:$0xff] }
  0xdb   :  { %v144_v12 = vpop.xlane.xlu0 %143  ;;  %v148_v13 = vpop.xlane.xlu1 %147 }
  0xdc   :  { %v151_v14 = vmul.f32 0.0078125, %v144_v12  ;;  %v158_v15 = vmul.f32 %v6455_v10, %v6455_v10  ;;  %v153_v16 = vmul.f32 0.0078125, %v148_v13  ;;  %v160_v17 = vmul.f32 %v6457_v11, %v6457_v11 }
  0xde   :  { %162 = vadd.xlane.f32.xlu0 %v158_v15  ;;  %v6463_v18 = vsub.f32 %v127_v2, %v151_v14  ;;  %v6465_v19 = vsub.f32 %v129_v3, %v153_v16  ;;  %v6330_v14 = vmov 0.0  }
  0xdf   :  { %5452 = vmatprep.subr.bf16.mxu1 %v6330_v14  ;;  %5458 = vmatprep.subr.bf16.mxu0 %v6330_v14 }
  0xe0   :  { %v159_v20 = vmul.f32 %v6463_v18, %v6463_v18  ;;  %v161_v21 = vmul.f32 %v6465_v19, %v6465_v19 }
  0xe2   :  { %166 = vadd.xlane.f32.xlu0 %v160_v17  ;;  %164 = vadd.xlane.f32.xlu1 %v159_v20 }
  0xe6   :  { %168 = vadd.xlane.f32.xlu1 %v161_v21 }
 0x167   :  { %v163_v45 = vpop.xlane.xlu0 %162 }
 0x168   :  { %v170_v46 = vmul.f32 0.0078125, %v163_v45 }
 0x16a   :  { %v174_v47 = vadd.f32 1e-05, %v170_v46  ;;  %v6592_v46 = vsel %vm136_vm3, 0.0, %v6332_v40 }
 0x16b   :  { %v165_v48 = vpop.xlane.xlu1 %164  ;;  %v167_v49 = vpop.xlane.xlu0 %166 }
 0x16c   :  { %5992 = vrsqrt.f32 %v174_v47  ;;  %v171_v50 = vmul.f32 0.0078125, %v165_v48  ;;  %v172_v51 = vmul.f32 0.0078125, %v167_v49 }
 0x16e   :  { %v175_v52 = vadd.f32 1e-05, %v171_v50  ;;  %v176_v53 = vadd.f32 1e-05, %v172_v51 }
 0x16f   :  { %v169_v54 = vpop.xlane.xlu1 %168 }
 0x170   :  { %5994 = vrsqrt.f32 %v175_v52  ;;  %v173_v55 = vmul.f32 0.0078125, %v169_v54 }
 0x171   :  { %5996 = vrsqrt.f32 %v176_v53 }
 0x172   :  { %v177_v56 = vadd.f32 1e-05, %v173_v55 }
 0x174   :  { %5998 = vrsqrt.f32 %v177_v56 }
 0x179   :  { %v5993_v57 = vpop.eup %5992 }
 0x17a   :  { %v182_v58 = vmul.f32 %v5993_v57, %v6455_v10 }
 0x17c   :  { %v192_v63 = vmul.f32 %v4929_v59, %v182_v58 }
 0x17d   :  { %v5995_v60 = vpop.eup %5994 }
 0x17e   :  { %v5997_v61 = vpop.eup %5996  ;;  %v183_v62 = vmul.f32 %v5995_v60, %v6463_v18  ;;  %v202_v4 = vadd.f32 %v4930_v0, %v192_v63 }
 0x17f   :  { %v184_v1 = vmul.f32 %v5997_v61, %v6457_v11 }
 0x180   :  { %v193_v2 = vmul.f32 %v4929_v59, %v183_v62 }
 0x181   :  { %v5999_v3 = vpop.eup %5998  ;;  %v194_v7 = vmul.f32 %v4929_v59, %v184_v1 }
 0x182   :  { %v203_v5 = vadd.f32 %v4930_v0, %v193_v2  ;;  %v185_v6 = vmul.f32 %v5999_v3, %v6465_v19 }
 0x183   :  { %v204_v10 = vadd.f32 %v4930_v0, %v194_v7 }
 0x184   :  { %v206_v8 = vpack.c.bf16 %v203_v5, %v202_v4  ;;  %v195_v9 = vmul.f32 %v4929_v59, %v185_v6 }
 0x186   :  { %401 = vmatmul.mubr.bf16.vlgmr.msra.gmra.mxu0 %v206_v8  ;;  %5448 = vmatprep.mubr.bf16.mxu1 %v206_v8  ;;  %v205_v12 = vadd.f32 %v4930_v0, %v195_v9 }
 0x187   :  { %410 = vmatprep.mubr.bf16.mxu0 %v6329_v39 }
 0x188   :  { %v207_v13 = vpack.c.bf16 %v205_v12, %v204_v10 }
 0x18a   :  { %5449 = vmatmul.mubr.bf16.vlgmr.msra.gmra.mxu1 %v207_v13 }
 0x18b   :  { %5454 = vmatprep.mubr.msk.bf16.mxu1 %vm6331_vm0, %v6330_v14 }
 0x18e   :  { %411 = vmatmul.mubr.bf16.gmra.mxu0 %v207_v13 }
 0x18f   :  { %5460 = vmatprep.mubr.msk.bf16.mxu0 %vm6331_vm0, %v6330_v14 }
 0x246   :  { %v402_v11 = vpop.f32.mrf.mxu0 }
 0x248   :  { %v404_v15 = vpop.f32.mrf.mxu0 }
 0x24a   :  { %v406_v16 = vpop.f32.mrf.mxu0  ;;  %v5450_v17 = vpop.f32.mrf.mxu1 }
 0x24b   :  { %v6560_v28 = vpack.c.bf16 %v406_v16, %v402_v11 }
 0x24c   :  { %v408_v18 = vpop.f32.mrf.mxu0  ;;  %v455_v19 = vpop.f32.mrf.mxu1 }
 0x24d   :  { %v6555_v20 = vpack.c.bf16 %v408_v18, %v404_v15 }
 0x24e   :  { %v412_v21 = vpop.f32.mrf.mxu0  ;;  %v5451_v22 = vpop.f32.mrf.mxu1 }
 0x24f   :  { %v481_v23 = vsel %vm476_vm1, %v6555_v20, 0  ;;  %v6577_v33 = vpack.c.bf16 %v5451_v22, %v5450_v17 }
 0x250   :  { %v414_v24 = vpop.f32.mrf.mxu0  ;;  %5453 = vmatpush3.bf16.xpose.msra.mxu1 %v481_v23  ;;  %v458_v26 = vpop.f32.mrf.mxu1 }
 0x251   :  { %5464 = vmatprep.subr.bf16.mxu1 %v6330_v14  ;;  %v6564_v30 = vpack.c.bf16 %v458_v26, %v455_v19 }
 0x252   :  { %v416_v25 = vpop.f32.mrf.mxu0 }
 0x253   :  { %v6575_v32 = vpack.c.bf16 %v416_v25, %v412_v21 }
 0x254   :  { %v418_v27 = vpop.f32.mrf.mxu0 }
 0x255   :  { %v6562_v29 = vpack.c.bf16 %v418_v27, %v414_v24 }
 0x257   :  { %5455 = vmatmul.mubr.msk.bf16.vlgmr.msra.gmra.mxu1 %vm476_vm1, %v6560_v28  ;;  %v528_v31 = vsel %vm476_vm1, %v6562_v29, 0 }
 0x258   :  { %5459 = vmatpush3.bf16.xpose.msra.mxu0 %v528_v31  ;;  %5465 = vmatpush3.bf16.msra.mxu1 %v6564_v30 }
 0x259   :  { %5470 = vmatprep.subr.bf16.mxu0 %v6330_v14  ;;  %5466 = vmatprep.mubr.msk.bf16.mxu1 %vm6331_vm0, %v6330_v14 }
 0x25a   :  { %5476 = vmatprep.subr.bf16.mxu1 %v6330_v14 }
 0x25f   :  { %5461 = vmatmul.mubr.msk.bf16.vlgmr.msra.gmra.mxu0 %vm476_vm1, %v6575_v32 }
 0x260   :  { %5471 = vmatpush3.bf16.msra.mxu0 %v6577_v33  ;;  %5472 = vmatprep.mubr.msk.bf16.mxu0 %vm6331_vm0, %v6330_v14 }
 0x261   :  { %5482 = vmatprep.subr.bf16.mxu0 %v6330_v14 }
 0x317   :  { %v517_v38 = vpop.f32.mrf.mxu1 }
 0x318   :  { %v571_v42 = vmul.f32 0.17677669, %v517_v38 }
 0x319   :  { %v5456_v43 = vpop.f32.mrf.mxu1 }
 0x31a   :  { %v575_v44 = vadd.f32 %v571_v42, %v6589_v41 }
 0x31b   :  { %v520_v45 = vpop.f32.mrf.mxu1 }
 0x31c   :  { %v572_v47 = vmul.f32 0.17677669, %v520_v45  ;;  %v580_v48 = vsel %vm579_vm4, %v575_v44, -inf }
 0x31d   :  { %581 = vmax.xlane.f32.xlu0 %v580_v48  ;;  %v5457_v49 = vpop.f32.mrf.mxu1 }
 0x31e   :  { %v576_v50 = vadd.f32 %v572_v47, %v6592_v46 }
 0x31f   :  { %v564_v51 = vpop.f32.mrf.mxu0 }
 0x320   :  { %v573_v52 = vmul.f32 0.17677669, %v564_v51  ;;  %v583_v53 = vsel %vm579_vm4, %v576_v50, -inf }
 0x321   :  { %584 = vmax.xlane.f32.xlu1 %v583_v53  ;;  %v5462_v54 = vpop.f32.mrf.mxu0 }
 0x322   :  { %v577_v55 = vadd.f32 %v573_v52, %v6589_v41 }
 0x323   :  { %v567_v56 = vpop.f32.mrf.mxu0 }
 0x324   :  { %v574_v57 = vmul.f32 0.17677669, %v567_v56  ;;  %v586_v58 = vsel %vm579_vm4, %v577_v55, -inf }
 0x325   :  { %587 = vmax.xlane.f32.xlu0 %v586_v58  ;;  %v5463_v59 = vpop.f32.mrf.mxu0 }
 0x326   :  { %v578_v60 = vadd.f32 %v574_v57, %v6592_v46 }
 0x328   :  { %v589_v61 = vsel %vm579_vm4, %v578_v60, -inf }
 0x329   :  { %590 = vmax.xlane.f32.xlu1 %v589_v61 }
 0x3a6   :  { %v582_v62 = vpop.xlane.xlu0 %581 }
 0x3a7   :  { %v592_v63 = vsub.f32 %v575_v44, %v582_v62 }
 0x3a9   :  { %v596_v0 = vmul.f32 1.442695, %v592_v63 }
 0x3aa   :  { %v585_v1 = vpop.xlane.xlu1 %584 }
 0x3ab   :  { %6000 = vpow2.f32 %v596_v0  ;;  %v593_v2 = vsub.f32 %v576_v50, %v585_v1 }
 0x3ad   :  { %v598_v3 = vmul.f32 1.442695, %v593_v2 }
 0x3ae   :  { %v588_v4 = vpop.xlane.xlu0 %587 }
 0x3af   :  { %6002 = vpow2.f32 %v598_v3  ;;  %v594_v5 = vsub.f32 %v577_v55, %v588_v4 }
 0x3b1   :  { %v600_v6 = vmul.f32 1.442695, %v594_v5 }
 0x3b2   :  { %v591_v11 = vpop.xlane.xlu1 %590 }
 0x3b3   :  { %6004 = vpow2.f32 %v600_v6  ;;  %v595_v15 = vsub.f32 %v578_v60, %v591_v11 }
 0x3b5   :  { %v602_v16 = vmul.f32 1.442695, %v595_v15 }
 0x3b7   :  { %6006 = vpow2.f32 %v602_v16 }
 0x3b8   :  { %v6001_v7 = vpop.eup %6000 }
 0x3b9   :  { %v604_v8 = vsel %vm579_vm4, %v6001_v7, 0.0 }
 0x3ba   :  { %605 = vadd.xlane.f32.xlu0 %v604_v8 }
 0x3bc   :  { %v6003_v9 = vpop.eup %6002 }
 0x3bd   :  { %v607_v10 = vsel %vm579_vm4, %v6003_v9, 0.0 }
 0x3be   :  { %608 = vadd.xlane.f32.xlu1 %v607_v10 }
 0x3c0   :  { %v6005_v12 = vpop.eup %6004 }
 0x3c1   :  { %v610_v13 = vsel %vm579_vm4, %v6005_v12, 0.0 }
 0x3c2   :  { %611 = vadd.xlane.f32.xlu0 %v610_v13 }
 0x3c4   :  { %v6007_v17 = vpop.eup %6006 }
 0x3c5   :  { %v613_v18 = vsel %vm579_vm4, %v6007_v17, 0.0 }
 0x3cf   :  { %775 = vrot.lane.b32.xlu1 %v6562_v29, %s6333_s21 }
 0x3d8   :  { %722 = vrot.lane.b32.xlu0 %v6555_v20, %s6333_s21 }
 0x3f3   :  { %614 = vadd.xlane.f32.xlu1 %v613_v18 }
 0x404   :  { %719 = vrot.lane.b32.xlu1 %v6560_v28, %s6333_s21 }
 0x408   :  { %772 = vrot.lane.b32.xlu1 %v6575_v32, %s6333_s21 }
 0x443   :  { %v606_v19 = vpop.xlane.xlu0 %605 }
 0x444   :  { %6008 = vrcp.f32 %v606_v19 }
 0x447   :  { %v609_v21 = vpop.xlane.xlu1 %608 }
 0x448   :  { %6010 = vrcp.f32 %v609_v21 }
 0x44b   :  { %v612_v22 = vpop.xlane.xlu0 %611  ;;  %v776_v36 = vpop.permute.xlu1 %775 }
 0x44c   :  { %6012 = vrcp.f32 %v612_v22  ;;  %v781_v47 = vsel %vm476_vm1, %v776_v36, 0 }
 0x44f   :  { %v723_v27 = vpop.permute.xlu0 %722 }
 0x450   :  { %v728_v34 = vsel %vm476_vm1, %v723_v27, 0 }
 0x451   :  { %v6009_v23 = vpop.eup %6008 }
 0x452   :  { %v617_v25 = vmul.f32 %v6009_v23, %v6001_v7 }
 0x455   :  { %v6011_v24 = vpop.eup %6010 }
 0x456   :  { %v619_v26 = vmul.f32 %v6011_v24, %v6003_v9 }
 0x458   :  { %v624_v31 = vpack.c.bf16 %v619_v26, %v617_v25 }
 0x459   :  { %v6013_v40 = vpop.eup %6012 }
 0x45a   :  { %5467 = vmatmul.mubr.msk.bf16.vlgmr.msra.gmra.mxu1 %vm579_vm4, %v624_v31  ;;  %v621_v43 = vmul.f32 %v6013_v40, %v6005_v12 }
 0x45b   :  { %5477 = vmatpush3.bf16.xpose.msra.mxu1 %v728_v34  ;;  %5478 = vmatprep.mubr.msk.bf16.mxu1 %vm6331_vm0, %v6330_v14 }
 0x45c   :  { %5488 = vmatprep.subr.bf16.mxu1 %v6330_v14 }
 0x47c   :  { %v615_v37 = vpop.xlane.xlu1 %614 }
 0x47d   :  { %6014 = vrcp.f32 %v615_v37 }
 0x480   :  { %v720_v38 = vpop.permute.xlu1 %719 }
 0x481   :  { %5479 = vmatmul.mubr.msk.bf16.vlgmr.msra.gmra.mxu1 %vm476_vm1, %v720_v38 }
 0x482   :  { %5490 = vmatprep.mubr.msk.bf16.mxu1 %vm6331_vm0, %v6330_v14 }
 0x484   :  { %v773_v48 = vpop.permute.xlu1 %772 }
 0x48a   :  { %v6015_v42 = vpop.eup %6014 }
 0x48b   :  { %v623_v44 = vmul.f32 %v6015_v42, %v6007_v17 }
 0x48d   :  { %v625_v45 = vpack.c.bf16 %v623_v44, %v621_v43 }
 0x48f   :  { %5473 = vmatmul.mubr.msk.bf16.vlgmr.msra.gmra.mxu0 %vm579_vm4, %v625_v45 }
 0x490   :  { %5483 = vmatpush3.bf16.xpose.msra.mxu0 %v781_v47  ;;  %5484 = vmatprep.mubr.msk.bf16.mxu0 %vm6331_vm0, %v6330_v14 }
 0x491   :  { %5494 = vmatprep.subr.bf16.mxu0 %v6330_v14 }
 0x497   :  { %5485 = vmatmul.mubr.msk.bf16.vlgmr.msra.gmra.mxu0 %vm476_vm1, %v773_v48 }
 0x498   :  { %5496 = vmatprep.mubr.msk.bf16.mxu0 %vm6331_vm0, %v6330_v14 }
 0x51a   :  { %v663_v49 = vpop.f32.mrf.mxu1 }
 0x51b   :  { %714 = vst.msk [vmem:[#allocation2] sm:$0xff] %vm476_vm1, %v663_v49 }
 0x51c   :  { %v5468_v50 = vpop.f32.mrf.mxu1 }
 0x51e   :  { %v666_v51 = vpop.f32.mrf.mxu1 }
 0x51f   :  { %715 = vst.msk [vmem:[#allocation2 + $0x8] sm:$0xff] %vm476_vm1, %v666_v51 }
 0x520   :  { %v5469_v52 = vpop.f32.mrf.mxu1 }
 0x541   :  { %v764_v53 = vpop.f32.mrf.mxu1 }
 0x542   :  { %v824_v54 = vmul.f32 0.17677669, %v764_v53 }
 0x543   :  { %v5480_v55 = vpop.f32.mrf.mxu1 }
 0x544   :  { %v828_v56 = vadd.f32 %v824_v54, %v6589_v41 }
 0x545   :  { %v767_v57 = vpop.f32.mrf.mxu1 }
 0x546   :  { %v825_v58 = vmul.f32 0.17677669, %v767_v57  ;;  %v832_v59 = vsel %vm579_vm4, %v828_v56, -inf }
 0x547   :  { %833 = vmax.xlane.f32.xlu0 %v832_v59  ;;  %v5481_v60 = vpop.f32.mrf.mxu1 }
 0x548   :  { %v829_v61 = vadd.f32 %v825_v58, %v6592_v46 }
 0x54a   :  { %v835_v62 = vsel %vm579_vm4, %v829_v61, -inf }
 0x54b   :  { %836 = vmax.xlane.f32.xlu1 %v835_v62 }
 0x54f   :  { %v707_v63 = vpop.f32.mrf.mxu0 }
 0x550   :  { %716 = vst.msk [vmem:[#allocation2 + $0x10] sm:$0xff] %vm476_vm1, %v707_v63 }
 0x551   :  { %v5474_v0 = vpop.f32.mrf.mxu0 }
 0x553   :  { %v710_v1 = vpop.f32.mrf.mxu0 }
 0x554   :  { %717 = vst.msk [vmem:[#allocation2 + $0x18] sm:$0xff] %vm476_vm1, %v710_v1 }
 0x555   :  { %v5475_v2 = vpop.f32.mrf.mxu0 }
 0x557   :  { %v817_v3 = vpop.f32.mrf.mxu0 }
 0x558   :  { %v826_v4 = vmul.f32 0.17677669, %v817_v3 }
 0x559   :  { %v5486_v5 = vpop.f32.mrf.mxu0 }
 0x55a   :  { %v830_v6 = vadd.f32 %v826_v4, %v6589_v41 }
 0x55b   :  { %v820_v7 = vpop.f32.mrf.mxu0 }
 0x55c   :  { %v827_v8 = vmul.f32 0.17677669, %v820_v7  ;;  %v838_v9 = vsel %vm579_vm4, %v830_v6, -inf }
 0x55d   :  { %839 = vmax.xlane.f32.xlu0 %v838_v9  ;;  %v5487_v10 = vpop.f32.mrf.mxu0 }
 0x55e   :  { %v831_v12 = vadd.f32 %v827_v8, %v6592_v46 }
 0x560   :  { %v841_v13 = vsel %vm579_vm4, %v831_v12, -inf }
 0x561   :  { %842 = vmax.xlane.f32.xlu0 %v841_v13 }
 0x5d0   :  { %v834_v11 = vpop.xlane.xlu0 %833 }
 0x5d1   :  { %v844_v15 = vsub.f32 %v828_v56, %v834_v11 }
 0x5d3   :  { %v848_v16 = vmul.f32 1.442695, %v844_v15 }
 0x5d4   :  { %v837_v17 = vpop.xlane.xlu1 %836 }
 0x5d5   :  { %6016 = vpow2.f32 %v848_v16  ;;  %v845_v18 = vsub.f32 %v829_v61, %v837_v17 }
 0x5d7   :  { %v850_v19 = vmul.f32 1.442695, %v845_v18 }
 0x5d9   :  { %6018 = vpow2.f32 %v850_v19 }
 0x5e2   :  { %v6017_v21 = vpop.eup %6016 }
 0x5e3   :  { %v856_v22 = vsel %vm579_vm4, %v6017_v21, 0.0 }
 0x5e4   :  { %857 = vadd.xlane.f32.xlu0 %v856_v22 }
 0x5e6   :  { %v6019_v23 = vpop.eup %6018  ;;  %v840_v24 = vpop.xlane.xlu0 %839 }
 0x5e7   :  { %v846_v25 = vsub.f32 %v830_v6, %v840_v24  ;;  %v859_v26 = vsel %vm579_vm4, %v6019_v23, 0.0 }
 0x5e8   :  { %860 = vadd.xlane.f32.xlu1 %v859_v26 }
 0x5e9   :  { %v852_v27 = vmul.f32 1.442695, %v846_v25 }
 0x5ea   :  { %v843_v36 = vpop.xlane.xlu0 %842 }
 0x5eb   :  { %6020 = vpow2.f32 %v852_v27  ;;  %v847_v37 = vsub.f32 %v831_v12, %v843_v36 }
 0x5ed   :  { %v854_v38 = vmul.f32 1.442695, %v847_v37 }
 0x5ef   :  { %6022 = vpow2.f32 %v854_v38 }
 0x5f8   :  { %v6021_v31 = vpop.eup %6020 }
 0x5f9   :  { %927 = vrot.lane.b32.xlu1 %v6577_v33, %s6333_s21  ;;  %v862_v34 = vsel %vm579_vm4, %v6021_v31, 0.0 }
 0x5fa   :  { %863 = vadd.xlane.f32.xlu0 %v862_v34 }
 0x5fc   :  { %v6023_v40 = vpop.eup %6022 }
 0x5fd   :  { %997 = vrot.lane.b32.xlu1 %v6555_v20, %s6323_s20  ;;  %v865_v42 = vsel %vm579_vm4, %v6023_v40, 0.0 }
 0x610   :  { %879 = vrot.lane.b32.xlu0 %v6564_v30, %s6333_s21 }
 0x614   :  { %995 = vrot.lane.b32.xlu0 %v6560_v28, %s6323_s20 }
 0x621   :  { %866 = vadd.xlane.f32.xlu1 %v865_v42 }
 0x632   :  { %1048 = vrot.lane.b32.xlu1 %v6562_v29, %s6323_s20 }
 0x636   :  { %1046 = vrot.lane.b32.xlu1 %v6575_v32, %s6323_s20 }
 0x66d   :  { %v858_v44 = vpop.xlane.xlu0 %857 }
 0x671   :  { %v861_v43 = vpop.xlane.xlu1 %860 }
 0x672   :  { %6024 = vrcp.f32 %v861_v43 }
 0x673   :  { %6026 = vrcp.f32 %v858_v44 }
 0x675   :  { %v928_v45 = vpop.permute.xlu1 %927 }
 0x676   :  { %5495 = vmatpush3.bf16.msra.mxu0 %v928_v45 }
 0x677   :  { %5506 = vmatprep.subr.bf16.mxu0 %v6330_v14 }
 0x679   :  { %v998_v53 = vpop.permute.xlu1 %997 }
 0x67a   :  { %v1003_v55 = vsel %vm476_vm1, %v998_v53, 0 }
 0x67f   :  { %v6025_v47 = vpop.eup %6024 }
 0x680   :  { %v6027_v49 = vpop.eup %6026  ;;  %v871_v50 = vmul.f32 %v6025_v47, %v6019_v23 }
 0x681   :  { %v869_v52 = vmul.f32 %v6027_v49, %v6017_v21 }
 0x683   :  { %v864_v48 = vpop.xlane.xlu0 %863  ;;  %v876_v54 = vpack.c.bf16 %v871_v50, %v869_v52 }
 0x684   :  { %6028 = vrcp.f32 %v864_v48 }
 0x687   :  { %v880_v51 = vpop.permute.xlu0 %879 }
 0x688   :  { %5489 = vmatpush3.bf16.msra.mxu1 %v880_v51 }
 0x689   :  { %5500 = vmatprep.subr.bf16.mxu1 %v6330_v14 }
 0x68b   :  { %5491 = vmatmul.mubr.msk.bf16.vlgmr.msra.gmra.mxu1 %vm579_vm4, %v876_v54  ;;  %v996_v56 = vpop.permute.xlu0 %995 }
 0x68c   :  { %5501 = vmatpush3.bf16.xpose.msra.mxu1 %v1003_v55  ;;  %5502 = vmatprep.mubr.msk.bf16.mxu1 %vm6331_vm0, %v6330_v14 }
 0x68d   :  { %5512 = vmatprep.subr.bf16.mxu1 %v6330_v14 }
 0x691   :  { %v6029_v58 = vpop.eup %6028 }
 0x692   :  { %v873_v60 = vmul.f32 %v6029_v58, %v6021_v31 }
 0x693   :  { %5503 = vmatmul.mubr.msk.bf16.vlgmr.msra.gmra.mxu1 %vm476_vm1, %v996_v56 }
 0x694   :  { %5514 = vmatprep.mubr.msk.bf16.mxu1 %vm6331_vm0, %v6330_v14 }
 0x6aa   :  { %v867_v57 = vpop.xlane.xlu1 %866 }
 0x6ab   :  { %6030 = vrcp.f32 %v867_v57 }
 0x6ae   :  { %v1049_v62 = vpop.permute.xlu1 %1048 }
 0x6af   :  { %v1054_v0 = vsel %vm476_vm1, %v1049_v62, 0 }
 0x6b2   :  { %v1047_v1 = vpop.permute.xlu1 %1046 }
 0x6b8   :  { %v6031_v59 = vpop.eup %6030 }
 0x6b9   :  { %v875_v61 = vmul.f32 %v6031_v59, %v6023_v40 }
 0x6bb   :  { %v877_v63 = vpack.c.bf16 %v875_v61, %v873_v60 }
 0x6bd   :  { %5497 = vmatmul.mubr.msk.bf16.vlgmr.msra.gmra.mxu0 %vm579_vm4, %v877_v63 }
 0x6be   :  { %5507 = vmatpush3.bf16.xpose.msra.mxu0 %v1054_v0  ;;  %5508 = vmatprep.mubr.msk.bf16.mxu0 %vm6331_vm0, %v6330_v14 }
 0x6bf   :  { %5518 = vmatprep.subr.bf16.mxu0 %v6330_v14 }
 0x6c5   :  { %5509 = vmatmul.mubr.msk.bf16.vlgmr.msra.gmra.mxu0 %vm476_vm1, %v1047_v1 }
 0x6c6   :  { %5520 = vmatprep.mubr.msk.bf16.mxu0 %vm6331_vm0, %v6330_v14 }
 0x74b   :  { %v6675_v2 = vpop.f32.mrf.mxu1 }
 0x74d   :  { %v5492_v3 = vpop.f32.mrf.mxu1 }
 0x74f   :  { %v6677_v4 = vpop.f32.mrf.mxu1 }
 0x751   :  { %v5493_v5 = vpop.f32.mrf.mxu1 }
 0x753   :  { %v1039_v6 = vpop.f32.mrf.mxu1 }
 0x754   :  { %v1097_v7 = vmul.f32 0.17677669, %v1039_v6 }
 0x755   :  { %v5504_v8 = vpop.f32.mrf.mxu1 }
 0x756   :  { %v1101_v9 = vadd.f32 %v1097_v7, %v6589_v41 }
 0x757   :  { %v1042_v10 = vpop.f32.mrf.mxu1 }
 0x758   :  { %v1098_v12 = vmul.f32 0.17677669, %v1042_v10  ;;  %v1105_v13 = vsel %vm579_vm4, %v1101_v9, -inf }
 0x759   :  { %1106 = vmax.xlane.f32.xlu0 %v1105_v13  ;;  %v5505_v11 = vpop.f32.mrf.mxu1 }
 0x75a   :  { %v1102_v15 = vadd.f32 %v1098_v12, %v6592_v46 }
 0x75c   :  { %v1108_v16 = vsel %vm579_vm4, %v1102_v15, -inf }
 0x75d   :  { %1109 = vmax.xlane.f32.xlu1 %v1108_v16 }
 0x77d   :  { %v6683_v17 = vpop.f32.mrf.mxu0 }
 0x77f   :  { %v5498_v18 = vpop.f32.mrf.mxu0 }
 0x781   :  { %v6685_v19 = vpop.f32.mrf.mxu0 }
 0x783   :  { %v5499_v21 = vpop.f32.mrf.mxu0 }
 0x785   :  { %v1090_v22 = vpop.f32.mrf.mxu0 }
 0x786   :  { %v1099_v23 = vmul.f32 0.17677669, %v1090_v22 }
 0x787   :  { %v5510_v24 = vpop.f32.mrf.mxu0 }
 0x788   :  { %v1103_v25 = vadd.f32 %v1099_v23, %v6589_v41 }
 0x789   :  { %v1093_v26 = vpop.f32.mrf.mxu0 }
 0x78a   :  { %v1100_v27 = vmul.f32 0.17677669, %v1093_v26  ;;  %v1111_v31 = vsel %vm579_vm4, %v1103_v25, -inf }
 0x78b   :  { %1112 = vmax.xlane.f32.xlu0 %v1111_v31  ;;  %v5511_v34 = vpop.f32.mrf.mxu0 }
 0x78c   :  { %v1104_v36 = vadd.f32 %v1100_v27, %v6592_v46 }
 0x78e   :  { %v1114_v37 = vsel %vm579_vm4, %v1104_v36, -inf }
 0x78f   :  { %1115 = vmax.xlane.f32.xlu0 %v1114_v37 }
 0x7e2   :  { %v1107_v38 = vpop.xlane.xlu0 %1106 }
 0x7e3   :  { %v1117_v40 = vsub.f32 %v1101_v9, %v1107_v38 }
 0x7e5   :  { %v1121_v42 = vmul.f32 1.442695, %v1117_v40 }
 0x7e6   :  { %v1110_v43 = vpop.xlane.xlu1 %1109 }
 0x7e7   :  { %6032 = vpow2.f32 %v1121_v42  ;;  %v1118_v44 = vsub.f32 %v1102_v15, %v1110_v43 }
 0x7e9   :  { %v1123_v45 = vmul.f32 1.442695, %v1118_v44 }
 0x7eb   :  { %6034 = vpow2.f32 %v1123_v45 }
 0x7f4   :  { %v6033_v47 = vpop.eup %6032 }
 0x7f5   :  { %v1129_v48 = vsel %vm579_vm4, %v6033_v47, 0.0 }
 0x7f6   :  { %1130 = vadd.xlane.f32.xlu0 %v1129_v48 }
 0x7f8   :  { %v6035_v49 = vpop.eup %6034 }
 0x7f9   :  { %v1132_v50 = vsel %vm579_vm4, %v6035_v49, 0.0 }
 0x7fa   :  { %1133 = vadd.xlane.f32.xlu1 %v1132_v50 }
 0x80b   :  { %1198 = vrot.lane.b32.xlu1 %v6577_v33, %s6323_s20 }
 0x80f   :  { %1268 = vrot.lane.b32.xlu1 %v6555_v20, %s6334_s22 }
 0x814   :  { %v1113_v51 = vpop.xlane.xlu0 %1112 }
 0x815   :  { %v1119_v52 = vsub.f32 %v1103_v25, %v1113_v51 }
 0x817   :  { %v1125_v53 = vmul.f32 1.442695, %v1119_v52 }
 0x818   :  { %v1116_v54 = vpop.xlane.xlu0 %1115 }
 0x819   :  { %6036 = vpow2.f32 %v1125_v53  ;;  %v1120_v55 = vsub.f32 %v1104_v36, %v1116_v54 }
 0x81b   :  { %v1127_v56 = vmul.f32 1.442695, %v1120_v55 }
 0x81d   :  { %6038 = vpow2.f32 %v1127_v56 }
 0x826   :  { %v6037_v57 = vpop.eup %6036 }
 0x827   :  { %v1135_v58 = vsel %vm579_vm4, %v6037_v57, 0.0 }
 0x828   :  { %1136 = vadd.xlane.f32.xlu0 %v1135_v58 }
 0x82a   :  { %v6039_v59 = vpop.eup %6038 }
 0x82b   :  { %v1138_v60 = vsel %vm579_vm4, %v6039_v59, 0.0 }
 0x833   :  { %1139 = vadd.xlane.f32.xlu1 %v1138_v60 }
 0x83e   :  { %1151 = vrot.lane.b32.xlu0 %v6564_v30, %s6323_s20 }
 0x842   :  { %1266 = vrot.lane.b32.xlu0 %v6560_v28, %s6334_s22 }
 0x844   :  { %1319 = vrot.lane.b32.xlu1 %v6562_v29, %s6334_s22 }
 0x848   :  { %1317 = vrot.lane.b32.xlu1 %v6575_v32, %s6334_s22 }
 0x87f   :  { %v1131_v62 = vpop.xlane.xlu0 %1130 }
 0x883   :  { %v1134_v20 = vpop.xlane.xlu1 %1133 }
 0x884   :  { %6040 = vrcp.f32 %v1134_v20 }
 0x885   :  { %6042 = vrcp.f32 %v1131_v62 }
 0x887   :  { %v1199_v61 = vpop.permute.xlu1 %1198 }
 0x888   :  { %5519 = vmatpush3.bf16.msra.mxu0 %v1199_v61 }
 0x889   :  { %5530 = vmatprep.subr.bf16.mxu0 %v6330_v14 }
 0x88b   :  { %v1269_v6 = vpop.permute.xlu1 %1268 }
 0x88c   :  { %v1274_v32 = vsel %vm476_vm1, %v1269_v6, 0 }
 0x891   :  { %v6041_v63 = vpop.eup %6040 }
 0x892   :  { %v6043_v1 = vpop.eup %6042  ;;  %v1144_v3 = vmul.f32 %v6041_v63, %v6035_v49 }
 0x893   :  { %v1142_v28 = vmul.f32 %v6043_v1, %v6033_v47 }
 0x895   :  { %v1149_v29 = vpack.c.bf16 %v1144_v3, %v1142_v28 }
 0x8b1   :  { %v1137_v0 = vpop.xlane.xlu0 %1136 }
 0x8b2   :  { %6044 = vrcp.f32 %v1137_v0 }
 0x8b5   :  { %v1152_v5 = vpop.permute.xlu0 %1151 }
 0x8b6   :  { %5513 = vmatpush3.bf16.msra.mxu1 %v1152_v5 }
 0x8b7   :  { %5524 = vmatprep.subr.bf16.mxu1 %v6330_v14 }
 0x8b9   :  { %5515 = vmatmul.mubr.msk.bf16.vlgmr.msra.gmra.mxu1 %vm579_vm4, %v1149_v29  ;;  %v1267_v8 = vpop.permute.xlu0 %1266 }
 0x8ba   :  { %5525 = vmatpush3.bf16.xpose.msra.mxu1 %v1274_v32  ;;  %5526 = vmatprep.mubr.msk.bf16.mxu1 %vm6331_vm0, %v6330_v14 }
 0x8bb   :  { %5536 = vmatprep.subr.bf16.mxu1 %v6330_v14 }
 0x8bc   :  { %v1140_v7 = vpop.xlane.xlu1 %1139 }
 0x8bd   :  { %6046 = vrcp.f32 %v1140_v7 }
 0x8bf   :  { %v6045_v9 = vpop.eup %6044 }
 0x8c0   :  { %v1146_v12 = vmul.f32 %v6045_v9, %v6037_v57  ;;  %v1320_v11 = vpop.permute.xlu1 %1319 }
 0x8c1   :  { %5527 = vmatmul.mubr.msk.bf16.vlgmr.msra.gmra.mxu1 %vm476_vm1, %v1267_v8  ;;  %v1325_v16 = vsel %vm476_vm1, %v1320_v11, 0 }
 0x8c2   :  { %5538 = vmatprep.mubr.msk.bf16.mxu1 %vm6331_vm0, %v6330_v14 }
 0x8c4   :  { %v1318_v18 = vpop.permute.xlu1 %1317 }
 0x8ca   :  { %v6047_v10 = vpop.eup %6046 }
 0x8cb   :  { %v1148_v13 = vmul.f32 %v6047_v10, %v6039_v59 }
 0x8cd   :  { %v1150_v15 = vpack.c.bf16 %v1148_v13, %v1146_v12 }
 0x8cf   :  { %5521 = vmatmul.mubr.msk.bf16.vlgmr.msra.gmra.mxu0 %vm579_vm4, %v1150_v15 }
 0x8d0   :  { %5531 = vmatpush3.bf16.xpose.msra.mxu0 %v1325_v16  ;;  %5532 = vmatprep.mubr.msk.bf16.mxu0 %vm6331_vm0, %v6330_v14 }
 0x8d1   :  { %5542 = vmatprep.subr.bf16.mxu0 %v6330_v14 }
 0x8d7   :  { %5533 = vmatmul.mubr.msk.bf16.vlgmr.msra.gmra.mxu0 %vm476_vm1, %v1318_v18 }
 0x8d8   :  { %5544 = vmatprep.mubr.msk.bf16.mxu0 %vm6331_vm0, %v6330_v14 }
 0x979   :  { %v6725_v21 = vpop.f32.mrf.mxu1 }
 0x97b   :  { %v5516_v22 = vpop.f32.mrf.mxu1 }
 0x97d   :  { %v6727_v23 = vpop.f32.mrf.mxu1 }
 0x97f   :  { %v5517_v24 = vpop.f32.mrf.mxu1 }
 0x981   :  { %v1310_v25 = vpop.f32.mrf.mxu1 }
 0x982   :  { %v1368_v26 = vmul.f32 0.17677669, %v1310_v25 }
 0x983   :  { %v5528_v27 = vpop.f32.mrf.mxu1 }
 0x984   :  { %v1372_v31 = vadd.f32 %v1368_v26, %v6589_v41 }
 0x985   :  { %v1313_v34 = vpop.f32.mrf.mxu1 }
 0x986   :  { %v1369_v36 = vmul.f32 0.17677669, %v1313_v34  ;;  %v1376_v37 = vsel %vm579_vm4, %v1372_v31, -inf }
 0x987   :  { %1377 = vmax.xlane.f32.xlu0 %v1376_v37  ;;  %v5529_v38 = vpop.f32.mrf.mxu1 }
 0x988   :  { %v1373_v40 = vadd.f32 %v1369_v36, %v6592_v46 }
 0x98a   :  { %v1379_v42 = vsel %vm579_vm4, %v1373_v40, -inf }
 0x98b   :  { %1380 = vmax.xlane.f32.xlu1 %v1379_v42  ;;  %v5776_v42 = vld [vmem:[#allocation3 + $0x38] sm:$0xff]  }
 0x98f   :  { %v1238_v43 = vpop.f32.mrf.mxu0 }
 0x991   :  { %v5522_v44 = vpop.f32.mrf.mxu0 }
 0x992   :  { %v5778_v44 = vld [vmem:[#allocation3 + $0x28] sm:$0xff]  }
 0x993   :  { %v1241_v45 = vpop.f32.mrf.mxu0 }
 0x995   :  { %v5523_v47 = vpop.f32.mrf.mxu0 }
 0x996   :  { %v5780_v47 = vld [vmem:[#allocation3 + $0x18] sm:$0xff]  }
 0x997   :  { %v1361_v48 = vpop.f32.mrf.mxu0 }
 0x998   :  { %v1370_v49 = vmul.f32 0.17677669, %v1361_v48 }
 0x999   :  { %v5534_v50 = vpop.f32.mrf.mxu0 }
 0x99a   :  { %v1374_v51 = vadd.f32 %v1370_v49, %v6589_v41  ;;  %v5781_v50 = vld [vmem:[#allocation3 + $0x10] sm:$0xff]  }
 0x99b   :  { %v1364_v52 = vpop.f32.mrf.mxu0 }
 0x99c   :  { %v1371_v53 = vmul.f32 0.17677669, %v1364_v52  ;;  %v1382_v54 = vsel %vm579_vm4, %v1374_v51, -inf }
 0x99d   :  { %1383 = vmax.xlane.f32.xlu0 %v1382_v54  ;;  %v5535_v55 = vpop.f32.mrf.mxu0  ;;  %v5783_v54 = vld [vmem:[#allocation3] sm:$0xff]  }
 0x99e   :  { %v1375_v56 = vadd.f32 %v1371_v53, %v6592_v46  ;;  %v5782_v53 = vld [vmem:[#allocation3 + $0x8] sm:$0xff]  }
 0x9a0   :  { %v1385_v57 = vsel %vm579_vm4, %v1375_v56, -inf }
 0x9a1   :  { %1386 = vmax.xlane.f32.xlu0 %v1385_v57 }
 0xa10   :  { %v1378_v58 = vpop.xlane.xlu0 %1377 }
 0xa11   :  { %v1388_v59 = vsub.f32 %v1372_v31, %v1378_v58 }
 0xa13   :  { %v1392_v60 = vmul.f32 1.442695, %v1388_v59 }
 0xa14   :  { %v1381_v20 = vpop.xlane.xlu1 %1380 }
 0xa15   :  { %6048 = vpow2.f32 %v1392_v60  ;;  %v1389_v61 = vsub.f32 %v1373_v40, %v1381_v20 }
 0xa17   :  { %v1394_v62 = vmul.f32 1.442695, %v1389_v61 }
 0xa19   :  { %6050 = vpow2.f32 %v1394_v62 }
 0xa22   :  { %v6049_v63 = vpop.eup %6048 }
 0xa23   :  { %v1400_v0 = vsel %vm579_vm4, %v6049_v63, 0.0 }
 0xa24   :  { %1401 = vadd.xlane.f32.xlu0 %v1400_v0 }
 0xa26   :  { %v6051_v1 = vpop.eup %6050  ;;  %v1384_v3 = vpop.xlane.xlu0 %1383 }
 0xa27   :  { %v1390_v5 = vsub.f32 %v1374_v51, %v1384_v3  ;;  %v1403_v28 = vsel %vm579_vm4, %v6051_v1, 0.0 }
 0xa28   :  { %1404 = vadd.xlane.f32.xlu1 %v1403_v28 }
 0xa29   :  { %v1396_v6 = vmul.f32 1.442695, %v1390_v5 }
 0xa2a   :  { %v1387_v29 = vpop.xlane.xlu0 %1386 }
 0xa2b   :  { %6052 = vpow2.f32 %v1396_v6  ;;  %v1391_v32 = vsub.f32 %v1375_v56, %v1387_v29  ;;  %v4971_v6 = vld [vmem:[#allocation6] ss:$0 sm:$0xff] }
 0xa2d   :  { %v1398_v7 = vmul.f32 1.442695, %v1391_v32 }
 0xa2f   :  { %6054 = vpow2.f32 %v1398_v7 }
 0xa38   :  { %v6053_v8 = vpop.eup %6052 }
 0xa39   :  { %v1406_v9 = vsel %vm579_vm4, %v6053_v8, 0.0 }
 0xa3a   :  { %1407 = vadd.xlane.f32.xlu0 %v1406_v9  ;;  %v6160_v9 = vld [vmem:[%s7285_s0] sm:$0xff] }
 0xa3c   :  { %v6055_v10 = vpop.eup %6054 }
 0xa3d   :  { %v1409_v12 = vsel %vm579_vm4, %v6055_v10, 0.0 }
 0xa3e   :  { %1410 = vadd.xlane.f32.xlu1 %v1409_v12 }
 0xa4f   :  { %1469 = vrot.lane.b32.xlu1 %v6577_v33, %s6334_s22 }
 0xa50   :  { %1422 = vrot.lane.b32.xlu0 %v6564_v30, %s6334_s22 }
 0xa53   :  { %978 = vrot.lane.b32.xlu1 %v6675_v2, %s6334_s22 }
 0xa54   :  { %982 = vrot.lane.b32.xlu0 %v6683_v17, %s6334_s22 }
 0xa57   :  { %980 = vrot.lane.b32.xlu1 %v6677_v4, %s6334_s22 }
 0xa58   :  { %1249 = vrot.lane.b32.xlu0 %v6725_v21, %s6323_s20 }
 0xa5b   :  { %984 = vrot.lane.b32.xlu1 %v6685_v19, %s6334_s22 }
 0xa5c   :  { %1253 = vrot.lane.b32.xlu0 %v1238_v43, %s6323_s20  ;;  %v5777_v43 = vld [vmem:[#allocation3 + $0x30] sm:$0xff]  }
 0xa5f   :  { %1251 = vrot.lane.b32.xlu1 %v6727_v23, %s6323_s20 }
 0xa63   :  { %1255 = vrot.lane.b32.xlu1 %v1241_v45, %s6323_s20  ;;  %v5779_v45 = vld [vmem:[#allocation3 + $0x20] sm:$0xff]  }
 0xaad   :  { %v1402_v33 = vpop.xlane.xlu0 %1401 }
 0xab1   :  { %v1405_v30 = vpop.xlane.xlu1 %1404 }
 0xab2   :  { %6056 = vrcp.f32 %v1405_v30 }
 0xab3   :  { %6058 = vrcp.f32 %v1402_v33  ;;  %v6161_v33 = vld [vmem:[%s7285_s0 + $0x10] sm:$0xff] }
 0xabf   :  { %v6057_v2 = vpop.eup %6056 }
 0xac0   :  { %v6059_v4 = vpop.eup %6058  ;;  %v1415_v13 = vmul.f32 %v6057_v2, %v6051_v1 }
 0xac1   :  { %v1413_v16 = vmul.f32 %v6059_v4, %v6049_v63  ;;  %v6162_v4 = vld [vmem:[%s7285_s0 + $0x8] sm:$0xff] }
 0xac3   :  { %v1408_v17 = vpop.xlane.xlu0 %1407  ;;  %v1420_v19 = vpack.c.bf16 %v1415_v13, %v1413_v16  ;;  %v5784_v16 = vld [vmem:[#allocation8 + $0xe0] ss:$16 sps:$4 sm:$0xff]  }
 0xac4   :  { %6060 = vrcp.f32 %v1408_v17 }
 0xac7   :  { %v1411_v11 = vpop.xlane.xlu1 %1410  ;;  %v1423_v15 = vpop.permute.xlu0 %1422 }
 0xac8   :  { %6062 = vrcp.f32 %v1411_v11  ;;  %5537 = vmatpush3.bf16.msra.mxu1 %v1423_v15  ;;  %v6163_v11 = vld [vmem:[%s7285_s0 + $0x18] sm:$0xff] }
 0xac9   :  { %5548 = vmatprep.subr.bf16.mxu1 %v5776_v42 }
 0xacb   :  { %v1470_v18 = vpop.permute.xlu1 %1469  ;;  %5539 = vmatmul.mubr.msk.bf16.vlgmr.msra.gmra.mxu1 %vm579_vm4, %v1420_v19  ;;  %v983_v21 = vpop.permute.xlu0 %982  ;;  %v5786_v19 = vld [vmem:[#allocation8 + $0xe4] ss:$16 sps:$4 sm:$0xff]  }
 0xacc   :  { %993 = vst.msk [vmem:[#allocation2 + $0x10] sm:$0xff] %vm990_vm5, %v983_v21  ;;  %5543 = vmatpush3.bf16.msra.mxu0 %v1470_v18  ;;  %5549 = vmatpush3.bf16.msra.mxu1 %v5776_v42  ;;  %v5787_v18 = vld [vmem:[#allocation8 + $0xe8] ss:$16 sps:$4 sm:$0xff]   ;;  %v5789_v21 = vld [vmem:[#allocation8 + $0xec] ss:$16 sps:$4 sm:$0xff]  }
 0xacd   :  { %5550 = vmatprep.subr.bf16.mxu1 %v5777_v43  ;;  %1935 = vmatprep.subr.bf16.mxu0 %v5786_v19 }
 0xacf   :  { %v979_v22 = vpop.permute.xlu1 %978  ;;  %v1250_v23 = vpop.permute.xlu0 %1249 }
 0xad0   :  { %991 = vst.msk [vmem:[#allocation2] sm:$0xff] %vm990_vm5, %v979_v22  ;;  %5551 = vmatpush3.bf16.msra.mxu1 %v5777_v43 }
 0xad1   :  { %1262 = vst.msk [vmem:[#allocation2] sm:$0xff] %vm1261_vm6, %v1250_v23  ;;  %v6061_v24 = vpop.eup %6060  ;;  %5552 = vmatprep.subr.bf16.mxu1 %v5778_v44 }
 0xad2   :  { %v1417_v31 = vmul.f32 %v6061_v24, %v6053_v8 }
 0xad3   :  { %v981_v25 = vpop.permute.xlu1 %980  ;;  %v1254_v26 = vpop.permute.xlu0 %1253 }
 0xad4   :  { %992 = vst.msk [vmem:[#allocation2 + $0x8] sm:$0xff] %vm990_vm5, %v981_v25  ;;  %5553 = vmatpush3.bf16.msra.mxu1 %v5778_v44 }
 0xad5   :  { %1264 = vst.msk [vmem:[#allocation2 + $0x10] sm:$0xff] %vm1261_vm6, %v1254_v26  ;;  %v6063_v27 = vpop.eup %6062  ;;  %5554 = vmatprep.subr.bf16.mxu1 %v5779_v45 }
 0xad6   :  { %v1419_v34 = vmul.f32 %v6063_v27, %v6055_v10 }
 0xad7   :  { %v985_v36 = vpop.permute.xlu1 %984 }
 0xad8   :  { %994 = vst.msk [vmem:[#allocation2 + $0x18] sm:$0xff] %vm990_vm5, %v985_v36  ;;  %v1421_v37 = vpack.c.bf16 %v1419_v34, %v1417_v31  ;;  %5555 = vmatpush3.bf16.msra.mxu1 %v5779_v45 }
 0xad9   :  { %5556 = vmatprep.subr.bf16.mxu1 %v5780_v47 }
 0xada   :  { %5545 = vmatmul.mubr.msk.bf16.vlgmr.msra.gmra.mxu0 %vm579_vm4, %v1421_v37 }
 0xadb   :  { %v1252_v38 = vpop.permute.xlu1 %1251  ;;  %1967 = vmatprep.mubr.bf16.mxu0 %v6329_v39  ;;  %1936 = vmatpush1.bf16.msra.mxu0 %v5784_v16 }
 0xadc   :  { %1263 = vst.msk [vmem:[#allocation2 + $0x8] sm:$0xff] %vm1261_vm6, %v1252_v38  ;;  %5557 = vmatpush3.bf16.msra.mxu1 %v5780_v47  ;;  %v5792_v47 = vld [vmem:[#allocation8 + $0xc4] ss:$16 sps:$4 sm:$0xff]  }
 0xadd   :  { %5558 = vmatprep.subr.bf16.mxu1 %v5781_v50  ;;  %1937 = vmatprep.subr.bf16.mxu0 %v5792_v47  ;;  %v6165_v47 = vld [vmem:[%s7287_s2] ss:$0 sm:$0xff] }
 0xadf   :  { %v1256_v40 = vpop.permute.xlu1 %1255 }
 0xae0   :  { %1265 = vst.msk [vmem:[#allocation2 + $0x18] sm:$0xff] %vm1261_vm6, %v1256_v40  ;;  %5559 = vmatpush3.bf16.msra.mxu1 %v5781_v50  ;;  %v5793_v50 = vld [vmem:[#allocation8 + $0xc8] ss:$16 sps:$4 sm:$0xff]  }
 0xae1   :  { %5560 = vmatprep.subr.bf16.mxu1 %v5782_v53 }
 0xae4   :  { %5561 = vmatpush3.bf16.msra.mxu1 %v5782_v53  ;;  %v5796_v53 = vld [vmem:[#allocation8 + $0xa0] ss:$16 sps:$4 sm:$0xff]  }
 0xae5   :  { %5562 = vmatprep.subr.bf16.mxu1 %v5783_v54 }
 0xae8   :  { %5563 = vmatpush3.bf16.msra.mxu1 %v5783_v54  ;;  %v5799_v54 = vld [vmem:[#allocation8 + $0xa8] ss:$16 sps:$4 sm:$0xff]  }
 0xae9   :  { %1988 = vmatprep.subr.bf16.mxu1 %v5789_v21 }
 0xb8b   :  { %v1462_v48 = vpop.f32.mrf.mxu1 }
 0xb8c   :  { %1520 = vrot.lane.b32.xlu0 %v1462_v48, %s6333_s21  ;;  %v5795_v48 = vld [vmem:[#allocation8 + $0xcc] ss:$16 sps:$4 sm:$0xff]  }
 0xb8d   :  { %v5540_v49 = vpop.f32.mrf.mxu1 }
 0xb8e   :  { %v5790_v49 = vld [vmem:[#allocation8 + $0xc0] ss:$16 sps:$4 sm:$0xff]  }
 0xb8f   :  { %v1465_v51 = vpop.f32.mrf.mxu1  ;;  %1938 = vmatpush1.bf16.msra.mxu0 %v5790_v49 }
 0xb90   :  { %1522 = vrot.lane.b32.xlu1 %v1465_v51, %s6333_s21  ;;  %v5798_v51 = vld [vmem:[#allocation8 + $0xa4] ss:$16 sps:$4 sm:$0xff]  }
 0xb91   :  { %v5541_v52 = vpop.f32.mrf.mxu1  ;;  %1939 = vmatprep.subr.bf16.mxu0 %v5798_v51 }
 0xb92   :  { %v5801_v52 = vld [vmem:[#allocation8 + $0xac] ss:$16 sps:$4 sm:$0xff]  }
 0xb93   :  { %1940 = vmatpush1.bf16.msra.mxu0 %v5796_v53  ;;  %v5835_v53 = vld [vmem:[#allocation9 + $0xb8] sm:$0xff]  }
 0xb9a   :  { %v1509_v55 = vpop.f32.mrf.mxu0 }
 0xb9b   :  { %1524 = vrot.lane.b32.xlu0 %v1509_v55, %s6333_s21  ;;  %v5804_v55 = vld [vmem:[#allocation8 + $0x84] ss:$16 sps:$4 sm:$0xff]  }
 0xb9c   :  { %v5546_v56 = vpop.f32.mrf.mxu0  ;;  %1941 = vmatprep.subr.bf16.mxu0 %v5804_v55  ;;  %v5837_v55 = vld [vmem:[#allocation9 + $0xf0] sm:$0xff]  }
 0xb9d   :  { %v5807_v56 = vld [vmem:[#allocation8 + $0x8c] ss:$16 sps:$4 sm:$0xff]  }
 0xb9e   :  { %v1512_v57 = vpop.f32.mrf.mxu0 }
 0xb9f   :  { %1526 = vrot.lane.b32.xlu1 %v1512_v57, %s6333_s21  ;;  %v5802_v57 = vld [vmem:[#allocation8 + $0x80] ss:$16 sps:$4 sm:$0xff]  }
 0xba0   :  { %v5547_v58 = vpop.f32.mrf.mxu0  ;;  %1942 = vmatpush1.bf16.msra.mxu0 %v5802_v57 }
 0xba1   :  { %v5805_v58 = vld [vmem:[#allocation8 + $0x88] ss:$16 sps:$4 sm:$0xff]  }
 0xbfe   :  { %v1521_v59 = vpop.permute.xlu0 %1520 }
 0xbff   :  { %1533 = vst.msk [vmem:[#allocation2] sm:$0xff] %vm1532_vm7, %v1521_v59  ;;  %v5808_v59 = vld [vmem:[#allocation8 + $0x60] ss:$16 sps:$4 sm:$0xff]  }
 0xc02   :  { %v1523_v60 = vpop.permute.xlu1 %1522 }
 0xc03   :  { %1534 = vst.msk [vmem:[#allocation2 + $0x8] sm:$0xff] %vm1532_vm7, %v1523_v60  ;;  %v5810_v60 = vld [vmem:[#allocation8 + $0x64] ss:$16 sps:$4 sm:$0xff]  }
 0xc04   :  { %1943 = vmatprep.subr.bf16.mxu0 %v5810_v60 }
 0xc05   :  { %1944 = vmatpush1.bf16.msra.mxu0 %v5808_v59  ;;  %v5841_v59 = vld [vmem:[#allocation9 + $0xe8] sm:$0xff]  }
 0xc06   :  { %v1537_v20 = vld [vmem:[#allocation2] sm:$0xff] }
 0xc0a   :  { %v1538_v61 = vld [vmem:[#allocation2 + $0x8] sm:$0xff] }
 0xc0b   :  { %v1541_v62 = vpack.c.bf16 %v1538_v61, %v1537_v20  ;;  %v5811_v20 = vld [vmem:[#allocation8 + $0x68] ss:$16 sps:$4 sm:$0xff]   ;;  %v5813_v61 = vld [vmem:[#allocation8 + $0x6c] ss:$16 sps:$4 sm:$0xff]  }
 0xc0d   :  { %5564 = vmatprep.mubr.bf16.mxu1 %v1541_v62  ;;  %v1525_v63 = vpop.permute.xlu0 %1524  ;;  %v5816_v62 = vld [vmem:[#allocation8 + $0x44] ss:$16 sps:$4 sm:$0xff]  }
 0xc0e   :  { %1535 = vst.msk [vmem:[#allocation2 + $0x10] sm:$0xff] %vm1532_vm7, %v1525_v63  ;;  %v5819_v63 = vld [vmem:[#allocation8 + $0x4c] ss:$16 sps:$4 sm:$0xff]   ;;  %1945 = vmatprep.subr.bf16.mxu0 %v5816_v62 }
 0xc0f   :  { %v5843_v62 = vld [vmem:[#allocation9 + $0xa8] sm:$0xff]  }
 0xc11   :  { %v1527_v0 = vpop.permute.xlu1 %1526 }
 0xc12   :  { %1536 = vst.msk [vmem:[#allocation2 + $0x18] sm:$0xff] %vm1532_vm7, %v1527_v0  ;;  %v5814_v0 = vld [vmem:[#allocation8 + $0x40] ss:$16 sps:$4 sm:$0xff]  }
 0xc13   :  { %1946 = vmatpush1.bf16.msra.mxu0 %v5814_v0  ;;  %v5845_v0 = vld [vmem:[#allocation9 + $0xe0] sm:$0xff]  }
 0xc15   :  { %v1539_v1 = vld [vmem:[#allocation2 + $0x10] sm:$0xff] }
 0xc19   :  { %v1540_v3 = vld [vmem:[#allocation2 + $0x18] sm:$0xff] }
 0xc1a   :  { %v1542_v5 = vpack.c.bf16 %v1540_v3, %v1539_v1  ;;  %v5817_v1 = vld [vmem:[#allocation8 + $0x48] ss:$16 sps:$4 sm:$0xff]   ;;  %v5822_v3 = vld [vmem:[#allocation8 + $0x24] ss:$16 sps:$4 sm:$0xff]  }
 0xc1b   :  { %1947 = vmatprep.subr.bf16.mxu0 %v5822_v3  ;;  %v5847_v3 = vld [vmem:[#allocation9 + $0xa0] sm:$0xff]  }
 0xc1c   :  { %5565 = vmatmul.mubr.bf16.vlgmr.msra.gmra.mxu1 %v1542_v5  ;;  %v5825_v5 = vld [vmem:[#allocation8 + $0x2c] ss:$16 sps:$4 sm:$0xff]  }
 0xc1d   :  { %2020 = vmatprep.mubr.bf16.mxu1 %v6329_v39  ;;  %1989 = vmatpush1.bf16.msra.mxu1 %v5787_v18 }
 0xc1e   :  { %1990 = vmatprep.subr.bf16.mxu1 %v5795_v48 }
 0xc21   :  { %1991 = vmatpush1.bf16.msra.mxu1 %v5793_v50 }
 0xc22   :  { %1992 = vmatprep.subr.bf16.mxu1 %v5801_v52  ;;  %v5834_v52 = vld [vmem:[#allocation9 + $0x38] sm:$0xff]  }
 0xc25   :  { %1993 = vmatpush1.bf16.msra.mxu1 %v5799_v54  ;;  %v5836_v54 = vld [vmem:[#allocation9 + $0x70] sm:$0xff]  }
 0xc26   :  { %1994 = vmatprep.subr.bf16.mxu1 %v5807_v56 }
 0xc29   :  { %1995 = vmatpush1.bf16.msra.mxu1 %v5805_v58  ;;  %v5838_v58 = vld [vmem:[#allocation9 + $0x30] sm:$0xff]  }
 0xc2a   :  { %1996 = vmatprep.subr.bf16.mxu1 %v5813_v61  ;;  %v5842_v61 = vld [vmem:[#allocation9 + $0x28] sm:$0xff]  }
 0xc2d   :  { %1997 = vmatpush1.bf16.msra.mxu1 %v5811_v20 }
 0xc2e   :  { %1998 = vmatprep.subr.bf16.mxu1 %v5819_v63  ;;  %v5844_v63 = vld [vmem:[#allocation9 + $0x60] sm:$0xff]  }
 0xc31   :  { %1999 = vmatpush1.bf16.msra.mxu1 %v5817_v1  ;;  %v5846_v1 = vld [vmem:[#allocation9 + $0x20] sm:$0xff]  }
 0xc32   :  { %2000 = vmatprep.subr.bf16.mxu1 %v5825_v5  ;;  %v5848_v5 = vld [vmem:[#allocation9 + $0x58] sm:$0xff]  }
 0xcdc   :  { %v5566_v28 = vpop.f32.mrf.mxu1 }
 0xcdd   :  { %v1657_v8 = vadd.f32 %v5566_v28, %v4971_v6  ;;  %v5820_v28 = vld [vmem:[#allocation8 + $0x20] ss:$16 sps:$4 sm:$0xff]  }
 0xcde   :  { %v1648_v29 = vpop.f32.mrf.mxu1  ;;  %1948 = vmatpush1.bf16.msra.mxu0 %v5820_v28  ;;  %v5849_v28 = vld [vmem:[#allocation9 + $0xd8] sm:$0xff]  }
 0xcdf   :  { %v1649_v32 = vadd.f32 %v4971_v6, %v1648_v29  ;;  %v6788_v2 = vadd.f32 %v6161_v33, %v1657_v8  ;;  %v5828_v29 = vld [vmem:[#allocation8 + $0x4] ss:$16 sps:$4 sm:$0xff]   ;;  %v5829_v8 = vld [vmem:[#allocation8 + $0x8] ss:$16 sps:$4 sm:$0xff]  }
 0xce0   :  { %v5567_v7 = vpop.f32.mrf.mxu1  ;;  %1949 = vmatprep.subr.bf16.mxu0 %v5828_v29  ;;  %v5851_v29 = vld [vmem:[#allocation9 + $0x98] sm:$0xff]  }
 0xce1   :  { %v6782_v10 = vadd.f32 %v6160_v9, %v1649_v32  ;;  %v1660_v17 = vadd.f32 %v5567_v7, %v4971_v6  ;;  %v5831_v32 = vld [vmem:[#allocation8 + $0xc] ss:$16 sps:$4 sm:$0xff]   ;;  %v5826_v7 = vld [vmem:[#allocation8] ss:$16 sps:$4 sm:$0xff]  }
 0xce2   :  { %v1651_v12 = vpop.f32.mrf.mxu1  ;;  %1950 = vmatpush1.bf16.msra.mxu0 %v5826_v7  ;;  %v5832_v9 = vld [vmem:[#allocation9 + $0x78] sm:$0xff]   ;;  %v5853_v7 = vld [vmem:[#allocation9 + $0xd0] sm:$0xff]  }
 0xce3   :  { %v1652_v30 = vadd.f32 %v4971_v6, %v1651_v12  ;;  %1667 = vadd.xlane.f32.xlu0 %v6782_v10  ;;  %v6800_v15 = vadd.f32 %v6163_v11, %v1660_v17  ;;  %v5823_v6 = vld [vmem:[#allocation8 + $0x28] ss:$16 sps:$4 sm:$0xff]   ;;  %5258 = vmatprep.subr.bf16.mxu0 %v5832_v9  ;;  %v5855_v9 = vld [vmem:[#allocation9 + $0x90] sm:$0xff]  }
 0xce4   :  { %2001 = vmatpush1.bf16.msra.mxu1 %v5823_v6  ;;  %v5833_v12 = vld [vmem:[#allocation9 + $0xf8] sm:$0xff]  }
 0xce5   :  { %v6793_v13 = vadd.f32 %v6162_v4, %v1652_v30  ;;  %2002 = vmatprep.subr.bf16.mxu1 %v5831_v32  ;;  %v5850_v6 = vld [vmem:[#allocation9 + $0x18] sm:$0xff]   ;;  %v5852_v32 = vld [vmem:[#allocation9 + $0x50] sm:$0xff]  }
 0xce7   :  { %1669 = vadd.xlane.f32.xlu1 %v6793_v13  ;;  %1671 = vadd.xlane.f32.xlu0 %v6788_v2 }
 0xce8   :  { %2003 = vmatpush1.bf16.msra.mxu1 %v5829_v8  ;;  %v5854_v8 = vld [vmem:[#allocation9 + $0x10] sm:$0xff]  }
 0xce9   :  { %5286 = vmatprep.subr.bf16.mxu1 %v5833_v12  ;;  %v5856_v12 = vld [vmem:[#allocation9 + $0x48] sm:$0xff]  }
 0xceb   :  { %1673 = vadd.xlane.f32.xlu0 %v6800_v15 }
 0xd6c   :  { %v1668_v22 = vpop.xlane.xlu0 %1667 }
 0xd6d   :  { %v1675_v23 = vmul.f32 0.0078125, %v1668_v22 }
 0xd6f   :  { %v6804_v24 = vsub.f32 %v6782_v10, %v1675_v23 }
 0xd70   :  { %v1670_v25 = vpop.xlane.xlu1 %1669  ;;  %v1672_v26 = vpop.xlane.xlu0 %1671 }
 0xd71   :  { %v1676_v27 = vmul.f32 0.0078125, %v1670_v25  ;;  %v1677_v31 = vmul.f32 0.0078125, %v1672_v26  ;;  %v1683_v34 = vmul.f32 %v6804_v24, %v6804_v24 }
 0xd73   :  { %v6809_v36 = vsub.f32 %v6793_v13, %v1676_v27  ;;  %v6812_v37 = vsub.f32 %v6788_v2, %v1677_v31  ;;  %1687 = vadd.xlane.f32.xlu0 %v1683_v34 }
 0xd74   :  { %v1674_v38 = vpop.xlane.xlu0 %1673 }
 0xd75   :  { %v1678_v40 = vmul.f32 0.0078125, %v1674_v38  ;;  %v1684_v42 = vmul.f32 %v6809_v36, %v6809_v36  ;;  %v1685_v43 = vmul.f32 %v6812_v37, %v6812_v37  ;;  %v6164_v38 = vld [vmem:[%s7286_s1] ss:$0 sm:$0xff] }
 0xd77   :  { %v6819_v44 = vsub.f32 %v6800_v15, %v1678_v40  ;;  %1689 = vadd.xlane.f32.xlu1 %v1684_v42  ;;  %1691 = vadd.xlane.f32.xlu0 %v1685_v43 }
 0xd79   :  { %v1686_v45 = vmul.f32 %v6819_v44, %v6819_v44 }
 0xd7b   :  { %1693 = vadd.xlane.f32.xlu1 %v1686_v45 }
 0xdfc   :  { %v1688_v30 = vpop.xlane.xlu0 %1687 }
 0xdfd   :  { %v1695_v33 = vmul.f32 0.0078125, %v1688_v30  ;;  %v5857_v30 = vld [vmem:[#allocation9 + $0xc8] sm:$0xff]  }
 0xdff   :  { %v1699_v17 = vadd.f32 1e-05, %v1695_v33  ;;  %v5858_v33 = vld [vmem:[#allocation9 + $0x8] sm:$0xff]  }
 0xe00   :  { %v1690_v4 = vpop.xlane.xlu1 %1689  ;;  %v1692_v11 = vpop.xlane.xlu0 %1691 }
 0xe01   :  { %6064 = vrsqrt.f32 %v1699_v17  ;;  %v1696_v16 = vmul.f32 0.0078125, %v1690_v4  ;;  %v1697_v19 = vmul.f32 0.0078125, %v1692_v11  ;;  %v5859_v17 = vld [vmem:[#allocation9 + $0x88] sm:$0xff]   ;;  %v5860_v4 = vld [vmem:[#allocation9 + $0x40] sm:$0xff]  }
 0xe02   :  { %v5861_v11 = vld [vmem:[#allocation9 + $0xc0] sm:$0xff]  }
 0xe03   :  { %v1700_v18 = vadd.f32 1e-05, %v1696_v16  ;;  %v1701_v21 = vadd.f32 1e-05, %v1697_v19  ;;  %v5862_v16 = vld [vmem:[#allocation9] sm:$0xff]  }
 0xe04   :  { %v1694_v22 = vpop.xlane.xlu1 %1693  ;;  %v5863_v19 = vld [vmem:[#allocation9 + $0x80] sm:$0xff]  }
 0xe05   :  { %6066 = vrsqrt.f32 %v1700_v18  ;;  %v1698_v23 = vmul.f32 0.0078125, %v1694_v22  ;;  %v1761_v18 = vsub.s32 1, %v6585_v35  ;;  %v1757_v22 = vsub.s32 0, %v6585_v35 }
 0xe06   :  { %6068 = vrsqrt.f32 %v1701_v21  ;;  %v1769_v21 = vsub.s32 3, %v6585_v35 }
 0xe07   :  { %v1702_v25 = vadd.f32 1e-05, %v1698_v23  ;;  %v1765_v23 = vsub.s32 2, %v6585_v35 }
 0xe09   :  { %6070 = vrsqrt.f32 %v1702_v25  ;;  %v1753_v25 = vld [vmem:[%s7292_s7] sm:$0xf] }
 0xe0e   :  { %v6065_v26 = vpop.eup %6064 }
 0xe0f   :  { %v1707_v27 = vmul.f32 %v6065_v26, %v6804_v24 }
 0xe11   :  { %v1711_v40 = vmul.f32 %v6164_v38, %v1707_v27 }
 0xe12   :  { %v6067_v31 = vpop.eup %6066 }
 0xe13   :  { %v1708_v34 = vmul.f32 %v6067_v31, %v6809_v36  ;;  %v6069_v42 = vpop.eup %6068  ;;  %v1715_v48 = vadd.f32 %v6165_v47, %v1711_v40  ;;  %v1762_v31 = vrot.slane %v1753_v25, %v1761_v18  ;;  %v1766_v40 = vrot.slane %v1753_v25, %v1765_v23 }
 0xe14   :  { %v1709_v50 = vmul.f32 %v6069_v42, %v6812_v37  ;;  %v5839_v37 = vld [vmem:[#allocation9 + $0xb0] sm:$0xff]  }
 0xe15   :  { %v1712_v43 = vmul.f32 %v6164_v38, %v1708_v34  ;;  %v1770_v34 = vrot.slane %v1753_v25, %v1769_v21 }
 0xe16   :  { %v6071_v45 = vpop.eup %6070  ;;  %v1713_v56 = vmul.f32 %v6164_v38, %v1709_v50 }
 0xe17   :  { %v1716_v49 = vadd.f32 %v6165_v47, %v1712_v43  ;;  %v1710_v24 = vmul.f32 %v6071_v45, %v6819_v44  ;;  %v5840_v44 = vld [vmem:[#allocation9 + $0x68] sm:$0xff]  }
 0xe18   :  { %v1717_v60 = vadd.f32 %v6165_v47, %v1713_v56 }
 0xe19   :  { %v1719_v51 = vpack.c.bf16 %v1716_v49, %v1715_v48  ;;  %v1714_v36 = vmul.f32 %v6164_v38, %v1710_v24  ;;  %v1758_v38 = vrot.slane %v1753_v25, %v1757_v22 }
 0xe1b   :  { %1968 = vmatmul.mubr.bf16.vlgmr.msra.gmra.mxu0 %v1719_v51  ;;  %2021 = vmatmul.mubr.bf16.vlgmr.msra.gmra.mxu1 %v1719_v51  ;;  %v1718_v57 = vadd.f32 %v6165_v47, %v1714_v36 }
 0xe1c   :  { %1977 = vmatprep.mubr.bf16.mxu0 %v6329_v39  ;;  %2030 = vmatprep.mubr.bf16.mxu1 %v6329_v39 }
 0xe1d   :  { %5259 = vmatpush3.bf16.msra.mxu0 %v5834_v52  ;;  %5287 = vmatpush3.bf16.msra.mxu1 %v5835_v53  ;;  %v1720_v20 = vpack.c.bf16 %v1718_v57, %v1717_v60 }
 0xe1e   :  { %5260 = vmatprep.subr.bf16.mxu0 %v5836_v54  ;;  %5288 = vmatprep.subr.bf16.mxu1 %v5837_v55 }
 0xe21   :  { %5261 = vmatpush3.bf16.msra.mxu0 %v5838_v58  ;;  %5289 = vmatpush3.bf16.msra.mxu1 %v5839_v37 }
 0xe22   :  { %5262 = vmatprep.subr.bf16.mxu0 %v5840_v44  ;;  %5290 = vmatprep.subr.bf16.mxu1 %v5841_v59 }
 0xe23   :  { %1978 = vmatmul.mubr.bf16.gmra.mxu0 %v1720_v20  ;;  %2031 = vmatmul.mubr.bf16.gmra.mxu1 %v1720_v20 }
 0xe25   :  { %5263 = vmatpush3.bf16.msra.mxu0 %v5842_v61  ;;  %5291 = vmatpush3.bf16.msra.mxu1 %v5843_v62 }
 0xe26   :  { %5264 = vmatprep.subr.bf16.mxu0 %v5844_v63  ;;  %5292 = vmatprep.subr.bf16.mxu1 %v5845_v0 }
 0xe29   :  { %5265 = vmatpush3.bf16.msra.mxu0 %v5846_v1  ;;  %5293 = vmatpush3.bf16.msra.mxu1 %v5847_v3 }
 0xe2a   :  { %5266 = vmatprep.subr.bf16.mxu0 %v5848_v5  ;;  %5294 = vmatprep.subr.bf16.mxu1 %v5849_v28 }
 0xe2d   :  { %5267 = vmatpush3.bf16.msra.mxu0 %v5850_v6  ;;  %5295 = vmatpush3.bf16.msra.mxu1 %v5851_v29 }
 0xe2e   :  { %5268 = vmatprep.subr.bf16.mxu0 %v5852_v32  ;;  %5296 = vmatprep.subr.bf16.mxu1 %v5853_v7 }
 0xe31   :  { %5269 = vmatpush3.bf16.msra.mxu0 %v5854_v8  ;;  %5297 = vmatpush3.bf16.msra.mxu1 %v5855_v9 }
 0xe32   :  { %5270 = vmatprep.subr.bf16.mxu0 %v5856_v12  ;;  %5298 = vmatprep.subr.bf16.mxu1 %v5857_v30 }
 0xe35   :  { %5271 = vmatpush3.bf16.msra.mxu0 %v5858_v33  ;;  %5299 = vmatpush3.bf16.msra.mxu1 %v5859_v17 }
 0xe36   :  { %5272 = vmatprep.subr.bf16.mxu0 %v5860_v4  ;;  %5300 = vmatprep.subr.bf16.mxu1 %v5861_v11 }
 0xe39   :  { %5273 = vmatpush3.bf16.msra.mxu0 %v5862_v16  ;;  %5301 = vmatpush3.bf16.msra.mxu1 %v5863_v19 }
 0xedb   :  { %v1969_v26 = vpop.f32.mrf.mxu0  ;;  %v2022_v27 = vpop.f32.mrf.mxu1 }
 0xedc   :  { %v1970_v51 = vadd.f32 %v1969_v26, %v1758_v38  ;;  %v2023_v36 = vadd.f32 %v2022_v27, %v1766_v40 }
 0xedd   :  { %v1971_v42 = vpop.f32.mrf.mxu0  ;;  %v2024_v43 = vpop.f32.mrf.mxu1 }
 0xede   :  { %v1972_v48 = vadd.f32 %v1971_v42, %v1762_v31  ;;  %v2025_v49 = vadd.f32 %v2024_v43, %v1770_v34  ;;  %v2041_v61 = vmax.f32 %v1970_v51, 0.0  ;;  %v2043_v62 = vmax.f32 %v2023_v36, 0.0 }
 0xedf   :  { %v1973_v45 = vpop.f32.mrf.mxu0  ;;  %v2026_v47 = vpop.f32.mrf.mxu1 }
 0xee0   :  { %v1974_v50 = vadd.f32 %v1973_v45, %v1758_v38  ;;  %v2027_v24 = vadd.f32 %v2026_v47, %v1766_v40  ;;  %v2042_v44 = vmax.f32 %v1972_v48, 0.0  ;;  %v2044_v59 = vmax.f32 %v2025_v49, 0.0 }
 0xee1   :  { %v1975_v52 = vpop.f32.mrf.mxu0  ;;  %v2028_v53 = vpop.f32.mrf.mxu1 }
 0xee2   :  { %v1976_v54 = vadd.f32 %v1975_v52, %v1762_v31  ;;  %v2029_v55 = vadd.f32 %v2028_v53, %v1770_v34  ;;  %v2045_v56 = vmax.f32 %v1974_v50, 0.0  ;;  %v2047_v57 = vmax.f32 %v2027_v24, 0.0 }
 0xee3   :  { %v1979_v58 = vpop.f32.mrf.mxu0  ;;  %v2032_v37 = vpop.f32.mrf.mxu1 }
 0xee4   :  { %v2046_v60 = vmax.f32 %v1976_v54, 0.0  ;;  %v2048_v20 = vmax.f32 %v2029_v55, 0.0  ;;  %v2057_v5 = vpack.c.bf16 %v2045_v56, %v2041_v61  ;;  %v2059_v28 = vpack.c.bf16 %v2047_v57, %v2043_v62 }
 0xee5   :  { %v1981_v63 = vpop.f32.mrf.mxu0  ;;  %v2034_v0 = vpop.f32.mrf.mxu1  ;;  %v1980_v12 = vadd.f32 %v1979_v58, %v1758_v38  ;;  %v2033_v30 = vadd.f32 %v2032_v37, %v1766_v40 }
 0xee6   :  { %v2058_v1 = vpack.c.bf16 %v2046_v60, %v2042_v44  ;;  %v2060_v3 = vpack.c.bf16 %v2048_v20, %v2044_v59  ;;  %v1982_v6 = vadd.f32 %v1981_v63, %v1762_v31  ;;  %v2035_v7 = vadd.f32 %v2034_v0, %v1770_v34 }
 0xee7   :  { %v1983_v29 = vpop.f32.mrf.mxu0  ;;  %v2036_v32 = vpop.f32.mrf.mxu1  ;;  %v2049_v43 = vmax.f32 %v1980_v12, 0.0  ;;  %v2051_v45 = vmax.f32 %v2033_v30, 0.0 }
 0xee8   :  { %v1984_v8 = vadd.f32 %v1983_v29, %v1758_v38  ;;  %v2037_v9 = vadd.f32 %v2036_v32, %v1766_v40  ;;  %2360 = vmatprep.mubr.bf16.mxu0 %v2058_v1  ;;  %2409 = vmatprep.mubr.bf16.mxu1 %v2060_v3  ;;  %v2050_v25 = vmax.f32 %v1982_v6, 0.0  ;;  %v2052_v26 = vmax.f32 %v2035_v7, 0.0  ;;  %v5012_v38 = vld [vmem:[#allocation11] ss:$0 sm:$0xff] }
 0xee9   :  { %v1985_v33 = vpop.f32.mrf.mxu0  ;;  %v2038_v17 = vpop.f32.mrf.mxu1  ;;  %2361 = vmatmul.mubr.bf16.vlgmr.msra.gmra.mxu0 %v2057_v5  ;;  %2410 = vmatmul.mubr.bf16.vlgmr.msra.gmra.mxu1 %v2059_v28 }
 0xeea   :  { %v1986_v4 = vadd.f32 %v1985_v33, %v1762_v31  ;;  %v2039_v11 = vadd.f32 %v2038_v17, %v1770_v34  ;;  %v2053_v16 = vmax.f32 %v1984_v8, 0.0  ;;  %v2055_v19 = vmax.f32 %v2037_v9, 0.0  ;;  %v5866_v17 = vld [vmem:[%s7288_s3 + $0x16c] ss:$12 sps:$4 sm:$0xff]  }
 0xeeb   :  { %2661 = vmatprep.subr.bf16.mxu0 %v5866_v17 }
 0xeec   :  { %v2054_v27 = vmax.f32 %v1986_v4, 0.0  ;;  %v2056_v42 = vmax.f32 %v2039_v11, 0.0  ;;  %v2061_v49 = vpack.c.bf16 %v2053_v16, %v2049_v43  ;;  %v2063_v50 = vpack.c.bf16 %v2055_v19, %v2051_v45 }
 0xeee   :  { %v2062_v47 = vpack.c.bf16 %v2054_v27, %v2050_v25  ;;  %v2064_v48 = vpack.c.bf16 %v2056_v42, %v2052_v26 }
 0xef0   :  { %2368 = vmatprep.mubr.bf16.mxu0 %v2062_v47  ;;  %2417 = vmatprep.mubr.bf16.mxu1 %v2064_v48 }
 0xef1   :  { %2369 = vmatmul.mubr.bf16.gmra.mxu0 %v2061_v49  ;;  %2418 = vmatmul.mubr.bf16.gmra.mxu1 %v2063_v50 }
 0xef2   :  { %2693 = vmatprep.mubr.bf16.mxu0 %v6329_v39 }
 0xfa9   :  { %v5274_v31 = vpop.f32.mrf.mxu0  ;;  %v5302_v34 = vpop.f32.mrf.mxu1 }
 0xfab   :  { %v5275_v40 = vpop.f32.mrf.mxu0  ;;  %v5303_v24 = vpop.f32.mrf.mxu1 }
 0xfac   :  { %v5276_v51 = vadd.f32 %v5275_v40, %v5274_v31  ;;  %v5304_v54 = vadd.f32 %v5303_v24, %v5302_v34  ;;  %v5869_v31 = vld [vmem:[%s7288_s3 + $0x154] ss:$12 sps:$4 sm:$0xff]   ;;  %v5867_v34 = vld [vmem:[%s7288_s3 + $0x150] ss:$12 sps:$4 sm:$0xff]   ;;  %v5870_v24 = vld [vmem:[%s7288_s3 + $0x138] ss:$12 sps:$4 sm:$0xff]  }
 0xfad   :  { %v5277_v36 = vpop.f32.mrf.mxu0  ;;  %v5305_v52 = vpop.f32.mrf.mxu1  ;;  %v5873_v40 = vld [vmem:[%s7288_s3 + $0x170] ss:$12 sps:$4 sm:$0xff]  }
 0xfae   :  { %v2363_v53 = vadd.f32 %v5276_v51, %v5012_v38  ;;  %5568 = vmatprep.subr.bf16.mxu1 %v5873_v40  ;;  %v5876_v51 = vld [vmem:[%s7288_s3 + $0x124] ss:$12 sps:$4 sm:$0xff]  }
 0xfaf   :  { %v5278_v55 = vpop.f32.mrf.mxu0  ;;  %v5306_v56 = vpop.f32.mrf.mxu1  ;;  %5569 = vmatpush3.bf16.msra.mxu1 %v5873_v40 }
 0xfb0   :  { %v2412_v57 = vadd.f32 %v5304_v54, %v2363_v53  ;;  %v5279_v58 = vadd.f32 %v5278_v55, %v5277_v36  ;;  %v5307_v60 = vadd.f32 %v5306_v56, %v5305_v52  ;;  %v5877_v36 = vld [vmem:[%s7288_s3 + $0x158] ss:$12 sps:$4 sm:$0xff]   ;;  %v5874_v52 = vld [vmem:[%s7288_s3 + $0x120] ss:$12 sps:$4 sm:$0xff]   ;;  %v5878_v55 = vld [vmem:[%s7288_s3 + $0x108] ss:$12 sps:$4 sm:$0xff]  }
 0xfb1   :  { %v5280_v37 = vpop.f32.mrf.mxu0  ;;  %v5308_v44 = vpop.f32.mrf.mxu1  ;;  %5570 = vmatprep.subr.bf16.mxu1 %v5877_v36  ;;  %v5880_v53 = vld [vmem:[%s7288_s3 + $0x10c] ss:$12 sps:$4 sm:$0xff]   ;;  %v5884_v56 = vld [vmem:[%s7288_s3 + $0xf4] ss:$12 sps:$4 sm:$0xff]  }
 0xfb2   :  { %v2366_v59 = vadd.f32 %v5279_v58, %v5012_v38  ;;  %v6852_v20 = vadd.f32 %v2412_v57, %v6782_v10  ;;  %v5881_v54 = vld [vmem:[%s7288_s3 + $0x140] ss:$12 sps:$4 sm:$0xff]   ;;  %v5885_v57 = vld [vmem:[%s7288_s3 + $0x128] ss:$12 sps:$4 sm:$0xff]   ;;  %v5882_v58 = vld [vmem:[%s7288_s3 + $0xf0] ss:$12 sps:$4 sm:$0xff]  }
 0xfb3   :  { %v5281_v61 = vpop.f32.mrf.mxu0  ;;  %v5309_v62 = vpop.f32.mrf.mxu1  ;;  %5571 = vmatpush3.bf16.msra.mxu1 %v5877_v36 }
 0xfb4   :  { %v2415_v63 = vadd.f32 %v5307_v60, %v2366_v59  ;;  %v5282_v0 = vadd.f32 %v5281_v61, %v5280_v37  ;;  %2434 = vadd.xlane.f32.xlu0 %v6852_v20  ;;  %v5310_v28 = vadd.f32 %v5309_v62, %v5308_v44  ;;  %5572 = vmatprep.subr.bf16.mxu1 %v5881_v54  ;;  %v5888_v37 = vld [vmem:[%s7288_s3 + $0xdc] ss:$12 sps:$4 sm:$0xff]   ;;  %v5886_v59 = vld [vmem:[%s7288_s3 + $0xd8] ss:$12 sps:$4 sm:$0xff]   ;;  %v5890_v62 = vld [vmem:[%s7288_s3 + $0xc0] ss:$12 sps:$4 sm:$0xff]  }
 0xfb5   :  { %v5283_v1 = vpop.f32.mrf.mxu0  ;;  %v5311_v3 = vpop.f32.mrf.mxu1  ;;  %v5889_v44 = vld [vmem:[%s7288_s3 + $0x110] ss:$12 sps:$4 sm:$0xff]   ;;  %v5893_v61 = vld [vmem:[%s7288_s3 + $0xf8] ss:$12 sps:$4 sm:$0xff]  }
 0xfb6   :  { %v2371_v5 = vadd.f32 %v5282_v0, %v5012_v38  ;;  %v6856_v6 = vadd.f32 %v2415_v63, %v6793_v13  ;;  %v5864_v13 = vld [vmem:[%s7288_s3 + $0x168] ss:$12 sps:$4 sm:$0xff]   ;;  %v5892_v60 = vld [vmem:[%s7288_s3 + $0xc4] ss:$12 sps:$4 sm:$0xff]   ;;  %v5894_v63 = vld [vmem:[%s7288_s3 + $0xe0] ss:$12 sps:$4 sm:$0xff]  }
 0xfb7   :  { %v5284_v29 = vpop.f32.mrf.mxu0  ;;  %v5312_v32 = vpop.f32.mrf.mxu1  ;;  %2662 = vmatpush1.bf16.msra.mxu0 %v5864_v13  ;;  %5573 = vmatpush3.bf16.msra.mxu1 %v5881_v54  ;;  %v5895_v0 = vld [vmem:[%s7288_s3 + $0xc8] ss:$12 sps:$4 sm:$0xff]  }
 0xfb8   :  { %v2420_v7 = vadd.f32 %v5310_v28, %v2371_v5  ;;  %v5285_v8 = vadd.f32 %v5284_v29, %v5283_v1  ;;  %2436 = vadd.xlane.f32.xlu1 %v6856_v6  ;;  %v5313_v9 = vadd.f32 %v5312_v32, %v5311_v3  ;;  %2663 = vmatprep.subr.bf16.mxu0 %v5869_v31 }
 0xfb9   :  { %5574 = vmatprep.subr.bf16.mxu1 %v5885_v57 }
 0xfba   :  { %v2374_v10 = vadd.f32 %v5285_v8, %v5012_v38  ;;  %v6860_v12 = vadd.f32 %v2420_v7, %v6788_v2  ;;  %v5872_v38 = vld [vmem:[%s7288_s3 + $0x13c] ss:$12 sps:$4 sm:$0xff]  }
 0xfbb   :  { %2664 = vmatpush1.bf16.msra.mxu0 %v5867_v34  ;;  %5575 = vmatpush3.bf16.msra.mxu1 %v5885_v57 }
 0xfbc   :  { %v2423_v30 = vadd.f32 %v5313_v9, %v2374_v10  ;;  %2438 = vadd.xlane.f32.xlu0 %v6860_v12  ;;  %2665 = vmatprep.subr.bf16.mxu0 %v5872_v38 }
 0xfbd   :  { %5576 = vmatprep.subr.bf16.mxu1 %v5889_v44 }
 0xfbe   :  { %v6864_v33 = vadd.f32 %v2423_v30, %v6800_v15 }
 0xfbf   :  { %2666 = vmatpush1.bf16.msra.mxu0 %v5870_v24  ;;  %5577 = vmatpush3.bf16.msra.mxu1 %v5889_v44 }
 0xfc0   :  { %2440 = vadd.xlane.f32.xlu1 %v6864_v33  ;;  %2667 = vmatprep.subr.bf16.mxu0 %v5876_v51 }
 0xfc1   :  { %5578 = vmatprep.subr.bf16.mxu1 %v5893_v61 }
 0xfc3   :  { %2668 = vmatpush1.bf16.msra.mxu0 %v5874_v52  ;;  %5579 = vmatpush3.bf16.msra.mxu1 %v5893_v61 }
 0xfc4   :  { %2669 = vmatprep.subr.bf16.mxu0 %v5880_v53  ;;  %5580 = vmatprep.subr.bf16.mxu1 %v5894_v63 }
 0xfc7   :  { %2670 = vmatpush1.bf16.msra.mxu0 %v5878_v55  ;;  %5581 = vmatpush3.bf16.msra.mxu1 %v5894_v63 }
 0xfc8   :  { %2671 = vmatprep.subr.bf16.mxu0 %v5884_v56  ;;  %5582 = vmatprep.subr.bf16.mxu1 %v5895_v0 }
 0xfcb   :  { %2672 = vmatpush1.bf16.msra.mxu0 %v5882_v58  ;;  %5583 = vmatpush3.bf16.msra.mxu1 %v5895_v0 }
 0xfcc   :  { %2673 = vmatprep.subr.bf16.mxu0 %v5888_v37  ;;  %5606 = vmatprep.subr.bf16.mxu1 %v6330_v14 }
 0xfcf   :  { %2674 = vmatpush1.bf16.msra.mxu0 %v5886_v59 }
 0xfd0   :  { %2675 = vmatprep.subr.bf16.mxu0 %v5892_v60 }
 0xfd3   :  { %2676 = vmatpush1.bf16.msra.mxu0 %v5890_v62 }
 0xfd4   :  { %5588 = vmatprep.subr.bf16.mxu0 %v6330_v14 }
0x103d   :  { %v2435_v2 = vpop.xlane.xlu0 %2434 }
0x103e   :  { %v2442_v4 = vmul.f32 0.0078125, %v2435_v2 }
0x1040   :  { %v6874_v11 = vsub.f32 %v6852_v20, %v2442_v4  ;;  %v5047_v4 = vld [vmem:[%s7286_s1 + $0x1] ss:$0 sm:$0xff] }
0x1041   :  { %v2437_v16 = vpop.xlane.xlu1 %2436 }
0x1042   :  { %v2443_v15 = vmul.f32 0.0078125, %v2437_v16  ;;  %v2450_v19 = vmul.f32 %v6874_v11, %v6874_v11 }
0x1044   :  { %v6879_v25 = vsub.f32 %v6856_v6, %v2443_v15  ;;  %2454 = vadd.xlane.f32.xlu0 %v2450_v19 }
0x1045   :  { %v2439_v26 = vpop.xlane.xlu0 %2438 }
0x1046   :  { %v2444_v27 = vmul.f32 0.0078125, %v2439_v26  ;;  %v2451_v42 = vmul.f32 %v6879_v25, %v6879_v25  ;;  %v5048_v26 = vld [vmem:[%s7287_s2 + $0x1] ss:$0 sm:$0xff] }
0x1048   :  { %v6884_v43 = vsub.f32 %v6860_v12, %v2444_v27  ;;  %2456 = vadd.xlane.f32.xlu1 %v2451_v42 }
0x1049   :  { %v2441_v45 = vpop.xlane.xlu1 %2440 }
0x104a   :  { %v2445_v47 = vmul.f32 0.0078125, %v2441_v45  ;;  %v2452_v48 = vmul.f32 %v6884_v43, %v6884_v43 }
0x104c   :  { %v6889_v49 = vsub.f32 %v6864_v33, %v2445_v47  ;;  %2458 = vadd.xlane.f32.xlu0 %v2452_v48 }
0x104e   :  { %v2453_v50 = vmul.f32 %v6889_v49, %v6889_v49 }
0x1050   :  { %2460 = vadd.xlane.f32.xlu1 %v2453_v50 }
0x10cd   :  { %v2455_v1 = vpop.xlane.xlu0 %2454 }
0x10ce   :  { %v2462_v3 = vmul.f32 0.0078125, %v2455_v1 }
0x10d0   :  { %v2466_v5 = vadd.f32 1e-05, %v2462_v3 }
0x10d1   :  { %v2457_v28 = vpop.xlane.xlu1 %2456 }
0x10d2   :  { %6072 = vrsqrt.f32 %v2466_v5  ;;  %v2463_v29 = vmul.f32 0.0078125, %v2457_v28 }
0x10d4   :  { %v2467_v32 = vadd.f32 1e-05, %v2463_v29 }
0x10d5   :  { %v2459_v7 = vpop.xlane.xlu0 %2458 }
0x10d6   :  { %6074 = vrsqrt.f32 %v2467_v32  ;;  %v2464_v8 = vmul.f32 0.0078125, %v2459_v7 }
0x10d8   :  { %v2468_v10 = vadd.f32 1e-05, %v2464_v8 }
0x10d9   :  { %v2461_v9 = vpop.xlane.xlu1 %2460 }
0x10da   :  { %6076 = vrsqrt.f32 %v2468_v10  ;;  %v2465_v30 = vmul.f32 0.0078125, %v2461_v9 }
0x10dc   :  { %v2469_v13 = vadd.f32 1e-05, %v2465_v30 }
0x10de   :  { %6078 = vrsqrt.f32 %v2469_v13 }
0x10df   :  { %v6073_v17 = vpop.eup %6072 }
0x10e0   :  { %v2474_v2 = vmul.f32 %v6073_v17, %v6874_v11 }
0x10e2   :  { %v2484_v19 = vmul.f32 %v5047_v4, %v2474_v2 }
0x10e3   :  { %v6075_v16 = vpop.eup %6074 }
0x10e4   :  { %v2475_v15 = vmul.f32 %v6075_v16, %v6879_v25  ;;  %v2494_v45 = vadd.f32 %v5048_v26, %v2484_v19 }
0x10e6   :  { %v2485_v27 = vmul.f32 %v5047_v4, %v2475_v15 }
0x10e7   :  { %v6077_v42 = vpop.eup %6076 }
0x10e8   :  { %v2495_v47 = vadd.f32 %v5048_v26, %v2485_v27  ;;  %v2476_v48 = vmul.f32 %v6077_v42, %v6884_v43 }
0x10ea   :  { %v2498_v50 = vpack.c.bf16 %v2495_v47, %v2494_v45  ;;  %v2486_v34 = vmul.f32 %v5047_v4, %v2476_v48 }
0x10eb   :  { %v6079_v11 = vpop.eup %6078 }
0x10ec   :  { %2694 = vmatmul.mubr.bf16.vlgmr.msra.gmra.mxu0 %v2498_v50  ;;  %5584 = vmatprep.mubr.bf16.mxu1 %v2498_v50  ;;  %v2477_v31 = vmul.f32 %v6079_v11, %v6889_v49  ;;  %v2496_v38 = vadd.f32 %v5048_v26, %v2486_v34 }
0x10ed   :  { %2703 = vmatprep.mubr.bf16.mxu0 %v6329_v39 }
0x10ee   :  { %v2487_v25 = vmul.f32 %v5047_v4, %v2477_v31 }
0x10f0   :  { %v2497_v40 = vadd.f32 %v5048_v26, %v2487_v25 }
0x10f2   :  { %v2499_v24 = vpack.c.bf16 %v2497_v40, %v2496_v38 }
0x10f4   :  { %2704 = vmatmul.mubr.bf16.gmra.mxu0 %v2499_v24  ;;  %5585 = vmatmul.mubr.bf16.vlgmr.msra.gmra.mxu1 %v2499_v24 }
0x10f5   :  { %5590 = vmatprep.mubr.msk.bf16.mxu0 %vm6331_vm0, %v6330_v14  ;;  %5608 = vmatprep.mubr.msk.bf16.mxu1 %vm6331_vm0, %v6330_v14 }
0x11ac   :  { %v2695_v43 = vpop.f32.mrf.mxu0 }
0x11ae   :  { %v2697_v51 = vpop.f32.mrf.mxu0 }
0x11b0   :  { %v2699_v36 = vpop.f32.mrf.mxu0 }
0x11b1   :  { %v6983_v60 = vpack.c.bf16 %v2699_v36, %v2695_v43 }
0x11b2   :  { %v2701_v52 = vpop.f32.mrf.mxu0 }
0x11b3   :  { %v6976_v49 = vpack.c.bf16 %v2701_v52, %v2697_v51 }
0x11b4   :  { %v2705_v53 = vpop.f32.mrf.mxu0  ;;  %v5586_v54 = vpop.f32.mrf.mxu1 }
0x11b5   :  { %v2773_v55 = vsel %vm476_vm1, %v6976_v49, 0 }
0x11b6   :  { %v2707_v56 = vpop.f32.mrf.mxu0  ;;  %v2748_v57 = vpop.f32.mrf.mxu1  ;;  %5589 = vmatpush3.bf16.xpose.msra.mxu0 %v2773_v55 }
0x11b7   :  { %5594 = vmatprep.subr.bf16.mxu0 %v6330_v14 }
0x11b8   :  { %v2709_v58 = vpop.f32.mrf.mxu0  ;;  %v5587_v37 = vpop.f32.mrf.mxu1 }
0x11b9   :  { %v6981_v44 = vpack.c.bf16 %v5587_v37, %v5586_v54  ;;  %v6996_v0 = vpack.c.bf16 %v2709_v58, %v2705_v53 }
0x11ba   :  { %v2711_v59 = vpop.f32.mrf.mxu0  ;;  %v2751_v63 = vpop.f32.mrf.mxu1 }
0x11bb   :  { %v6985_v61 = vpack.c.bf16 %v2711_v59, %v2707_v56  ;;  %5607 = vmatpush3.bf16.msra.mxu1 %v6981_v44  ;;  %v6998_v1 = vpack.c.bf16 %v2751_v63, %v2748_v57 }
0x11bc   :  { %5618 = vmatprep.subr.bf16.mxu1 %v6330_v14 }
0x11bd   :  { %5591 = vmatmul.mubr.msk.bf16.vlgmr.msra.gmra.mxu0 %vm476_vm1, %v6983_v60  ;;  %v2820_v62 = vsel %vm476_vm1, %v6985_v61, 0 }
0x11be   :  { %5595 = vmatpush3.bf16.xpose.msra.mxu0 %v2820_v62  ;;  %5596 = vmatprep.mubr.msk.bf16.mxu0 %vm6331_vm0, %v6330_v14 }
0x11bf   :  { %5600 = vmatprep.subr.bf16.mxu0 %v6330_v14 }
0x11c5   :  { %5597 = vmatmul.mubr.msk.bf16.vlgmr.msra.gmra.mxu0 %vm476_vm1, %v6996_v0 }
0x11c6   :  { %5601 = vmatpush3.bf16.msra.mxu0 %v6998_v1  ;;  %5602 = vmatprep.mubr.msk.bf16.mxu0 %vm6331_vm0, %v6330_v14 }
0x11c7   :  { %5612 = vmatprep.subr.bf16.mxu0 %v6330_v14 }
0x127d   :  { %v2809_v3 = vpop.f32.mrf.mxu0 }
0x127e   :  { %v2863_v5 = vmul.f32 0.17677669, %v2809_v3 }
0x127f   :  { %v5592_v28 = vpop.f32.mrf.mxu0 }
0x1280   :  { %v2867_v29 = vadd.f32 %v2863_v5, %v6589_v41 }
0x1281   :  { %v2812_v32 = vpop.f32.mrf.mxu0 }
0x1282   :  { %v2864_v7 = vmul.f32 0.17677669, %v2812_v32  ;;  %v2871_v8 = vsel %vm579_vm4, %v2867_v29, -inf }
0x1283   :  { %2872 = vmax.xlane.f32.xlu0 %v2871_v8  ;;  %v5593_v10 = vpop.f32.mrf.mxu0 }
0x1284   :  { %v2868_v9 = vadd.f32 %v2864_v7, %v6592_v46 }
0x1285   :  { %v2856_v30 = vpop.f32.mrf.mxu0 }
0x1286   :  { %v2865_v13 = vmul.f32 0.17677669, %v2856_v30  ;;  %v2874_v17 = vsel %vm579_vm4, %v2868_v9, -inf }
0x1287   :  { %2875 = vmax.xlane.f32.xlu1 %v2874_v17  ;;  %v5598_v2 = vpop.f32.mrf.mxu0 }
0x1288   :  { %v2869_v4 = vadd.f32 %v2865_v13, %v6589_v41 }
0x1289   :  { %v2859_v16 = vpop.f32.mrf.mxu0 }
0x128a   :  { %v2866_v15 = vmul.f32 0.17677669, %v2859_v16  ;;  %v2877_v19 = vsel %vm579_vm4, %v2869_v4, -inf }
0x128b   :  { %2878 = vmax.xlane.f32.xlu0 %v2877_v19  ;;  %v5599_v26 = vpop.f32.mrf.mxu0 }
0x128c   :  { %v2870_v27 = vadd.f32 %v2866_v15, %v6592_v46 }
0x128e   :  { %v2880_v42 = vsel %vm579_vm4, %v2870_v27, -inf }
0x128f   :  { %2881 = vmax.xlane.f32.xlu1 %v2880_v42 }
0x130c   :  { %v2873_v45 = vpop.xlane.xlu0 %2872 }
0x130d   :  { %v2883_v47 = vsub.f32 %v2867_v29, %v2873_v45 }
0x130f   :  { %v2887_v48 = vmul.f32 1.442695, %v2883_v47 }
0x1310   :  { %v2876_v50 = vpop.xlane.xlu1 %2875 }
0x1311   :  { %6080 = vpow2.f32 %v2887_v48  ;;  %v2884_v11 = vsub.f32 %v2868_v9, %v2876_v50 }
0x1313   :  { %v2889_v31 = vmul.f32 1.442695, %v2884_v11 }
0x1314   :  { %v2879_v34 = vpop.xlane.xlu0 %2878 }
0x1315   :  { %6082 = vpow2.f32 %v2889_v31  ;;  %v2885_v25 = vsub.f32 %v2869_v4, %v2879_v34 }
0x1317   :  { %v2891_v38 = vmul.f32 1.442695, %v2885_v25 }
0x1318   :  { %v2882_v53 = vpop.xlane.xlu1 %2881 }
0x1319   :  { %6084 = vpow2.f32 %v2891_v38  ;;  %v2886_v54 = vsub.f32 %v2870_v27, %v2882_v53 }
0x131b   :  { %v2893_v55 = vmul.f32 1.442695, %v2886_v54 }
0x131d   :  { %6086 = vpow2.f32 %v2893_v55 }
0x131e   :  { %v6081_v40 = vpop.eup %6080 }
0x131f   :  { %v2895_v24 = vsel %vm579_vm4, %v6081_v40, 0.0 }
0x1320   :  { %2896 = vadd.xlane.f32.xlu0 %v2895_v24 }
0x1322   :  { %v6083_v43 = vpop.eup %6082 }
0x1323   :  { %v2898_v51 = vsel %vm579_vm4, %v6083_v43, 0.0 }
0x1324   :  { %2899 = vadd.xlane.f32.xlu1 %v2898_v51 }
0x1326   :  { %v6085_v36 = vpop.eup %6084 }
0x1327   :  { %v2901_v52 = vsel %vm579_vm4, %v6085_v36, 0.0 }
0x1328   :  { %2902 = vadd.xlane.f32.xlu0 %v2901_v52 }
0x132a   :  { %v6087_v56 = vpop.eup %6086 }
0x132b   :  { %v2904_v57 = vsel %vm579_vm4, %v6087_v56, 0.0 }
0x1335   :  { %3066 = vrot.lane.b32.xlu1 %v6985_v61, %s6333_s21 }
0x133e   :  { %3013 = vrot.lane.b32.xlu0 %v6976_v49, %s6333_s21 }
0x1359   :  { %2905 = vadd.xlane.f32.xlu1 %v2904_v57 }
0x136a   :  { %3010 = vrot.lane.b32.xlu1 %v6983_v60, %s6333_s21 }
0x136e   :  { %3063 = vrot.lane.b32.xlu1 %v6996_v0, %s6333_s21 }
0x13a9   :  { %v2897_v58 = vpop.xlane.xlu0 %2896 }
0x13aa   :  { %6088 = vrcp.f32 %v2897_v58 }
0x13ad   :  { %v2900_v37 = vpop.xlane.xlu1 %2899 }
0x13ae   :  { %6090 = vrcp.f32 %v2900_v37 }
0x13b1   :  { %v2903_v59 = vpop.xlane.xlu0 %2902  ;;  %v3067_v7 = vpop.permute.xlu1 %3066 }
0x13b2   :  { %6092 = vrcp.f32 %v2903_v59  ;;  %v3072_v4 = vsel %vm476_vm1, %v3067_v7, 0 }
0x13b5   :  { %v3014_v28 = vpop.permute.xlu0 %3013 }
0x13b6   :  { %v3019_v32 = vsel %vm476_vm1, %v3014_v28, 0 }
0x13b7   :  { %v6089_v62 = vpop.eup %6088 }
0x13b8   :  { %v2908_v3 = vmul.f32 %v6089_v62, %v6081_v40 }
0x13bb   :  { %v6091_v63 = vpop.eup %6090 }
0x13bc   :  { %v2910_v5 = vmul.f32 %v6091_v63, %v6083_v43 }
0x13be   :  { %v2915_v29 = vpack.c.bf16 %v2910_v5, %v2908_v3 }
0x13bf   :  { %v6093_v9 = vpop.eup %6092 }
0x13c0   :  { %5603 = vmatmul.mubr.msk.bf16.vlgmr.msra.gmra.mxu0 %vm579_vm4, %v2915_v29  ;;  %v2912_v13 = vmul.f32 %v6093_v9, %v6085_v36 }
0x13c1   :  { %5613 = vmatpush3.bf16.xpose.msra.mxu0 %v3019_v32  ;;  %5614 = vmatprep.mubr.msk.bf16.mxu0 %vm6331_vm0, %v6330_v14 }
0x13c2   :  { %5624 = vmatprep.subr.bf16.mxu0 %v6330_v14 }
0x13e2   :  { %v2906_v8 = vpop.xlane.xlu1 %2905 }
0x13e3   :  { %6094 = vrcp.f32 %v2906_v8 }
0x13e6   :  { %v3011_v10 = vpop.permute.xlu1 %3010 }
0x13e7   :  { %5615 = vmatmul.mubr.msk.bf16.vlgmr.msra.gmra.mxu0 %vm476_vm1, %v3011_v10 }
0x13e8   :  { %5626 = vmatprep.mubr.msk.bf16.mxu0 %vm6331_vm0, %v6330_v14 }
0x13ea   :  { %v3064_v16 = vpop.permute.xlu1 %3063 }
0x13f0   :  { %v6095_v30 = vpop.eup %6094 }
0x13f1   :  { %v2914_v17 = vmul.f32 %v6095_v30, %v6087_v56 }
0x13f3   :  { %v2916_v2 = vpack.c.bf16 %v2914_v17, %v2912_v13 }
0x13f5   :  { %5609 = vmatmul.mubr.msk.bf16.vlgmr.msra.gmra.mxu1 %vm579_vm4, %v2916_v2 }
0x13f6   :  { %5619 = vmatpush3.bf16.xpose.msra.mxu1 %v3072_v4  ;;  %5620 = vmatprep.mubr.msk.bf16.mxu1 %vm6331_vm0, %v6330_v14 }
0x13f7   :  { %5630 = vmatprep.subr.bf16.mxu1 %v6330_v14 }
0x13fd   :  { %5621 = vmatmul.mubr.msk.bf16.vlgmr.msra.gmra.mxu1 %vm476_vm1, %v3064_v16 }
0x13fe   :  { %5632 = vmatprep.mubr.msk.bf16.mxu1 %vm6331_vm0, %v6330_v14 }
0x1480   :  { %v2954_v15 = vpop.f32.mrf.mxu0 }
0x1481   :  { %3005 = vst.msk [vmem:[#allocation2] sm:$0xff] %vm476_vm1, %v2954_v15 }
0x1482   :  { %v5604_v19 = vpop.f32.mrf.mxu0 }
0x1484   :  { %v2957_v26 = vpop.f32.mrf.mxu0 }
0x1485   :  { %3006 = vst.msk [vmem:[#allocation2 + $0x8] sm:$0xff] %vm476_vm1, %v2957_v26 }
0x1486   :  { %v5605_v27 = vpop.f32.mrf.mxu0 }
0x14a7   :  { %v3055_v42 = vpop.f32.mrf.mxu0 }
0x14a8   :  { %v3115_v45 = vmul.f32 0.17677669, %v3055_v42 }
0x14a9   :  { %v5616_v47 = vpop.f32.mrf.mxu0 }
0x14aa   :  { %v3119_v48 = vadd.f32 %v3115_v45, %v6589_v41 }
0x14ab   :  { %v3058_v50 = vpop.f32.mrf.mxu0 }
0x14ac   :  { %v3116_v11 = vmul.f32 0.17677669, %v3058_v50  ;;  %v3123_v31 = vsel %vm579_vm4, %v3119_v48, -inf }
0x14ad   :  { %3124 = vmax.xlane.f32.xlu0 %v3123_v31  ;;  %v5617_v34 = vpop.f32.mrf.mxu0 }
0x14ae   :  { %v3120_v25 = vadd.f32 %v3116_v11, %v6592_v46 }
0x14b0   :  { %v3126_v38 = vsel %vm579_vm4, %v3120_v25, -inf }
0x14b1   :  { %3127 = vmax.xlane.f32.xlu1 %v3126_v38 }
0x14b5   :  { %v2998_v40 = vpop.f32.mrf.mxu1 }
0x14b6   :  { %3007 = vst.msk [vmem:[#allocation2 + $0x10] sm:$0xff] %vm476_vm1, %v2998_v40 }
0x14b7   :  { %v5610_v24 = vpop.f32.mrf.mxu1 }
0x14b9   :  { %v3001_v43 = vpop.f32.mrf.mxu1 }
0x14ba   :  { %3008 = vst.msk [vmem:[#allocation2 + $0x18] sm:$0xff] %vm476_vm1, %v3001_v43 }
0x14bb   :  { %v5611_v51 = vpop.f32.mrf.mxu1 }
0x14bd   :  { %v3108_v36 = vpop.f32.mrf.mxu1 }
0x14be   :  { %v3117_v52 = vmul.f32 0.17677669, %v3108_v36 }
0x14bf   :  { %v5622_v53 = vpop.f32.mrf.mxu1 }
0x14c0   :  { %v3121_v54 = vadd.f32 %v3117_v52, %v6589_v41 }
0x14c1   :  { %v3111_v55 = vpop.f32.mrf.mxu1 }
0x14c2   :  { %v3118_v56 = vmul.f32 0.17677669, %v3111_v55  ;;  %v3129_v57 = vsel %vm579_vm4, %v3121_v54, -inf }
0x14c3   :  { %v5623_v58 = vpop.f32.mrf.mxu1  ;;  %3130 = vmax.xlane.f32.xlu0 %v3129_v57 }
0x14c4   :  { %v3122_v37 = vadd.f32 %v3118_v56, %v6592_v46 }
0x14c6   :  { %v3132_v59 = vsel %vm579_vm4, %v3122_v37, -inf }
0x14c7   :  { %3133 = vmax.xlane.f32.xlu0 %v3132_v59 }
0x1536   :  { %v3125_v62 = vpop.xlane.xlu0 %3124 }
0x1537   :  { %v3135_v63 = vsub.f32 %v3119_v48, %v3125_v62 }
0x1539   :  { %v3139_v3 = vmul.f32 1.442695, %v3135_v63 }
0x153a   :  { %v3128_v5 = vpop.xlane.xlu1 %3127 }
0x153b   :  { %6096 = vpow2.f32 %v3139_v3  ;;  %v3136_v28 = vsub.f32 %v3120_v25, %v3128_v5 }
0x153d   :  { %v3141_v29 = vmul.f32 1.442695, %v3136_v28 }
0x153f   :  { %6098 = vpow2.f32 %v3141_v29 }
0x1548   :  { %v6097_v32 = vpop.eup %6096 }
0x1549   :  { %v3147_v7 = vsel %vm579_vm4, %v6097_v32, 0.0 }
0x154a   :  { %3148 = vadd.xlane.f32.xlu0 %v3147_v7 }
0x154c   :  { %v6099_v8 = vpop.eup %6098  ;;  %v3131_v10 = vpop.xlane.xlu0 %3130 }
0x154d   :  { %v3137_v9 = vsub.f32 %v3121_v54, %v3131_v10  ;;  %v3150_v30 = vsel %vm579_vm4, %v6099_v8, 0.0 }
0x154e   :  { %3151 = vadd.xlane.f32.xlu1 %v3150_v30 }
0x154f   :  { %v3143_v13 = vmul.f32 1.442695, %v3137_v9 }
0x1550   :  { %v3134_v4 = vpop.xlane.xlu0 %3133 }
0x1551   :  { %6100 = vpow2.f32 %v3143_v13  ;;  %v3138_v16 = vsub.f32 %v3122_v37, %v3134_v4 }
0x1553   :  { %v3145_v15 = vmul.f32 1.442695, %v3138_v16 }
0x1555   :  { %6102 = vpow2.f32 %v3145_v15 }
0x155e   :  { %v6101_v17 = vpop.eup %6100 }
0x155f   :  { %3218 = vrot.lane.b32.xlu1 %v6981_v44, %s6333_s21  ;;  %v3153_v2 = vsel %vm579_vm4, %v6101_v17, 0.0 }
0x1560   :  { %3154 = vadd.xlane.f32.xlu0 %v3153_v2 }
0x1562   :  { %v6103_v19 = vpop.eup %6102 }
0x1563   :  { %3287 = vrot.lane.b32.xlu1 %v6976_v49, %s6323_s20  ;;  %v3156_v26 = vsel %vm579_vm4, %v6103_v19, 0.0 }
0x1576   :  { %3170 = vrot.lane.b32.xlu0 %v6998_v1, %s6333_s21 }
0x157a   :  { %3285 = vrot.lane.b32.xlu0 %v6983_v60, %s6323_s20 }
0x1587   :  { %3157 = vadd.xlane.f32.xlu1 %v3156_v26 }
0x1598   :  { %3338 = vrot.lane.b32.xlu1 %v6985_v61, %s6323_s20 }
0x159c   :  { %3336 = vrot.lane.b32.xlu1 %v6996_v0, %s6323_s20 }
0x15d3   :  { %v3149_v42 = vpop.xlane.xlu0 %3148 }
0x15d7   :  { %v3152_v27 = vpop.xlane.xlu1 %3151 }
0x15d8   :  { %6104 = vrcp.f32 %v3152_v27 }
0x15d9   :  { %6106 = vrcp.f32 %v3149_v42 }
0x15db   :  { %v3219_v45 = vpop.permute.xlu1 %3218 }
0x15dc   :  { %5631 = vmatpush3.bf16.msra.mxu1 %v3219_v45 }
0x15dd   :  { %5642 = vmatprep.subr.bf16.mxu1 %v6330_v14 }
0x15df   :  { %v3288_v25 = vpop.permute.xlu1 %3287 }
0x15e0   :  { %v3293_v40 = vsel %vm476_vm1, %v3288_v25, 0 }
0x15e5   :  { %v6105_v47 = vpop.eup %6104 }
0x15e6   :  { %v6107_v50 = vpop.eup %6106  ;;  %v3162_v11 = vmul.f32 %v6105_v47, %v6099_v8 }
0x15e7   :  { %v3160_v34 = vmul.f32 %v6107_v50, %v6097_v32 }
0x15e9   :  { %v3155_v48 = vpop.xlane.xlu0 %3154  ;;  %v3167_v38 = vpack.c.bf16 %v3162_v11, %v3160_v34 }
0x15ea   :  { %6108 = vrcp.f32 %v3155_v48 }
0x15ed   :  { %v3171_v31 = vpop.permute.xlu0 %3170 }
0x15ee   :  { %5625 = vmatpush3.bf16.msra.mxu0 %v3171_v31 }
0x15ef   :  { %5636 = vmatprep.subr.bf16.mxu0 %v6330_v14 }
0x15f1   :  { %5627 = vmatmul.mubr.msk.bf16.vlgmr.msra.gmra.mxu0 %vm579_vm4, %v3167_v38  ;;  %v3286_v24 = vpop.permute.xlu0 %3285 }
0x15f2   :  { %5637 = vmatpush3.bf16.xpose.msra.mxu0 %v3293_v40  ;;  %5638 = vmatprep.mubr.msk.bf16.mxu0 %vm6331_vm0, %v6330_v14 }
0x15f3   :  { %5648 = vmatprep.subr.bf16.mxu0 %v6330_v14 }
0x15f7   :  { %v6109_v51 = vpop.eup %6108 }
0x15f8   :  { %v3164_v52 = vmul.f32 %v6109_v51, %v6101_v17 }
0x15f9   :  { %5639 = vmatmul.mubr.msk.bf16.vlgmr.msra.gmra.mxu0 %vm476_vm1, %v3286_v24 }
0x15fa   :  { %5650 = vmatprep.mubr.msk.bf16.mxu0 %vm6331_vm0, %v6330_v14 }
0x1610   :  { %v3158_v43 = vpop.xlane.xlu1 %3157 }
0x1611   :  { %6110 = vrcp.f32 %v3158_v43 }
0x1614   :  { %v3339_v54 = vpop.permute.xlu1 %3338 }
0x1615   :  { %v3344_v56 = vsel %vm476_vm1, %v3339_v54, 0 }
0x1618   :  { %v3337_v57 = vpop.permute.xlu1 %3336 }
0x161e   :  { %v6111_v36 = vpop.eup %6110 }
0x161f   :  { %v3166_v53 = vmul.f32 %v6111_v36, %v6103_v19 }
0x1621   :  { %v3168_v55 = vpack.c.bf16 %v3166_v53, %v3164_v52 }
0x1623   :  { %5633 = vmatmul.mubr.msk.bf16.vlgmr.msra.gmra.mxu1 %vm579_vm4, %v3168_v55 }
0x1624   :  { %5643 = vmatpush3.bf16.xpose.msra.mxu1 %v3344_v56  ;;  %5644 = vmatprep.mubr.msk.bf16.mxu1 %vm6331_vm0, %v6330_v14 }
0x1625   :  { %5654 = vmatprep.subr.bf16.mxu1 %v6330_v14 }
0x162b   :  { %5645 = vmatmul.mubr.msk.bf16.vlgmr.msra.gmra.mxu1 %vm476_vm1, %v3337_v57 }
0x162c   :  { %5656 = vmatprep.mubr.msk.bf16.mxu1 %vm6331_vm0, %v6330_v14 }
0x16b1   :  { %v7088_v58 = vpop.f32.mrf.mxu0 }
0x16b3   :  { %v5628_v37 = vpop.f32.mrf.mxu0 }
0x16b5   :  { %v7090_v59 = vpop.f32.mrf.mxu0 }
0x16b7   :  { %v5629_v62 = vpop.f32.mrf.mxu0 }
0x16b9   :  { %v3329_v63 = vpop.f32.mrf.mxu0 }
0x16ba   :  { %v3387_v3 = vmul.f32 0.17677669, %v3329_v63 }
0x16bb   :  { %v5640_v5 = vpop.f32.mrf.mxu0 }
0x16bc   :  { %v3391_v28 = vadd.f32 %v3387_v3, %v6589_v41 }
0x16bd   :  { %v3332_v29 = vpop.f32.mrf.mxu0 }
0x16be   :  { %v3388_v32 = vmul.f32 0.17677669, %v3332_v29  ;;  %v3395_v7 = vsel %vm579_vm4, %v3391_v28, -inf }
0x16bf   :  { %3396 = vmax.xlane.f32.xlu0 %v3395_v7  ;;  %v5641_v8 = vpop.f32.mrf.mxu0 }
0x16c0   :  { %v3392_v10 = vadd.f32 %v3388_v32, %v6592_v46 }
0x16c2   :  { %v3398_v9 = vsel %vm579_vm4, %v3392_v10, -inf }
0x16c3   :  { %3399 = vmax.xlane.f32.xlu1 %v3398_v9 }
0x16e3   :  { %v7096_v30 = vpop.f32.mrf.mxu1 }
0x16e5   :  { %v5634_v13 = vpop.f32.mrf.mxu1 }
0x16e7   :  { %v7098_v17 = vpop.f32.mrf.mxu1 }
0x16e9   :  { %v5635_v2 = vpop.f32.mrf.mxu1 }
0x16eb   :  { %v3380_v4 = vpop.f32.mrf.mxu1 }
0x16ec   :  { %v3389_v16 = vmul.f32 0.17677669, %v3380_v4 }
0x16ed   :  { %v5646_v15 = vpop.f32.mrf.mxu1 }
0x16ee   :  { %v3393_v19 = vadd.f32 %v3389_v16, %v6589_v41 }
0x16ef   :  { %v3383_v26 = vpop.f32.mrf.mxu1 }
0x16f0   :  { %v3390_v27 = vmul.f32 0.17677669, %v3383_v26  ;;  %v3401_v42 = vsel %vm579_vm4, %v3393_v19, -inf }
0x16f1   :  { %v5647_v45 = vpop.f32.mrf.mxu1  ;;  %3402 = vmax.xlane.f32.xlu0 %v3401_v42 }
0x16f2   :  { %v3394_v47 = vadd.f32 %v3390_v27, %v6592_v46 }
0x16f4   :  { %v3404_v48 = vsel %vm579_vm4, %v3394_v47, -inf }
0x16f5   :  { %3405 = vmax.xlane.f32.xlu0 %v3404_v48 }
0x1748   :  { %v3397_v50 = vpop.xlane.xlu0 %3396 }
0x1749   :  { %v3407_v11 = vsub.f32 %v3391_v28, %v3397_v50 }
0x174b   :  { %v3411_v31 = vmul.f32 1.442695, %v3407_v11 }
0x174c   :  { %v3400_v34 = vpop.xlane.xlu1 %3399 }
0x174d   :  { %6112 = vpow2.f32 %v3411_v31  ;;  %v3408_v25 = vsub.f32 %v3392_v10, %v3400_v34 }
0x174f   :  { %v3413_v38 = vmul.f32 1.442695, %v3408_v25 }
0x1751   :  { %6114 = vpow2.f32 %v3413_v38 }
0x175a   :  { %v6113_v40 = vpop.eup %6112 }
0x175b   :  { %v3419_v24 = vsel %vm579_vm4, %v6113_v40, 0.0 }
0x175c   :  { %3420 = vadd.xlane.f32.xlu0 %v3419_v24 }
0x175e   :  { %v6115_v43 = vpop.eup %6114 }
0x175f   :  { %v3422_v51 = vsel %vm579_vm4, %v6115_v43, 0.0 }
0x1760   :  { %3423 = vadd.xlane.f32.xlu1 %v3422_v51 }
0x1771   :  { %3488 = vrot.lane.b32.xlu1 %v6981_v44, %s6323_s20 }
0x1775   :  { %3557 = vrot.lane.b32.xlu1 %v6976_v49, %s6334_s22 }
0x177a   :  { %v3403_v36 = vpop.xlane.xlu0 %3402 }
0x177b   :  { %v3409_v52 = vsub.f32 %v3393_v19, %v3403_v36 }
0x177d   :  { %v3415_v53 = vmul.f32 1.442695, %v3409_v52 }
0x177e   :  { %v3406_v54 = vpop.xlane.xlu0 %3405 }
0x177f   :  { %6116 = vpow2.f32 %v3415_v53  ;;  %v3410_v55 = vsub.f32 %v3394_v47, %v3406_v54 }
0x1781   :  { %v3417_v56 = vmul.f32 1.442695, %v3410_v55 }
0x1783   :  { %6118 = vpow2.f32 %v3417_v56 }
0x178c   :  { %v6117_v57 = vpop.eup %6116 }
0x178d   :  { %v3425_v37 = vsel %vm579_vm4, %v6117_v57, 0.0 }
0x178e   :  { %3426 = vadd.xlane.f32.xlu0 %v3425_v37 }
0x1790   :  { %v6119_v62 = vpop.eup %6118 }
0x1791   :  { %v3428_v63 = vsel %vm579_vm4, %v6119_v62, 0.0 }
0x1799   :  { %3429 = vadd.xlane.f32.xlu1 %v3428_v63 }
0x17a4   :  { %3441 = vrot.lane.b32.xlu0 %v6998_v1, %s6323_s20 }
0x17a8   :  { %3555 = vrot.lane.b32.xlu0 %v6983_v60, %s6334_s22 }
0x17aa   :  { %3608 = vrot.lane.b32.xlu1 %v6985_v61, %s6334_s22 }
0x17ae   :  { %3606 = vrot.lane.b32.xlu1 %v6996_v0, %s6334_s22 }
0x17e5   :  { %v3421_v5 = vpop.xlane.xlu0 %3420 }
0x17e9   :  { %v3424_v49 = vpop.xlane.xlu1 %3423 }
0x17ea   :  { %6120 = vrcp.f32 %v3424_v49 }
0x17eb   :  { %6122 = vrcp.f32 %v3421_v5 }
0x17ed   :  { %v3489_v3 = vpop.permute.xlu1 %3488 }
0x17ee   :  { %5655 = vmatpush3.bf16.msra.mxu1 %v3489_v3 }
0x17ef   :  { %5666 = vmatprep.subr.bf16.mxu1 %v6330_v14 }
0x17f1   :  { %v3558_v10 = vpop.permute.xlu1 %3557 }
0x17f2   :  { %v3563_v0 = vsel %vm476_vm1, %v3558_v10, 0 }
0x17f7   :  { %v6121_v28 = vpop.eup %6120 }
0x17f8   :  { %v6123_v32 = vpop.eup %6122  ;;  %v3434_v7 = vmul.f32 %v6121_v28, %v6115_v43 }
0x17f9   :  { %v3432_v60 = vmul.f32 %v6123_v32, %v6113_v40 }
0x17fb   :  { %v3439_v61 = vpack.c.bf16 %v3434_v7, %v3432_v60 }
0x1817   :  { %v3427_v29 = vpop.xlane.xlu0 %3426 }
0x1818   :  { %6124 = vrcp.f32 %v3427_v29 }
0x181b   :  { %v3442_v8 = vpop.permute.xlu0 %3441 }
0x181c   :  { %5649 = vmatpush3.bf16.msra.mxu0 %v3442_v8 }
0x181d   :  { %5660 = vmatprep.subr.bf16.mxu0 %v6330_v14 }
0x181f   :  { %5651 = vmatmul.mubr.msk.bf16.vlgmr.msra.gmra.mxu0 %vm579_vm4, %v3439_v61  ;;  %v3556_v13 = vpop.permute.xlu0 %3555 }
0x1820   :  { %5661 = vmatpush3.bf16.xpose.msra.mxu0 %v3563_v0  ;;  %5662 = vmatprep.mubr.msk.bf16.mxu0 %vm6331_vm0, %v6330_v14 }
0x1821   :  { %5672 = vmatprep.subr.bf16.mxu0 %v6330_v14 }
0x1822   :  { %v3430_v9 = vpop.xlane.xlu1 %3429 }
0x1823   :  { %6126 = vrcp.f32 %v3430_v9 }
0x1825   :  { %v6125_v2 = vpop.eup %6124 }
0x1826   :  { %v3436_v16 = vmul.f32 %v6125_v2, %v6117_v57  ;;  %v3609_v19 = vpop.permute.xlu1 %3608 }
0x1827   :  { %5663 = vmatmul.mubr.msk.bf16.vlgmr.msra.gmra.mxu0 %vm476_vm1, %v3556_v13  ;;  %v3614_v27 = vsel %vm476_vm1, %v3609_v19, 0 }
0x1828   :  { %5674 = vmatprep.mubr.msk.bf16.mxu0 %vm6331_vm0, %v6330_v14 }
0x182a   :  { %v3607_v42 = vpop.permute.xlu1 %3606 }
0x1830   :  { %v6127_v4 = vpop.eup %6126 }
0x1831   :  { %v3438_v15 = vmul.f32 %v6127_v4, %v6119_v62 }
0x1833   :  { %v3440_v26 = vpack.c.bf16 %v3438_v15, %v3436_v16 }
0x1835   :  { %5657 = vmatmul.mubr.msk.bf16.vlgmr.msra.gmra.mxu1 %vm579_vm4, %v3440_v26 }
0x1836   :  { %5667 = vmatpush3.bf16.xpose.msra.mxu1 %v3614_v27  ;;  %5668 = vmatprep.mubr.msk.bf16.mxu1 %vm6331_vm0, %v6330_v14 }
0x1837   :  { %5678 = vmatprep.subr.bf16.mxu1 %v6330_v14 }
0x183d   :  { %5669 = vmatmul.mubr.msk.bf16.vlgmr.msra.gmra.mxu1 %vm476_vm1, %v3607_v42 }
0x183e   :  { %5680 = vmatprep.mubr.msk.bf16.mxu1 %vm6331_vm0, %v6330_v14 }
0x18df   :  { %v7138_v45 = vpop.f32.mrf.mxu0 }
0x18e1   :  { %v5652_v47 = vpop.f32.mrf.mxu0 }
0x18e3   :  { %v7140_v48 = vpop.f32.mrf.mxu0 }
0x18e5   :  { %v5653_v50 = vpop.f32.mrf.mxu0 }
0x18e7   :  { %v3599_v11 = vpop.f32.mrf.mxu0 }
0x18e8   :  { %v3657_v31 = vmul.f32 0.17677669, %v3599_v11 }
0x18e9   :  { %v5664_v34 = vpop.f32.mrf.mxu0 }
0x18ea   :  { %v3661_v25 = vadd.f32 %v3657_v31, %v6589_v41 }
0x18eb   :  { %v3602_v38 = vpop.f32.mrf.mxu0 }
0x18ec   :  { %v3658_v40 = vmul.f32 0.17677669, %v3602_v38  ;;  %v3665_v24 = vsel %vm579_vm4, %v3661_v25, -inf }
0x18ed   :  { %3666 = vmax.xlane.f32.xlu0 %v3665_v24  ;;  %v5665_v43 = vpop.f32.mrf.mxu0 }
0x18ee   :  { %v3662_v51 = vadd.f32 %v3658_v40, %v6592_v46 }
0x18f0   :  { %v3668_v14 = vsel %vm579_vm4, %v3662_v51, -inf }
0x18f1   :  { %3669 = vmax.xlane.f32.xlu1 %v3668_v14 }
0x18f5   :  { %v3528_v36 = vpop.f32.mrf.mxu1 }
0x18f7   :  { %v5658_v52 = vpop.f32.mrf.mxu1 }
0x18f9   :  { %v3531_v53 = vpop.f32.mrf.mxu1 }
0x18fb   :  { %v5659_v54 = vpop.f32.mrf.mxu1 }
0x18fd   :  { %v3650_v55 = vpop.f32.mrf.mxu1 }
0x18fe   :  { %v3659_v56 = vmul.f32 0.17677669, %v3650_v55  ;;  %v5896_v55 = vld [vmem:[#allocation3 + $0x78] sm:$0xff]  }
0x18ff   :  { %v5670_v57 = vpop.f32.mrf.mxu1 }
0x1900   :  { %v3663_v37 = vadd.f32 %v3659_v56, %v6589_v41  ;;  %v5897_v56 = vld [vmem:[#allocation3 + $0x70] sm:$0xff]   ;;  %v5898_v57 = vld [vmem:[#allocation3 + $0x68] sm:$0xff]  }
0x1901   :  { %v3653_v62 = vpop.f32.mrf.mxu1 }
0x1902   :  { %v3660_v63 = vmul.f32 0.17677669, %v3653_v62  ;;  %v3671_v49 = vsel %vm579_vm4, %v3663_v37, -inf  ;;  %v5900_v62 = vld [vmem:[#allocation3 + $0x58] sm:$0xff]  }
0x1903   :  { %v5671_v3 = vpop.f32.mrf.mxu1  ;;  %3672 = vmax.xlane.f32.xlu0 %v3671_v49 }
0x1904   :  { %v3664_v5 = vadd.f32 %v3660_v63, %v6592_v46  ;;  %v5901_v3 = vld [vmem:[#allocation3 + $0x50] sm:$0xff]  }
0x1906   :  { %v3674_v28 = vsel %vm579_vm4, %v3664_v5, -inf }
0x1907   :  { %3675 = vmax.xlane.f32.xlu0 %v3674_v28 }
0x1976   :  { %v3667_v29 = vpop.xlane.xlu0 %3666 }
0x1977   :  { %v3677_v32 = vsub.f32 %v3661_v25, %v3667_v29  ;;  %v5902_v29 = vld [vmem:[#allocation3 + $0x48] sm:$0xff]  }
0x1979   :  { %v3681_v7 = vmul.f32 1.442695, %v3677_v32  ;;  %v5903_v32 = vld [vmem:[#allocation3 + $0x40] sm:$0xff]  }
0x197a   :  { %v3670_v8 = vpop.xlane.xlu1 %3669 }
0x197b   :  { %6128 = vpow2.f32 %v3681_v7  ;;  %v3678_v60 = vsub.f32 %v3662_v51, %v3670_v8 }
0x197d   :  { %v3683_v10 = vmul.f32 1.442695, %v3678_v60 }
0x197f   :  { %6130 = vpow2.f32 %v3683_v10 }
0x1988   :  { %v6129_v41 = vpop.eup %6128 }
0x1989   :  { %v3689_v61 = vsel %vm579_vm4, %v6129_v41, 0.0 }
0x198a   :  { %3690 = vadd.xlane.f32.xlu0 %v3689_v61 }
0x198c   :  { %v6131_v0 = vpop.eup %6130  ;;  %v3673_v9 = vpop.xlane.xlu0 %3672 }
0x198d   :  { %v3679_v13 = vsub.f32 %v3663_v37, %v3673_v9  ;;  %v3692_v46 = vsel %vm579_vm4, %v6131_v0, 0.0  ;;  %v5899_v37 = vld [vmem:[#allocation3 + $0x60] sm:$0xff]  }
0x198e   :  { %3693 = vadd.xlane.f32.xlu1 %v3692_v46 }
0x198f   :  { %v3685_v2 = vmul.f32 1.442695, %v3679_v13 }
0x1990   :  { %v3676_v4 = vpop.xlane.xlu0 %3675 }
0x1991   :  { %6132 = vpow2.f32 %v3685_v2  ;;  %v3680_v16 = vsub.f32 %v3664_v5, %v3676_v4 }
0x1993   :  { %v3687_v15 = vmul.f32 1.442695, %v3680_v16 }
0x1995   :  { %6134 = vpow2.f32 %v3687_v15 }
0x199e   :  { %v6133_v19 = vpop.eup %6132 }
0x199f   :  { %v3695_v26 = vsel %vm579_vm4, %v6133_v19, 0.0 }
0x19a0   :  { %3696 = vadd.xlane.f32.xlu0 %v3695_v26  ;;  %v5121_v26 = vld [vmem:[#allocation6 + $0x1] ss:$0 sm:$0xff] }
0x19a2   :  { %v6135_v27 = vpop.eup %6134 }
0x19a3   :  { %v3698_v42 = vsel %vm579_vm4, %v6135_v27, 0.0 }
0x19a4   :  { %3699 = vadd.xlane.f32.xlu1 %v3698_v42 }
0x19b5   :  { %3758 = vrot.lane.b32.xlu1 %v6981_v44, %s6334_s22 }
0x19b6   :  { %3711 = vrot.lane.b32.xlu0 %v6998_v1, %s6334_s22 }
0x19b9   :  { %3269 = vrot.lane.b32.xlu1 %v7088_v58, %s6334_s22 }
0x19ba   :  { %3273 = vrot.lane.b32.xlu0 %v7096_v30, %s6334_s22 }
0x19bd   :  { %3271 = vrot.lane.b32.xlu1 %v7090_v59, %s6334_s22 }
0x19be   :  { %3539 = vrot.lane.b32.xlu0 %v7138_v45, %s6323_s20 }
0x19c1   :  { %3275 = vrot.lane.b32.xlu1 %v7098_v17, %s6334_s22 }
0x19c2   :  { %3543 = vrot.lane.b32.xlu0 %v3528_v36, %s6323_s20 }
0x19c5   :  { %3541 = vrot.lane.b32.xlu1 %v7140_v48, %s6323_s20 }
0x19c9   :  { %3545 = vrot.lane.b32.xlu1 %v3531_v53, %s6323_s20 }
0x1a13   :  { %v3691_v1 = vpop.xlane.xlu0 %3690 }
0x1a17   :  { %v3694_v44 = vpop.xlane.xlu1 %3693 }
0x1a18   :  { %6136 = vrcp.f32 %v3694_v44 }
0x1a19   :  { %6138 = vrcp.f32 %v3691_v1 }
0x1a25   :  { %v6137_v58 = vpop.eup %6136 }
0x1a26   :  { %v6139_v59 = vpop.eup %6138  ;;  %v3704_v47 = vmul.f32 %v6137_v58, %v6131_v0 }
0x1a27   :  { %v3702_v11 = vmul.f32 %v6139_v59, %v6129_v41 }
0x1a29   :  { %v3697_v30 = vpop.xlane.xlu0 %3696  ;;  %v3709_v17 = vpack.c.bf16 %v3704_v47, %v3702_v11 }
0x1a2a   :  { %6140 = vrcp.f32 %v3697_v30 }
0x1a2d   :  { %v3712_v45 = vpop.permute.xlu0 %3711  ;;  %v3700_v50 = vpop.xlane.xlu1 %3699 }
0x1a2e   :  { %6142 = vrcp.f32 %v3700_v50  ;;  %5673 = vmatpush3.bf16.msra.mxu0 %v3712_v45 }
0x1a2f   :  { %5684 = vmatprep.subr.bf16.mxu0 %v5896_v55 }
0x1a31   :  { %v3274_v31 = vpop.permute.xlu0 %3273  ;;  %5675 = vmatmul.mubr.msk.bf16.vlgmr.msra.gmra.mxu0 %vm579_vm4, %v3709_v17  ;;  %v3759_v48 = vpop.permute.xlu1 %3758  ;;  %v5906_v17 = vld [vmem:[#allocation8 + $0x1e4] ss:$16 sps:$4 sm:$0xff]  }
0x1a32   :  { %3283 = vst.msk [vmem:[#allocation2 + $0x10] sm:$0xff] %vm990_vm5, %v3274_v31  ;;  %5679 = vmatpush3.bf16.msra.mxu1 %v3759_v48  ;;  %5685 = vmatpush3.bf16.msra.mxu0 %v5896_v55  ;;  %v5907_v31 = vld [vmem:[#allocation8 + $0x1e8] ss:$16 sps:$4 sm:$0xff]   ;;  %v5909_v48 = vld [vmem:[#allocation8 + $0x1ec] ss:$16 sps:$4 sm:$0xff]  }
0x1a33   :  { %5686 = vmatprep.subr.bf16.mxu0 %v5897_v56  ;;  %4227 = vmatprep.subr.bf16.mxu1 %v5906_v17 }
0x1a35   :  { %v3540_v34 = vpop.permute.xlu0 %3539  ;;  %v3270_v25 = vpop.permute.xlu1 %3269 }
0x1a36   :  { %3281 = vst.msk [vmem:[#allocation2] sm:$0xff] %vm990_vm5, %v3270_v25  ;;  %5687 = vmatpush3.bf16.msra.mxu0 %v5897_v56  ;;  %v5912_v56 = vld [vmem:[#allocation8 + $0x1c4] ss:$16 sps:$4 sm:$0xff]  }
0x1a37   :  { %3551 = vst.msk [vmem:[#allocation2] sm:$0xff] %vm1261_vm6, %v3540_v34  ;;  %v6141_v38 = vpop.eup %6140  ;;  %5688 = vmatprep.subr.bf16.mxu0 %v5898_v57 }
0x1a38   :  { %v3706_v51 = vmul.f32 %v6141_v38, %v6133_v19 }
0x1a39   :  { %v3544_v40 = vpop.permute.xlu0 %3543  ;;  %v3272_v24 = vpop.permute.xlu1 %3271 }
0x1a3a   :  { %3553 = vst.msk [vmem:[#allocation2 + $0x10] sm:$0xff] %vm1261_vm6, %v3544_v40  ;;  %5689 = vmatpush3.bf16.msra.mxu0 %v5898_v57  ;;  %v5915_v57 = vld [vmem:[#allocation8 + $0x1cc] ss:$16 sps:$4 sm:$0xff]  }
0x1a3b   :  { %3282 = vst.msk [vmem:[#allocation2 + $0x8] sm:$0xff] %vm990_vm5, %v3272_v24  ;;  %v6143_v43 = vpop.eup %6142  ;;  %5690 = vmatprep.subr.bf16.mxu0 %v5899_v37 }
0x1a3c   :  { %v3708_v14 = vmul.f32 %v6143_v43, %v6135_v27 }
0x1a3d   :  { %v3276_v36 = vpop.permute.xlu1 %3275 }
0x1a3e   :  { %3284 = vst.msk [vmem:[#allocation2 + $0x18] sm:$0xff] %vm990_vm5, %v3276_v36  ;;  %v3710_v52 = vpack.c.bf16 %v3708_v14, %v3706_v51  ;;  %5691 = vmatpush3.bf16.msra.mxu0 %v5899_v37  ;;  %v5910_v37 = vld [vmem:[#allocation8 + $0x1c0] ss:$16 sps:$4 sm:$0xff]  }
0x1a3f   :  { %5692 = vmatprep.subr.bf16.mxu0 %v5900_v62 }
0x1a40   :  { %5681 = vmatmul.mubr.msk.bf16.vlgmr.msra.gmra.mxu1 %vm579_vm4, %v3710_v52 }
0x1a41   :  { %v3542_v53 = vpop.permute.xlu1 %3541  ;;  %4259 = vmatprep.mubr.bf16.mxu1 %v6329_v39 }
0x1a42   :  { %3552 = vst.msk [vmem:[#allocation2 + $0x8] sm:$0xff] %vm1261_vm6, %v3542_v53  ;;  %5693 = vmatpush3.bf16.msra.mxu0 %v5900_v62  ;;  %v5913_v62 = vld [vmem:[#allocation8 + $0x1c8] ss:$16 sps:$4 sm:$0xff]  }
0x1a43   :  { %5694 = vmatprep.subr.bf16.mxu0 %v5901_v3 }
0x1a45   :  { %v3546_v54 = vpop.permute.xlu1 %3545 }
0x1a46   :  { %3554 = vst.msk [vmem:[#allocation2 + $0x18] sm:$0xff] %vm1261_vm6, %v3546_v54  ;;  %5695 = vmatpush3.bf16.msra.mxu0 %v5901_v3  ;;  %v5916_v3 = vld [vmem:[#allocation8 + $0x1a0] ss:$16 sps:$4 sm:$0xff]  }
0x1a47   :  { %5696 = vmatprep.subr.bf16.mxu0 %v5902_v29 }
0x1a4a   :  { %5697 = vmatpush3.bf16.msra.mxu0 %v5902_v29  ;;  %v5927_v29 = vld [vmem:[#allocation8 + $0x18c] ss:$16 sps:$4 sm:$0xff]  }
0x1a4b   :  { %5698 = vmatprep.subr.bf16.mxu0 %v5903_v32 }
0x1a4e   :  { %5699 = vmatpush3.bf16.msra.mxu0 %v5903_v32  ;;  %v5922_v32 = vld [vmem:[#allocation8 + $0x180] ss:$16 sps:$4 sm:$0xff]  }
0x1a4f   :  { %4280 = vmatprep.subr.bf16.mxu0 %v5909_v48 }
0x1af1   :  { %v3751_v63 = vpop.f32.mrf.mxu0 }
0x1af2   :  { %3809 = vrot.lane.b32.xlu0 %v3751_v63, %s6333_s21  ;;  %v5918_v63 = vld [vmem:[#allocation8 + $0x1a4] ss:$16 sps:$4 sm:$0xff]  }
0x1af3   :  { %v5676_v49 = vpop.f32.mrf.mxu0 }
0x1af4   :  { %v5921_v49 = vld [vmem:[#allocation8 + $0x1ac] ss:$16 sps:$4 sm:$0xff]  }
0x1af5   :  { %v3754_v5 = vpop.f32.mrf.mxu0 }
0x1af6   :  { %3811 = vrot.lane.b32.xlu1 %v3754_v5, %s6333_s21  ;;  %v5919_v5 = vld [vmem:[#allocation8 + $0x1a8] ss:$16 sps:$4 sm:$0xff]  }
0x1af7   :  { %v5677_v28 = vpop.f32.mrf.mxu0 }
0x1af8   :  { %v5924_v28 = vld [vmem:[#allocation8 + $0x184] ss:$16 sps:$4 sm:$0xff]  }
0x1b00   :  { %v3798_v7 = vpop.f32.mrf.mxu1 }
0x1b01   :  { %3813 = vrot.lane.b32.xlu0 %v3798_v7, %s6333_s21  ;;  %v5925_v7 = vld [vmem:[#allocation8 + $0x188] ss:$16 sps:$4 sm:$0xff]  }
0x1b02   :  { %v5682_v8 = vpop.f32.mrf.mxu1 }
0x1b03   :  { %v5928_v8 = vld [vmem:[#allocation8 + $0x160] ss:$16 sps:$4 sm:$0xff]  }
0x1b04   :  { %v3801_v60 = vpop.f32.mrf.mxu1 }
0x1b05   :  { %3815 = vrot.lane.b32.xlu1 %v3801_v60, %s6333_s21  ;;  %v5930_v60 = vld [vmem:[#allocation8 + $0x164] ss:$16 sps:$4 sm:$0xff]  }
0x1b06   :  { %v5683_v10 = vpop.f32.mrf.mxu1 }
0x1b07   :  { %v5931_v10 = vld [vmem:[#allocation8 + $0x168] ss:$16 sps:$4 sm:$0xff]  }
0x1b64   :  { %v3810_v41 = vpop.permute.xlu0 %3809 }
0x1b65   :  { %3821 = vst.msk [vmem:[#allocation2] sm:$0xff] %vm1532_vm7, %v3810_v41  ;;  %v5933_v41 = vld [vmem:[#allocation8 + $0x16c] ss:$16 sps:$4 sm:$0xff]  }
0x1b68   :  { %v3812_v61 = vpop.permute.xlu1 %3811 }
0x1b69   :  { %3822 = vst.msk [vmem:[#allocation2 + $0x8] sm:$0xff] %vm1532_vm7, %v3812_v61  ;;  %v5936_v61 = vld [vmem:[#allocation8 + $0x144] ss:$16 sps:$4 sm:$0xff]  }
0x1b6c   :  { %v3825_v0 = vld [vmem:[#allocation2] sm:$0xff] }
0x1b70   :  { %v3826_v9 = vld [vmem:[#allocation2 + $0x8] sm:$0xff] }
0x1b71   :  { %v3829_v13 = vpack.c.bf16 %v3826_v9, %v3825_v0  ;;  %v5939_v0 = vld [vmem:[#allocation8 + $0x14c] ss:$16 sps:$4 sm:$0xff]   ;;  %v5934_v9 = vld [vmem:[#allocation8 + $0x140] ss:$16 sps:$4 sm:$0xff]  }
0x1b73   :  { %v3814_v46 = vpop.permute.xlu0 %3813  ;;  %5700 = vmatprep.mubr.bf16.mxu0 %v3829_v13  ;;  %v5937_v13 = vld [vmem:[#allocation8 + $0x148] ss:$16 sps:$4 sm:$0xff]  }
0x1b74   :  { %3823 = vst.msk [vmem:[#allocation2 + $0x10] sm:$0xff] %vm1532_vm7, %v3814_v46  ;;  %v5942_v46 = vld [vmem:[#allocation8 + $0x124] ss:$16 sps:$4 sm:$0xff]  }
0x1b77   :  { %v3816_v2 = vpop.permute.xlu1 %3815 }
0x1b78   :  { %3824 = vst.msk [vmem:[#allocation2 + $0x18] sm:$0xff] %vm1532_vm7, %v3816_v2  ;;  %v5945_v2 = vld [vmem:[#allocation8 + $0x12c] ss:$16 sps:$4 sm:$0xff]  }
0x1b7b   :  { %v3827_v4 = vld [vmem:[#allocation2 + $0x10] sm:$0xff] }
0x1b7f   :  { %v3828_v16 = vld [vmem:[#allocation2 + $0x18] sm:$0xff] }
0x1b80   :  { %v3830_v15 = vpack.c.bf16 %v3828_v16, %v3827_v4  ;;  %v5940_v4 = vld [vmem:[#allocation8 + $0x120] ss:$16 sps:$4 sm:$0xff]   ;;  %v5943_v16 = vld [vmem:[#allocation8 + $0x128] ss:$16 sps:$4 sm:$0xff]  }
0x1b82   :  { %5701 = vmatmul.mubr.bf16.vlgmr.msra.gmra.mxu0 %v3830_v15  ;;  %v5948_v15 = vld [vmem:[#allocation8 + $0x104] ss:$16 sps:$4 sm:$0xff]  }
0x1b83   :  { %4312 = vmatprep.mubr.bf16.mxu0 %v6329_v39  ;;  %4281 = vmatpush1.bf16.msra.mxu0 %v5907_v31 }
0x1b84   :  { %4282 = vmatprep.subr.bf16.mxu0 %v5915_v57  ;;  %v6167_v57 = vld [vmem:[%s7287_s2 + $0x1] ss:$0 sm:$0xff] }
0x1b87   :  { %4283 = vmatpush1.bf16.msra.mxu0 %v5913_v62 }
0x1b88   :  { %4284 = vmatprep.subr.bf16.mxu0 %v5921_v49 }
0x1b8b   :  { %4285 = vmatpush1.bf16.msra.mxu0 %v5919_v5  ;;  %v5955_v5 = vld [vmem:[#allocation9 + $0x1b8] sm:$0xff]  }
0x1b8c   :  { %4286 = vmatprep.subr.bf16.mxu0 %v5927_v29  ;;  %v5957_v29 = vld [vmem:[#allocation9 + $0x1f0] sm:$0xff]  }
0x1b8f   :  { %4287 = vmatpush1.bf16.msra.mxu0 %v5925_v7 }
0x1b90   :  { %4288 = vmatprep.subr.bf16.mxu0 %v5933_v41 }
0x1b93   :  { %4289 = vmatpush1.bf16.msra.mxu0 %v5931_v10 }
0x1b94   :  { %4290 = vmatprep.subr.bf16.mxu0 %v5939_v0  ;;  %v5963_v0 = vld [vmem:[#allocation9 + $0x1a8] sm:$0xff]  }
0x1b97   :  { %4291 = vmatpush1.bf16.msra.mxu0 %v5937_v13  ;;  %v5965_v13 = vld [vmem:[#allocation9 + $0x1e0] sm:$0xff]  }
0x1b98   :  { %4292 = vmatprep.subr.bf16.mxu0 %v5945_v2  ;;  %v5968_v2 = vld [vmem:[#allocation9 + $0x158] sm:$0xff]  }
0x1b9b   :  { %4293 = vmatpush1.bf16.msra.mxu0 %v5943_v16  ;;  %v5970_v16 = vld [vmem:[#allocation9 + $0x118] sm:$0xff]  }
0x1c42   :  { %v5702_v19 = vpop.f32.mrf.mxu0 }
0x1c43   :  { %v3947_v1 = vadd.f32 %v5702_v19, %v5121_v26  ;;  %v5951_v19 = vld [vmem:[#allocation8 + $0x10c] ss:$16 sps:$4 sm:$0xff]  }
0x1c44   :  { %v3938_v27 = vpop.f32.mrf.mxu0  ;;  %4294 = vmatprep.subr.bf16.mxu0 %v5951_v19  ;;  %v5972_v19 = vld [vmem:[#allocation9 + $0x150] sm:$0xff]  }
0x1c45   :  { %v3939_v42 = vadd.f32 %v5121_v26, %v3938_v27  ;;  %v7197_v47 = vadd.f32 %v3947_v1, %v6860_v12  ;;  %v5949_v27 = vld [vmem:[#allocation8 + $0x108] ss:$16 sps:$4 sm:$0xff]  }
0x1c46   :  { %v5703_v44 = vpop.f32.mrf.mxu0  ;;  %4295 = vmatpush1.bf16.msra.mxu0 %v5949_v27  ;;  %v5974_v27 = vld [vmem:[#allocation9 + $0x110] sm:$0xff]  }
0x1c47   :  { %v7193_v58 = vadd.f32 %v3939_v42, %v6852_v20  ;;  %v3950_v45 = vadd.f32 %v5703_v44, %v5121_v26  ;;  %v5904_v20 = vld [vmem:[#allocation8 + $0x1e0] ss:$16 sps:$4 sm:$0xff]   ;;  %v5952_v42 = vld [vmem:[#allocation9 + $0x178] sm:$0xff]  }
0x1c48   :  { %v3941_v30 = vpop.f32.mrf.mxu0  ;;  %4228 = vmatpush1.bf16.msra.mxu1 %v5904_v20  ;;  %v5953_v44 = vld [vmem:[#allocation9 + $0x1f8] sm:$0xff]  }
0x1c49   :  { %v3942_v59 = vadd.f32 %v5121_v26, %v3941_v30  ;;  %3957 = vadd.xlane.f32.xlu0 %v7193_v58  ;;  %v7205_v11 = vadd.f32 %v3950_v45, %v6864_v33  ;;  %4229 = vmatprep.subr.bf16.mxu1 %v5912_v56  ;;  %v5946_v26 = vld [vmem:[#allocation8 + $0x100] ss:$16 sps:$4 sm:$0xff]  }
0x1c4a   :  { %5394 = vmatprep.subr.bf16.mxu0 %v5953_v44  ;;  %v5976_v44 = vld [vmem:[#allocation9 + $0x148] sm:$0xff]  }
0x1c4b   :  { %v7200_v50 = vadd.f32 %v3942_v59, %v6856_v6 }
0x1c4c   :  { %4230 = vmatpush1.bf16.msra.mxu1 %v5910_v37 }
0x1c4d   :  { %3959 = vadd.xlane.f32.xlu1 %v7200_v50  ;;  %3961 = vadd.xlane.f32.xlu0 %v7197_v47 }
0x1c4e   :  { %4231 = vmatprep.subr.bf16.mxu1 %v5918_v63 }
0x1c50   :  { %4232 = vmatpush1.bf16.msra.mxu1 %v5916_v3  ;;  %v5954_v3 = vld [vmem:[#allocation9 + $0x138] sm:$0xff]  }
0x1c51   :  { %3963 = vadd.xlane.f32.xlu0 %v7205_v11  ;;  %4233 = vmatprep.subr.bf16.mxu1 %v5924_v28  ;;  %v5956_v28 = vld [vmem:[#allocation9 + $0x170] sm:$0xff]  }
0x1c54   :  { %4234 = vmatpush1.bf16.msra.mxu1 %v5922_v32 }
0x1c55   :  { %4235 = vmatprep.subr.bf16.mxu1 %v5930_v60  ;;  %v5961_v60 = vld [vmem:[#allocation9 + $0x1e8] sm:$0xff]  }
0x1c58   :  { %4236 = vmatpush1.bf16.msra.mxu1 %v5928_v8  ;;  %v5958_v8 = vld [vmem:[#allocation9 + $0x130] sm:$0xff]  }
0x1c59   :  { %4237 = vmatprep.subr.bf16.mxu1 %v5936_v61  ;;  %v5962_v61 = vld [vmem:[#allocation9 + $0x128] sm:$0xff]  }
0x1c5c   :  { %4238 = vmatpush1.bf16.msra.mxu1 %v5934_v9  ;;  %v5964_v9 = vld [vmem:[#allocation9 + $0x160] sm:$0xff]  }
0x1c5d   :  { %4239 = vmatprep.subr.bf16.mxu1 %v5942_v46  ;;  %v5967_v46 = vld [vmem:[#allocation9 + $0x1a0] sm:$0xff]  }
0x1c60   :  { %4240 = vmatpush1.bf16.msra.mxu1 %v5940_v4  ;;  %v5969_v4 = vld [vmem:[#allocation9 + $0x1d8] sm:$0xff]  }
0x1c61   :  { %4241 = vmatprep.subr.bf16.mxu1 %v5948_v15  ;;  %v5971_v15 = vld [vmem:[#allocation9 + $0x198] sm:$0xff]  }
0x1c64   :  { %4242 = vmatpush1.bf16.msra.mxu1 %v5946_v26  ;;  %v5973_v26 = vld [vmem:[#allocation9 + $0x1d0] sm:$0xff]  }
0x1c65   :  { %5366 = vmatprep.subr.bf16.mxu1 %v5952_v42  ;;  %v5975_v42 = vld [vmem:[#allocation9 + $0x190] sm:$0xff]  }
0x1cd2   :  { %v3958_v12 = vpop.xlane.xlu0 %3957 }
0x1cd3   :  { %v3965_v6 = vmul.f32 0.0078125, %v3958_v12 }
0x1cd5   :  { %v7209_v34 = vsub.f32 %v7193_v58, %v3965_v6 }
0x1cd6   :  { %v3960_v25 = vpop.xlane.xlu1 %3959  ;;  %v3962_v38 = vpop.xlane.xlu0 %3961 }
0x1cd7   :  { %v3966_v40 = vmul.f32 0.0078125, %v3960_v25  ;;  %v3967_v33 = vmul.f32 0.0078125, %v3962_v38  ;;  %v3973_v24 = vmul.f32 %v7209_v34, %v7209_v34 }
0x1cd9   :  { %v7214_v43 = vsub.f32 %v7200_v50, %v3966_v40  ;;  %v7217_v51 = vsub.f32 %v7197_v47, %v3967_v33  ;;  %3977 = vadd.xlane.f32.xlu0 %v3973_v24 }
0x1cda   :  { %v3964_v14 = vpop.xlane.xlu0 %3963 }
0x1cdb   :  { %v3968_v36 = vmul.f32 0.0078125, %v3964_v14  ;;  %v3974_v52 = vmul.f32 %v7214_v43, %v7214_v43  ;;  %v3975_v53 = vmul.f32 %v7217_v51, %v7217_v51 }
0x1cdd   :  { %v7224_v54 = vsub.f32 %v7205_v11, %v3968_v36  ;;  %3979 = vadd.xlane.f32.xlu1 %v3974_v52  ;;  %3981 = vadd.xlane.f32.xlu0 %v3975_v53  ;;  %v6166_v36 = vld [vmem:[%s7286_s1 + $0x1] ss:$0 sm:$0xff] }
0x1cdf   :  { %v3976_v55 = vmul.f32 %v7224_v54, %v7224_v54 }
0x1ce1   :  { %3983 = vadd.xlane.f32.xlu1 %v3976_v55 }
0x1d62   :  { %v3978_v1 = vpop.xlane.xlu0 %3977 }
0x1d63   :  { %v3985_v30 = vmul.f32 0.0078125, %v3978_v1  ;;  %v5977_v1 = vld [vmem:[#allocation9 + $0x1c8] sm:$0xff]  }
0x1d65   :  { %v3989_v59 = vadd.f32 1e-05, %v3985_v30  ;;  %v5978_v30 = vld [vmem:[#allocation9 + $0x108] sm:$0xff]  }
0x1d66   :  { %v3980_v45 = vpop.xlane.xlu1 %3979  ;;  %v3982_v20 = vpop.xlane.xlu0 %3981 }
0x1d67   :  { %6144 = vrsqrt.f32 %v3989_v59  ;;  %v3986_v17 = vmul.f32 0.0078125, %v3980_v45  ;;  %v3987_v31 = vmul.f32 0.0078125, %v3982_v20  ;;  %v5979_v59 = vld [vmem:[#allocation9 + $0x188] sm:$0xff]   ;;  %v5980_v45 = vld [vmem:[#allocation9 + $0x140] sm:$0xff]  }
0x1d68   :  { %v5981_v20 = vld [vmem:[#allocation9 + $0x1c0] sm:$0xff]  }
0x1d69   :  { %v3990_v48 = vadd.f32 1e-05, %v3986_v17  ;;  %v3991_v12 = vadd.f32 1e-05, %v3987_v31  ;;  %v5982_v17 = vld [vmem:[#allocation9 + $0x100] sm:$0xff]  }
0x1d6a   :  { %v3984_v6 = vpop.xlane.xlu1 %3983  ;;  %v5983_v31 = vld [vmem:[#allocation9 + $0x180] sm:$0xff]  }
0x1d6b   :  { %6146 = vrsqrt.f32 %v3990_v48  ;;  %v3988_v25 = vmul.f32 0.0078125, %v3984_v6  ;;  %v5130_v48 = vld [vmem:[%s7292_s7 + $0x4] sm:$0xf] }
0x1d6c   :  { %6148 = vrsqrt.f32 %v3991_v12 }
0x1d6d   :  { %v3992_v38 = vadd.f32 1e-05, %v3988_v25  ;;  %v4054_v25 = vrot.slane %v5130_v48, %v1761_v18 }
0x1d6f   :  { %6150 = vrsqrt.f32 %v3992_v38  ;;  %v4062_v38 = vrot.slane %v5130_v48, %v1769_v21 }
0x1d74   :  { %v6145_v40 = vpop.eup %6144 }
0x1d75   :  { %v3997_v33 = vmul.f32 %v6145_v40, %v7209_v34  ;;  %v4050_v40 = vrot.slane %v5130_v48, %v1757_v22 }
0x1d77   :  { %v4001_v52 = vmul.f32 %v6166_v36, %v3997_v33  ;;  %v4058_v33 = vrot.slane %v5130_v48, %v1765_v23 }
0x1d78   :  { %v6147_v24 = vpop.eup %6146 }
0x1d79   :  { %v3998_v14 = vmul.f32 %v6147_v24, %v7214_v43  ;;  %v6149_v53 = vpop.eup %6148  ;;  %v4005_v37 = vadd.f32 %v6167_v57, %v4001_v52 }
0x1d7a   :  { %v3999_v63 = vmul.f32 %v6149_v53, %v7217_v51  ;;  %v5959_v51 = vld [vmem:[#allocation9 + $0x1b0] sm:$0xff]  }
0x1d7b   :  { %v4002_v55 = vmul.f32 %v6166_v36, %v3998_v14 }
0x1d7c   :  { %v6151_v56 = vpop.eup %6150  ;;  %v4003_v32 = vmul.f32 %v6166_v36, %v3999_v63 }
0x1d7d   :  { %v4006_v62 = vadd.f32 %v6167_v57, %v4002_v55  ;;  %v4000_v34 = vmul.f32 %v6151_v56, %v7224_v54  ;;  %v5960_v54 = vld [vmem:[#allocation9 + $0x168] sm:$0xff]  }
0x1d7e   :  { %v4007_v10 = vadd.f32 %v6167_v57, %v4003_v32 }
0x1d7f   :  { %v4009_v49 = vpack.c.bf16 %v4006_v62, %v4005_v37  ;;  %v4004_v43 = vmul.f32 %v6166_v36, %v4000_v34 }
0x1d81   :  { %4260 = vmatmul.mubr.bf16.vlgmr.msra.gmra.mxu1 %v4009_v49  ;;  %4313 = vmatmul.mubr.bf16.vlgmr.msra.gmra.mxu0 %v4009_v49  ;;  %v4008_v7 = vadd.f32 %v6167_v57, %v4004_v43 }
0x1d82   :  { %4269 = vmatprep.mubr.bf16.mxu1 %v6329_v39  ;;  %4322 = vmatprep.mubr.bf16.mxu0 %v6329_v39  ;;  %v5966_v39 = vld [vmem:[#allocation9 + $0x120] sm:$0xff]  }
0x1d83   :  { %5367 = vmatpush3.bf16.msra.mxu1 %v5954_v3  ;;  %5395 = vmatpush3.bf16.msra.mxu0 %v5955_v5  ;;  %v4010_v41 = vpack.c.bf16 %v4008_v7, %v4007_v10 }
0x1d84   :  { %5368 = vmatprep.subr.bf16.mxu1 %v5956_v28  ;;  %5396 = vmatprep.subr.bf16.mxu0 %v5957_v29 }
0x1d87   :  { %5369 = vmatpush3.bf16.msra.mxu1 %v5958_v8  ;;  %5397 = vmatpush3.bf16.msra.mxu0 %v5959_v51 }
0x1d88   :  { %5370 = vmatprep.subr.bf16.mxu1 %v5960_v54  ;;  %5398 = vmatprep.subr.bf16.mxu0 %v5961_v60 }
0x1d89   :  { %4270 = vmatmul.mubr.bf16.gmra.mxu1 %v4010_v41  ;;  %4323 = vmatmul.mubr.bf16.gmra.mxu0 %v4010_v41 }
0x1d8b   :  { %5371 = vmatpush3.bf16.msra.mxu1 %v5962_v61  ;;  %5399 = vmatpush3.bf16.msra.mxu0 %v5963_v0 }
0x1d8c   :  { %5372 = vmatprep.subr.bf16.mxu1 %v5964_v9  ;;  %5400 = vmatprep.subr.bf16.mxu0 %v5965_v13 }
0x1d8f   :  { %5373 = vmatpush3.bf16.msra.mxu1 %v5966_v39  ;;  %5401 = vmatpush3.bf16.msra.mxu0 %v5967_v46 }
0x1d90   :  { %5374 = vmatprep.subr.bf16.mxu1 %v5968_v2  ;;  %5402 = vmatprep.subr.bf16.mxu0 %v5969_v4 }
0x1d93   :  { %5375 = vmatpush3.bf16.msra.mxu1 %v5970_v16  ;;  %5403 = vmatpush3.bf16.msra.mxu0 %v5971_v15 }
0x1d94   :  { %5376 = vmatprep.subr.bf16.mxu1 %v5972_v19  ;;  %5404 = vmatprep.subr.bf16.mxu0 %v5973_v26 }
0x1d97   :  { %5377 = vmatpush3.bf16.msra.mxu1 %v5974_v27  ;;  %5405 = vmatpush3.bf16.msra.mxu0 %v5975_v42 }
0x1d98   :  { %5378 = vmatprep.subr.bf16.mxu1 %v5976_v44  ;;  %5406 = vmatprep.subr.bf16.mxu0 %v5977_v1 }
0x1d9b   :  { %5379 = vmatpush3.bf16.msra.mxu1 %v5978_v30  ;;  %5407 = vmatpush3.bf16.msra.mxu0 %v5979_v59 }
0x1d9c   :  { %5380 = vmatprep.subr.bf16.mxu1 %v5980_v45  ;;  %5408 = vmatprep.subr.bf16.mxu0 %v5981_v20 }
0x1d9f   :  { %5381 = vmatpush3.bf16.msra.mxu1 %v5982_v17  ;;  %5409 = vmatpush3.bf16.msra.mxu0 %v5983_v31 }
0x1e41   :  { %v4261_v12 = vpop.f32.mrf.mxu1  ;;  %v4314_v6 = vpop.f32.mrf.mxu0 }
0x1e42   :  { %v4262_v37 = vadd.f32 %v4261_v12, %v4050_v40  ;;  %v4315_v62 = vadd.f32 %v4314_v6, %v4058_v33 }
0x1e43   :  { %v4263_v24 = vpop.f32.mrf.mxu1  ;;  %v4316_v14 = vpop.f32.mrf.mxu0 }
0x1e44   :  { %v4264_v53 = vadd.f32 %v4263_v24, %v4054_v25  ;;  %v4317_v55 = vadd.f32 %v4316_v14, %v4062_v38  ;;  %v4333_v29 = vmax.f32 %v4262_v37, 0.0  ;;  %v4335_v32 = vmax.f32 %v4315_v62, 0.0 }
0x1e45   :  { %v4265_v36 = vpop.f32.mrf.mxu1  ;;  %v4318_v52 = vpop.f32.mrf.mxu0 }
0x1e46   :  { %v4266_v56 = vadd.f32 %v4265_v36, %v4050_v40  ;;  %v4319_v57 = vadd.f32 %v4318_v52, %v4058_v33  ;;  %v4334_v35 = vmax.f32 %v4264_v53, 0.0  ;;  %v4336_v23 = vmax.f32 %v4317_v55, 0.0 }
0x1e47   :  { %v4267_v18 = vpop.f32.mrf.mxu1  ;;  %v4320_v63 = vpop.f32.mrf.mxu0 }
0x1e48   :  { %v4268_v34 = vadd.f32 %v4267_v18, %v4054_v25  ;;  %v4321_v21 = vadd.f32 %v4320_v63, %v4062_v38  ;;  %v4337_v49 = vmax.f32 %v4266_v56, 0.0  ;;  %v4339_v43 = vmax.f32 %v4319_v57, 0.0 }
0x1e49   :  { %v4271_v22 = vpop.f32.mrf.mxu1  ;;  %v4324_v3 = vpop.f32.mrf.mxu0 }
0x1e4a   :  { %v4338_v5 = vmax.f32 %v4268_v34, 0.0  ;;  %v4340_v28 = vmax.f32 %v4321_v21, 0.0  ;;  %v4349_v60 = vpack.c.bf16 %v4337_v49, %v4333_v29  ;;  %v4351_v10 = vpack.c.bf16 %v4339_v43, %v4335_v32 }
0x1e4b   :  { %v4273_v7 = vpop.f32.mrf.mxu1  ;;  %v4326_v8 = vpop.f32.mrf.mxu0  ;;  %v4272_v46 = vadd.f32 %v4271_v22, %v4050_v40  ;;  %v4325_v2 = vadd.f32 %v4324_v3, %v4058_v33 }
0x1e4c   :  { %v4350_v51 = vpack.c.bf16 %v4338_v5, %v4334_v35  ;;  %v4352_v54 = vpack.c.bf16 %v4340_v28, %v4336_v23  ;;  %v4274_v41 = vadd.f32 %v4273_v7, %v4054_v25  ;;  %v4327_v9 = vadd.f32 %v4326_v8, %v4062_v38 }
0x1e4d   :  { %v4275_v61 = vpop.f32.mrf.mxu1  ;;  %v4328_v0 = vpop.f32.mrf.mxu0  ;;  %v4341_v59 = vmax.f32 %v4272_v46, 0.0  ;;  %v4343_v45 = vmax.f32 %v4325_v2, 0.0 }
0x1e4e   :  { %v4276_v13 = vadd.f32 %v4275_v61, %v4050_v40  ;;  %v4329_v39 = vadd.f32 %v4328_v0, %v4058_v33  ;;  %4654 = vmatprep.mubr.bf16.mxu1 %v4350_v51  ;;  %4703 = vmatprep.mubr.bf16.mxu0 %v4352_v54  ;;  %v4342_v42 = vmax.f32 %v4274_v41, 0.0  ;;  %v4344_v44 = vmax.f32 %v4327_v9, 0.0 }
0x1e4f   :  { %v4277_v4 = vpop.f32.mrf.mxu1  ;;  %v4330_v16 = vpop.f32.mrf.mxu0  ;;  %4655 = vmatmul.mubr.bf16.vlgmr.msra.gmra.mxu1 %v4349_v60  ;;  %4704 = vmatmul.mubr.bf16.vlgmr.msra.gmra.mxu0 %v4351_v10 }
0x1e50   :  { %v4278_v15 = vadd.f32 %v4277_v4, %v4054_v25  ;;  %v4331_v19 = vadd.f32 %v4330_v16, %v4062_v38  ;;  %v4345_v26 = vmax.f32 %v4276_v13, 0.0  ;;  %v4347_v27 = vmax.f32 %v4329_v39, 0.0  ;;  %v5163_v25 = vld [vmem:[#allocation11 + $0x1] ss:$0 sm:$0xff] }
0x1e52   :  { %v4346_v1 = vmax.f32 %v4278_v15, 0.0  ;;  %v4348_v30 = vmax.f32 %v4331_v19, 0.0  ;;  %v4353_v31 = vpack.c.bf16 %v4345_v26, %v4341_v59  ;;  %v4355_v48 = vpack.c.bf16 %v4347_v27, %v4343_v45  ;;  %v5984_v27 = vld [vmem:[%s7297_s12 + $0x38] sm:$0xff]   ;;  %v5989_v59 = vld [vmem:[%s7297_s12 + $0x10] sm:$0xff]   ;;  %v5990_v45 = vld [vmem:[%s7297_s12 + $0x8] sm:$0xff]  }
0x1e53   :  { %5704 = vmatprep.subr.bf16.mxu1 %v5984_v27 }
0x1e54   :  { %v4354_v20 = vpack.c.bf16 %v4346_v1, %v4342_v42  ;;  %v4356_v17 = vpack.c.bf16 %v4348_v30, %v4344_v44  ;;  %5705 = vmatpush3.bf16.msra.mxu1 %v5984_v27  ;;  %v5985_v42 = vld [vmem:[%s7297_s12 + $0x30] sm:$0xff]   ;;  %v5986_v44 = vld [vmem:[%s7297_s12 + $0x28] sm:$0xff]   ;;  %v5987_v1 = vld [vmem:[%s7297_s12 + $0x20] sm:$0xff]  }
0x1e55   :  { %5706 = vmatprep.subr.bf16.mxu1 %v5985_v42  ;;  %v5988_v30 = vld [vmem:[%s7297_s12 + $0x18] sm:$0xff]  }
0x1e56   :  { %4662 = vmatprep.mubr.bf16.mxu1 %v4354_v20  ;;  %4711 = vmatprep.mubr.bf16.mxu0 %v4356_v17  ;;  %v5991_v20 = vld [vmem:[%s7297_s12] sm:$0xff]  }
0x1e57   :  { %4663 = vmatmul.mubr.bf16.gmra.mxu1 %v4353_v31  ;;  %4712 = vmatmul.mubr.bf16.gmra.mxu0 %v4355_v48 }
0x1e58   :  { %5707 = vmatpush3.bf16.msra.mxu1 %v5985_v42 }
0x1e59   :  { %5708 = vmatprep.subr.bf16.mxu1 %v5986_v44 }
0x1e5c   :  { %5709 = vmatpush3.bf16.msra.mxu1 %v5986_v44 }
0x1e5d   :  { %5710 = vmatprep.subr.bf16.mxu1 %v5987_v1 }
0x1e60   :  { %5711 = vmatpush3.bf16.msra.mxu1 %v5987_v1 }
0x1e61   :  { %5712 = vmatprep.subr.bf16.mxu1 %v5988_v30 }
0x1e64   :  { %5713 = vmatpush3.bf16.msra.mxu1 %v5988_v30 }
0x1e65   :  { %5714 = vmatprep.subr.bf16.mxu1 %v5989_v59 }
0x1e68   :  { %5715 = vmatpush3.bf16.msra.mxu1 %v5989_v59 }
0x1e69   :  { %5716 = vmatprep.subr.bf16.mxu1 %v5990_v45 }
0x1e6c   :  { %5717 = vmatpush3.bf16.msra.mxu1 %v5990_v45 }
0x1e6d   :  { %5718 = vmatprep.subr.bf16.mxu1 %v5991_v20 }
0x1e70   :  { %5719 = vmatpush3.bf16.msra.mxu1 %v5991_v20 }
0x1f0f   :  { %v5382_v12 = vpop.f32.mrf.mxu1  ;;  %v5410_v6 = vpop.f32.mrf.mxu0 }
0x1f11   :  { %v5383_v38 = vpop.f32.mrf.mxu1  ;;  %v5411_v40 = vpop.f32.mrf.mxu0 }
0x1f12   :  { %v5384_v33 = vadd.f32 %v5383_v38, %v5382_v12  ;;  %v5412_v52 = vadd.f32 %v5411_v40, %v5410_v6 }
0x1f13   :  { %v5385_v24 = vpop.f32.mrf.mxu1  ;;  %v5413_v14 = vpop.f32.mrf.mxu0 }
0x1f14   :  { %v4657_v36 = vadd.f32 %v5384_v33, %v5163_v25 }
0x1f15   :  { %v5386_v53 = vpop.f32.mrf.mxu1  ;;  %v5414_v55 = vpop.f32.mrf.mxu0 }
0x1f16   :  { %v4706_v56 = vadd.f32 %v5412_v52, %v4657_v36  ;;  %v5387_v57 = vadd.f32 %v5386_v53, %v5385_v24  ;;  %v5415_v63 = vadd.f32 %v5414_v55, %v5413_v14  ;;  %v5196_v55 = vld [vmem:[%s7295_s10] ss:$0 sm:$0xff]  ;;  %s6335_s10 = smov [#allocation14]  }
0x1f17   :  { %v5388_v37 = vpop.f32.mrf.mxu1  ;;  %v5416_v62 = vpop.f32.mrf.mxu0  ;;  %s4914_s18 = sshll.u32 %s6335_s10, 4  ;;  %s4915_s18 = int_to_ptr.vmem [resolvable:$true] %s4914_s18 }
0x1f18   :  { %v4660_v18 = vadd.f32 %v5387_v57, %v5163_v25  ;;  %v4720_v34 = vadd.f32 %v4706_v56, %v7193_v58  ;;  %s6288_s3 = scalar_lea.vmem %s4915_s18, 512  ;;  %p6293_p3 = scmp.lt.s32.totalorder %s4915_s18, %s4915_s18 }
0x1f19   :  { %v5389_v21 = vpop.f32.mrf.mxu1  ;;  %v5417_v49 = vpop.f32.mrf.mxu0  ;;  %p6289_p2 = scmp.ne.s32.totalorder %s4915_s18, %s6288_s3  ;;  %p6294_p4 = scmp.lt.s32.totalorder %s6288_s3, %s6288_s3 }
0x1f1a   :  { %v4709_v43 = vadd.f32 %v5415_v63, %v4660_v18  ;;  %v5390_v22 = vadd.f32 %v5389_v21, %v5388_v37  ;;  %4726 = vadd.xlane.f32.xlu0 %v4720_v34  ;;  %v5418_v5 = vadd.f32 %v5417_v49, %v5416_v62  ;;  %v5197_v62 = vld [vmem:[#allocation12] ss:$0 sm:$0xff] }
0x1f1b   :  { %v5391_v3 = vpop.f32.mrf.mxu1  ;;  %v5419_v35 = vpop.f32.mrf.mxu0  ;;  %p6295_p5 = por %p6294_p4, %p6293_p3 }
0x1f1c   :  { %v4665_v23 = vadd.f32 %v5390_v22, %v5163_v25  ;;  %v4721_v28 = vadd.f32 %v4709_v43, %v7200_v50 }
0x1f1d   :  { %v5392_v29 = vpop.f32.mrf.mxu1  ;;  %v5420_v32 = vpop.f32.mrf.mxu0  ;;  %p6296_p6 = pnand %p6295_p5, %p6289_p2 }
0x1f1e   :  { %v4714_v7 = vadd.f32 %v5418_v5, %v4665_v23  ;;  %v5393_v8 = vadd.f32 %v5392_v29, %v5391_v3  ;;  %4728 = vadd.xlane.f32.xlu1 %v4721_v28  ;;  %v5421_v54 = vadd.f32 %v5420_v32, %v5419_v35 }
0x1f20   :  { %v4668_v51 = vadd.f32 %v5393_v8, %v5163_v25  ;;  %v4722_v58 = vadd.f32 %v4714_v7, %v7197_v47 }
0x1f22   :  { %v4717_v60 = vadd.f32 %v5421_v54, %v4668_v51  ;;  %4730 = vadd.xlane.f32.xlu0 %v4722_v58 }
0x1f24   :  { %v4723_v10 = vadd.f32 %v4717_v60, %v7205_v11 }
0x1f26   :  { %4732 = vadd.xlane.f32.xlu1 %v4723_v10 }
0x1fa3   :  { %v4727_v41 = vpop.xlane.xlu0 %4726 }
0x1fa4   :  { %v4734_v61 = vmul.f32 0.0078125, %v4727_v41 }
0x1fa6   :  { %v4738_v0 = vsub.f32 %v4720_v34, %v4734_v61 }
0x1fa7   :  { %v4729_v9 = vpop.xlane.xlu1 %4728 }
0x1fa8   :  { %v4735_v13 = vmul.f32 0.0078125, %v4729_v9  ;;  %v4742_v50 = vmul.f32 %v4738_v0, %v4738_v0 }
0x1faa   :  { %v4739_v39 = vsub.f32 %v4721_v28, %v4735_v13  ;;  %4746 = vadd.xlane.f32.xlu0 %v4742_v50 }
0x1fab   :  { %v4731_v46 = vpop.xlane.xlu0 %4730 }
0x1fac   :  { %v4736_v2 = vmul.f32 0.0078125, %v4731_v46  ;;  %v4743_v4 = vmul.f32 %v4739_v39, %v4739_v39 }
0x1fae   :  { %v4740_v16 = vsub.f32 %v4722_v58, %v4736_v2  ;;  %4748 = vadd.xlane.f32.xlu1 %v4743_v4 }
0x1faf   :  { %v4733_v15 = vpop.xlane.xlu1 %4732 }
0x1fb0   :  { %v4737_v47 = vmul.f32 0.0078125, %v4733_v15  ;;  %v4744_v19 = vmul.f32 %v4740_v16, %v4740_v16 }
0x1fb2   :  { %v4741_v26 = vsub.f32 %v4723_v10, %v4737_v47  ;;  %4750 = vadd.xlane.f32.xlu0 %v4744_v19 }
0x1fb4   :  { %v4745_v11 = vmul.f32 %v4741_v26, %v4741_v26 }
0x1fb6   :  { %4752 = vadd.xlane.f32.xlu1 %v4745_v11 }
0x2033   :  { %v4747_v17 = vpop.xlane.xlu0 %4746 }
0x2034   :  { %v4754_v31 = vmul.f32 0.0078125, %v4747_v17 }
0x2036   :  { %v4758_v48 = vadd.f32 1e-05, %v4754_v31 }
0x2037   :  { %v4749_v12 = vpop.xlane.xlu1 %4748 }
0x2038   :  { %6152 = vrsqrt.f32 %v4758_v48  ;;  %v4755_v6 = vmul.f32 0.0078125, %v4749_v12 }
0x203a   :  { %v4759_v25 = vadd.f32 1e-05, %v4755_v6 }
0x203b   :  { %v4751_v38 = vpop.xlane.xlu0 %4750 }
0x203c   :  { %6154 = vrsqrt.f32 %v4759_v25  ;;  %v4756_v40 = vmul.f32 0.0078125, %v4751_v38 }
0x203e   :  { %v4760_v33 = vadd.f32 1e-05, %v4756_v40 }
0x203f   :  { %v4753_v24 = vpop.xlane.xlu1 %4752 }
0x2040   :  { %6156 = vrsqrt.f32 %v4760_v33  ;;  %v4757_v14 = vmul.f32 0.0078125, %v4753_v24 }
0x2042   :  { %v4761_v36 = vadd.f32 1e-05, %v4757_v14 }
0x2044   :  { %6158 = vrsqrt.f32 %v4761_v36 }
0x2045   :  { %v6153_v52 = vpop.eup %6152 }
0x2046   :  { %v4766_v53 = vmul.f32 %v6153_v52, %v4738_v0 }
0x2048   :  { %v4776_v37 = vmul.f32 %v5196_v55, %v4766_v53 }
0x2049   :  { %v6155_v56 = vpop.eup %6154 }
0x204a   :  { %v4767_v57 = vmul.f32 %v6155_v56, %v4739_v39  ;;  %v4786_v21 = vadd.f32 %v5197_v62, %v4776_v37 }
0x204c   :  { %v4777_v18 = vmul.f32 %v5196_v55, %v4767_v57 }
0x204d   :  { %v6157_v63 = vpop.eup %6156 }
0x204e   :  { %v4768_v34 = vmul.f32 %v6157_v63, %v4740_v16  ;;  %v4787_v49 = vadd.f32 %v5197_v62, %v4777_v18 }
0x2050   :  { %v4790_v43 = vpack.c.bf16 %v4787_v49, %v4786_v21  ;;  %v4778_v35 = vmul.f32 %v5196_v55, %v4768_v34 }
0x2051   :  { %v6159_v22 = vpop.eup %6158 }
0x2052   :  { %v4769_v3 = vmul.f32 %v6159_v22, %v4741_v26  ;;  %5720 = vmatprep.mubr.bf16.mxu1 %v4790_v43  ;;  %v4788_v5 = vadd.f32 %v5197_v62, %v4778_v35 }
0x2054   :  { %v4779_v23 = vmul.f32 %v5196_v55, %v4769_v3 }
0x2056   :  { %v4789_v28 = vadd.f32 %v5197_v62, %v4779_v23 }
0x2058   :  { %v4791_v29 = vpack.c.bf16 %v4789_v28, %v4788_v5 }
0x205a   :  { %5721 = vmatmul.mubr.bf16.vlgmr.msra.gmra.mxu1 %v4791_v29 }
0x211a   :  { %v5722_v32 = vpop.f32.mrf.mxu1 }
0x211b   :  { %4907 = vst [vmem:[#allocation14 + $0x10] sm:$0xff] %v5722_v32 }
0x211c   :  { %v4890_v7 = vpop.f32.mrf.mxu1 }
0x211d   :  { %4905 = vst [vmem:[#allocation14] sm:$0xff] %v4890_v7 }
0x211e   :  { %v5723_v8 = vpop.f32.mrf.mxu1 }
0x211f   :  { %4908 = vst [vmem:[#allocation14 + $0x18] sm:$0xff] %v5723_v8 }
0x2120   :  { %v4893_v51 = vpop.f32.mrf.mxu1 }
0x2121   :  { %4906 = vst [vmem:[#allocation14 + $0x8] sm:$0xff] %v4893_v51 }
0x2122   :  { %6299 = shalt.err (!%p6296_p6)
}
0x2123   :  { %s6336_s19 = smov 128   ;;  %s6337_s6 = smov 8  }
0x2124   :  { %4920 = dma.vmem_to_hbm [thread:$0]  %s4915_s18, 512, %s7298_s13, [#allocation5], %s6336_s19, %s6336_s19, %s6337_s6  }
0x2125   :  { %6316 = dma.done.wait [#allocation5], 512  }
0x2126   :  { %6317 = vsyncadd [#allocation5], 4294966784 }
0x2127   :  { %4924 = vsyncpa [#allocation4], 1 }
0x2128   :  { %4925 = vsyncpa [#allocation7], 1 }
0x2129   :  { %4926 = vsyncpa [#allocation10], 1 }
0x212a   :  { %4927 = vsyncpa [#allocation13], 1 }
0x212b   :  { %4928 = vsyncpa [#allocation5], 1 }

</bundles_post_ra>
